<compile_context>
chip_gen: v7x
topology: tpu7x:2x2x1
jax: 0.10.0
libtpu: 0.0.40
codegen_flags: <defaults>
</compile_context>

<pallas_src>
import jax
import jax.numpy as jnp
from jax import lax
from jax.experimental import pallas as pl
from jax.experimental.pallas import tpu as pltpu


LANE = 128


def _round_up(n, m):
    return ((n + m - 1) // m) * m


# ------------------------------ Pallas kernels ----------------------------- #
def _head_and_store(acc, bconv_ref, pool_ref, wcls_ref, bcls_ref, out_ref):
    """Shared tail: bias + ReLU + GAP (MXU pooling matmul) + classifier."""
    h = jnp.maximum(acc + bconv_ref[...], 0.0)                   # (TB*HW, F_PAD)
    feat = jnp.dot(pool_ref[...], h,
                   preferred_element_type=jnp.float32)           # (TB, F_PAD)
    logits = jnp.dot(feat, wcls_ref[...],
                     preferred_element_type=jnp.float32) + bcls_ref[...]
    out_ref[0] = logits                                          # (TB, NC_PAD)


def fused_im2col_kernel(img_ref, wconv_ref, bconv_ref, pool_ref, wcls_ref,
                        bcls_ref, out_ref, acc_ref):
    """One batch tile per grid step; 3x3 patches are formed in-kernel.

    img_ref  : (TB, H+2, W+2, C)   zero-padded NHWC image tile
    wconv_ref: (9, C, F_PAD)       conv weight, one (C, F_PAD) slab per tap
    bconv_ref: (1, F_PAD)          conv bias (zero-padded)
    pool_ref : (TB, TB*H*W)        block-diagonal 1/HW pooling matrix
    wcls_ref : (F_PAD, NC_PAD)     classifier weight (zero-padded)
    bcls_ref : (1, NC_PAD)         classifier bias (zero-padded)
    out_ref  : (1, TB, NC_PAD)     lane-dense per-tile output block
    acc_ref  : (TB*H*W, F_PAD)     VMEM scratch conv accumulator
    """
    TB, H2, W2, C = img_ref.shape
    H, W = H2 - 2, W2 - 2
    HW = H * W
    k = 0
    for di in range(3):
        for dj in range(3):
            # Shifted 3x3-tap window; static offsets, lane dim untouched.
            win = img_ref[:, di:di + H, dj:dj + W, :]            # (TB, H, W, C)
            rows = win.reshape(TB * HW, C)
            contrib = jnp.dot(rows, wconv_ref[k],
                              preferred_element_type=jnp.float32)
            if k == 0:
                acc_ref[...] = contrib
            else:
                acc_ref[...] += contrib
            k += 1
    _head_and_store(acc_ref[...], bconv_ref, pool_ref, wcls_ref, bcls_ref,
                    out_ref)


def host_im2col_kernel(p_ref, wconv_ref, bconv_ref, pool_ref, wcls_ref,
                       bcls_ref, out_ref):
    """Fallback: patches were built (and K zero-padded to 128) on the host."""
    TB, HW, K = p_ref.shape
    rows = p_ref[...].reshape(TB * HW, K)
    acc = jnp.dot(rows, wconv_ref[...], preferred_element_type=jnp.float32)
    _head_and_store(acc, bconv_ref, pool_ref, wcls_ref, bcls_ref, out_ref)


# -------------------------------- wrapper ---------------------------------- #
def cassva_forward(x_nchw, params, *, tile_b=None, in_kernel_im2col=True):
    """x_nchw: [B, C, H, W] float32 -> logits [B, n_class] float32."""
    wconv, bconv, wcls, bcls = params        # (3,3,C,F), (F,), (F,NC), (NC,)
    B, C, H, W = x_nchw.shape
    F = wconv.shape[-1]
    NC = wcls.shape[-1]
    HW = H * W

    if tile_b is None:
        tile_b = B if B <= 8 else 8
    assert B % tile_b == 0, "batch must be divisible by tile_b"
    num_tiles = B // tile_b

    F_PAD = _round_up(F, LANE)
    NC_PAD = _round_up(NC, LANE)

    x_nhwc = jnp.transpose(x_nchw, (0, 2, 3, 1))                 # NCHW -> NHWC

    # Zero-padded parameters: padded feature columns stay exactly 0 through
    # bias/ReLU/GAP, padded logit columns are exactly 0 and sliced off below.
    wconv_p = jnp.pad(wconv, ((0, 0), (0, 0), (0, 0), (0, F_PAD - F)))
    bconv_p = jnp.pad(bconv, (0, F_PAD - F)).reshape(1, F_PAD)
    wcls_p = jnp.pad(wcls, ((0, F_PAD - F), (0, NC_PAD - NC)))
    bcls_p = jnp.pad(bcls, (0, NC_PAD - NC)).reshape(1, NC_PAD)
    # Block-diagonal GAP matrix: feat = pool @ relu(conv + bias)  (MXU, not XLU)
    pool = jnp.repeat(jnp.eye(tile_b, dtype=jnp.float32), HW, axis=1) / HW

    common_specs = [
        pl.BlockSpec((1, F_PAD), lambda t: (0, 0)),              # conv bias
        pl.BlockSpec((tile_b, tile_b * HW), lambda t: (0, 0)),   # pooling mat
        pl.BlockSpec((F_PAD, NC_PAD), lambda t: (0, 0)),         # cls weight
        pl.BlockSpec((1, NC_PAD), lambda t: (0, 0)),             # cls bias
    ]
    out_spec = pl.BlockSpec((1, tile_b, NC_PAD), lambda t: (t, 0, 0))
    out_shape = jax.ShapeDtypeStruct((num_tiles, tile_b, NC_PAD), jnp.float32)
    cparams = pltpu.CompilerParams(
        dimension_semantics=("parallel",),       # safe: per-tile output block
        vmem_limit_bytes=32 * 1024 * 1024)

    if in_kernel_im2col:
        # 1x HBM traffic: ship only the zero-padded NHWC image; the 3x3
        # windows are formed inside the kernel (9 shifted loads + dots).
        xpad = jnp.pad(x_nhwc, ((0, 0), (1, 1), (1, 1), (0, 0)))
        wconv9 = wconv_p.reshape(9, C, F_PAD)
        grid_spec = pltpu.PrefetchScalarGridSpec(
            num_scalar_prefetch=0,
            grid=(num_tiles,),
            in_specs=[pl.BlockSpec((tile_b, H + 2, W + 2, C),
                                   lambda t: (t, 0, 0, 0)),
                      pl.BlockSpec((9, C, F_PAD), lambda t: (0, 0, 0)),
                      *common_specs],
            out_specs=out_spec,
            scratch_shapes=[pltpu.VMEM((tile_b * HW, F_PAD), jnp.float32)])
        out = pl.pallas_call(
            fused_im2col_kernel, out_shape=out_shape, grid_spec=grid_spec,
            compiler_params=cparams,
        )(xpad, wconv9, bconv_p, pool, wcls_p, bcls_p)
    else:
        # Fallback path: host-side im2col (9x duplicated patches), K -> 128.
        K = 9 * C
        K_PAD = _round_up(K, LANE)
        xp = jnp.pad(x_nhwc, ((0, 0), (1, 1), (1, 1), (0, 0)))
        cols = [xp[:, di:di + H, dj:dj + W, :]
                for di in range(3) for dj in range(3)]
        patches = jnp.concatenate(cols, axis=-1).reshape(B, HW, K)
        patches = jnp.pad(patches, ((0, 0), (0, 0), (0, K_PAD - K)))
        wconv_flat = jnp.pad(wconv_p.reshape(K, F_PAD),
                             ((0, K_PAD - K), (0, 0)))
        grid_spec = pltpu.PrefetchScalarGridSpec(
            num_scalar_prefetch=0,
            grid=(num_tiles,),
            in_specs=[pl.BlockSpec((tile_b, HW, K_PAD), lambda t: (t, 0, 0)),
                      pl.BlockSpec((K_PAD, F_PAD), lambda t: (0, 0)),
                      *common_specs],
            out_specs=out_spec,
            scratch_shapes=[])
        out = pl.pallas_call(
            host_im2col_kernel, out_shape=out_shape, grid_spec=grid_spec,
            compiler_params=cparams,
        )(patches, wconv_flat, bconv_p, pool, wcls_p, bcls_p)

    return out.reshape(B, NC_PAD)[:, :NC]


# --------------------------- pure-JAX reference ----------------------------- #
def cassva_forward_ref(x_nchw, params):
    wconv, bconv, wcls, bcls = params
    x_nhwc = jnp.transpose(x_nchw, (0, 2, 3, 1))
    h = lax.conv_general_dilated(
        x_nhwc, wconv, window_strides=(1, 1), padding="SAME",
        dimension_numbers=("NHWC", "HWIO", "NHWC"))
    h = jax.nn.relu(h + bconv)
    feat = jnp.mean(h, axis=(1, 2))                              # GAP -> (B, F)
    return feat @ wcls + bcls


# ----------------------------------- main ----------------------------------- #
if __name__ == "__main__":
    # Small shapes consistent with the module's forward: image batch in NCHW.
    B, C, H, W = 2, 4, 16, 16
    F = 32            # classifier.in_features of the synthetic backbone
    N_CLASS = 5       # cassava: 5 classes

    key = jax.random.PRNGKey(0)
    kx, kw1, kb1, kw2, kb2 = jax.random.split(key, 5)

    x = jax.random.normal(kx, (B, C, H, W), dtype=jnp.float32)
    wconv = jax.random.normal(kw1, (3, 3, C, F), dtype=jnp.float32) * 0.1
    bconv = jax.random.normal(kb1, (F,), dtype=jnp.float32) * 0.05
    wcls = jax.random.normal(kw2, (F, N_CLASS), dtype=jnp.float32) * 0.1
    bcls = jax.random.normal(kb2, (N_CLASS,), dtype=jnp.float32) * 0.05
    params = (wconv, bconv, wcls, bcls)

    ref = jax.block_until_ready(cassva_forward_ref(x, params))

    def _run(in_kernel_im2col):
        out = jax.block_until_ready(
            cassva_forward(x, params, in_kernel_im2col=in_kernel_im2col))
        # f32 MXU matmuls vs the XLA conv/mean reference accumulate in
        # different orders; tolerance reflects that, not an approximation.
        ok = (out.shape == (B, N_CLASS) and out.dtype == jnp.float32 and
              bool(jnp.allclose(out, ref, atol=1e-3, rtol=1e-3)))
        return out, ok

    try:
        out, ok = _run(True)          # primary: in-kernel im2col (1x HBM)
    except Exception:                 # portability net for older Mosaic
        out, ok = None, False
    if not ok:
        out, ok = _run(False)         # fallback: host-im2col kernel

    assert ok, (out, ref)

    # TODO(synk): the real timm backbone (EfficientNet/ResNeXt/...) has many
    # conv stages; a single 3x3 conv + GAP stands in for the feature extractor.
    print("KERNEL_OK")
</pallas_src>

<mosaic_0001>
module attributes {stable_mosaic.version = 11 : i64} {
  func.func @fused_im2col_kernel(%arg0: i32, %arg1: memref<2x18x18x4xf32, #tpu.memory_space<vmem>>, %arg2: memref<9x4x128xf32, #tpu.memory_space<vmem>>, %arg3: memref<1x128xf32, #tpu.memory_space<vmem>>, %arg4: memref<2x512xf32, #tpu.memory_space<vmem>>, %arg5: memref<128x128xf32, #tpu.memory_space<vmem>>, %arg6: memref<1x128xf32, #tpu.memory_space<vmem>>, %arg7: memref<1x2x128xf32, #tpu.memory_space<vmem>>, %arg8: memref<512x128xf32, #tpu.memory_space<vmem>>) attributes {dimension_semantics = [#tpu.dimension_semantics<parallel>], iteration_bounds = array<i64: 1>, scalar_prefetch = 0 : i64, scratch_operands = 1 : i64, tpu.core_type = #tpu.core_type<tc>, window_params = [{transform_indices = @transform_0, window_bounds = array<i64: 2, 18, 18, 4>}, {pipeline_mode = #tpu.pipeline_mode<synchronous>, transform_indices = @transform_1, window_bounds = array<i64: 9, 4, 128>}, {pipeline_mode = #tpu.pipeline_mode<synchronous>, transform_indices = @transform_2, window_bounds = array<i64: 1, 128>}, {pipeline_mode = #tpu.pipeline_mode<synchronous>, transform_indices = @transform_3, window_bounds = array<i64: 2, 512>}, {pipeline_mode = #tpu.pipeline_mode<synchronous>, transform_indices = @transform_4, window_bounds = array<i64: 128, 128>}, {pipeline_mode = #tpu.pipeline_mode<synchronous>, transform_indices = @transform_5, window_bounds = array<i64: 1, 128>}, {transform_indices = @transform_6, window_bounds = array<i64: 1, 2, 128>}]} {
    %c0 = arith.constant 0 : index
    %c0_0 = arith.constant 0 : index
    %c0_1 = arith.constant 0 : index
    %c0_2 = arith.constant 0 : index
    %0 = vector.load %arg1[%c0, %c0_0, %c0_1, %c0_2] : memref<2x18x18x4xf32, #tpu.memory_space<vmem>>, vector<2x16x16x4xf32>
    %1 = vector.shape_cast %0 : vector<2x16x16x4xf32> to vector<512x4xf32>
    %c0_3 = arith.constant 0 : index
    %c0_4 = arith.constant 0 : index
    %c0_5 = arith.constant 0 : index
    %2 = vector.load %arg2[%c0_3, %c0_4, %c0_5] : memref<9x4x128xf32, #tpu.memory_space<vmem>>, vector<1x4x128xf32>
    %3 = vector.shape_cast %2 : vector<1x4x128xf32> to vector<4x128xf32>
    %cst = arith.constant dense<0.000000e+00> : vector<512x128xf32>
    %4 = tpu.matmul %1, %3, %cst {dimension_numbers = #tpu.dot_dimension_numbers<[1], [0], [0], [1], [0, 0, 1, 1], [], []>} : vector<512x4xf32>, vector<4x128xf32>, vector<512x128xf32> -> vector<512x128xf32>
    %c0_6 = arith.constant 0 : index
    %c0_7 = arith.constant 0 : index
    %5 = vector.load %arg8[%c0_6, %c0_7] : memref<512x128xf32, #tpu.memory_space<vmem>>, vector<512x128xf32>
    tpu.vector_store %arg8[%c0_6, %c0_7], %4 {strides = array<i32>} : memref<512x128xf32, #tpu.memory_space<vmem>>, vector<512x128xf32>,
    %c0_8 = arith.constant 0 : index
    %c0_9 = arith.constant 0 : index
    %c1 = arith.constant 1 : index
    %c0_10 = arith.constant 0 : index
    %6 = vector.load %arg1[%c0_8, %c0_9, %c1, %c0_10] : memref<2x18x18x4xf32, #tpu.memory_space<vmem>>, vector<2x16x16x4xf32>
    %7 = vector.shape_cast %6 : vector<2x16x16x4xf32> to vector<512x4xf32>
    %c1_11 = arith.constant 1 : index
    %c0_12 = arith.constant 0 : index
    %c0_13 = arith.constant 0 : index
    %8 = vector.load %arg2[%c1_11, %c0_12, %c0_13] : memref<9x4x128xf32, #tpu.memory_space<vmem>>, vector<1x4x128xf32>
    %9 = vector.shape_cast %8 : vector<1x4x128xf32> to vector<4x128xf32>
    %cst_14 = arith.constant dense<0.000000e+00> : vector<512x128xf32>
    %10 = tpu.matmul %7, %9, %cst_14 {dimension_numbers = #tpu.dot_dimension_numbers<[1], [0], [0], [1], [0, 0, 1, 1], [], []>} : vector<512x4xf32>, vector<4x128xf32>, vector<512x128xf32> -> vector<512x128xf32>
    %c0_15 = arith.constant 0 : index
    %c0_16 = arith.constant 0 : index
    %11 = vector.load %arg8[%c0_15, %c0_16] : memref<512x128xf32, #tpu.memory_space<vmem>>, vector<512x128xf32>
    %12 = arith.addf %11, %10 : vector<512x128xf32>
    %c0_17 = arith.constant 0 : index
    %c0_18 = arith.constant 0 : index
    %13 = vector.load %arg8[%c0_17, %c0_18] : memref<512x128xf32, #tpu.memory_space<vmem>>, vector<512x128xf32>
    tpu.vector_store %arg8[%c0_17, %c0_18], %12 {strides = array<i32>} : memref<512x128xf32, #tpu.memory_space<vmem>>, vector<512x128xf32>,
    %c0_19 = arith.constant 0 : index
    %c0_20 = arith.constant 0 : index
    %c2 = arith.constant 2 : index
    %c0_21 = arith.constant 0 : index
    %14 = vector.load %arg1[%c0_19, %c0_20, %c2, %c0_21] : memref<2x18x18x4xf32, #tpu.memory_space<vmem>>, vector<2x16x16x4xf32>
    %15 = vector.shape_cast %14 : vector<2x16x16x4xf32> to vector<512x4xf32>
    %c2_22 = arith.constant 2 : index
    %c0_23 = arith.constant 0 : index
    %c0_24 = arith.constant 0 : index
    %16 = vector.load %arg2[%c2_22, %c0_23, %c0_24] : memref<9x4x128xf32, #tpu.memory_space<vmem>>, vector<1x4x128xf32>
    %17 = vector.shape_cast %16 : vector<1x4x128xf32> to vector<4x128xf32>
    %cst_25 = arith.constant dense<0.000000e+00> : vector<512x128xf32>
    %18 = tpu.matmul %15, %17, %cst_25 {dimension_numbers = #tpu.dot_dimension_numbers<[1], [0], [0], [1], [0, 0, 1, 1], [], []>} : vector<512x4xf32>, vector<4x128xf32>, vector<512x128xf32> -> vector<512x128xf32>
    %c0_26 = arith.constant 0 : index
    %c0_27 = arith.constant 0 : index
    %19 = vector.load %arg8[%c0_26, %c0_27] : memref<512x128xf32, #tpu.memory_space<vmem>>, vector<512x128xf32>
    %20 = arith.addf %19, %18 : vector<512x128xf32>
    %c0_28 = arith.constant 0 : index
    %c0_29 = arith.constant 0 : index
    %21 = vector.load %arg8[%c0_28, %c0_29] : memref<512x128xf32, #tpu.memory_space<vmem>>, vector<512x128xf32>
    tpu.vector_store %arg8[%c0_28, %c0_29], %20 {strides = array<i32>} : memref<512x128xf32, #tpu.memory_space<vmem>>, vector<512x128xf32>,
    %c0_30 = arith.constant 0 : index
    %c1_31 = arith.constant 1 : index
    %c0_32 = arith.constant 0 : index
    %c0_33 = arith.constant 0 : index
    %22 = vector.load %arg1[%c0_30, %c1_31, %c0_32, %c0_33] : memref<2x18x18x4xf32, #tpu.memory_space<vmem>>, vector<2x16x16x4xf32>
    %23 = vector.shape_cast %22 : vector<2x16x16x4xf32> to vector<512x4xf32>
    %c3 = arith.constant 3 : index
    %c0_34 = arith.constant 0 : index
    %c0_35 = arith.constant 0 : index
    %24 = vector.load %arg2[%c3, %c0_34, %c0_35] : memref<9x4x128xf32, #tpu.memory_space<vmem>>, vector<1x4x128xf32>
    %25 = vector.shape_cast %24 : vector<1x4x128xf32> to vector<4x128xf32>
    %cst_36 = arith.constant dense<0.000000e+00> : vector<512x128xf32>
    %26 = tpu.matmul %23, %25, %cst_36 {dimension_numbers = #tpu.dot_dimension_numbers<[1], [0], [0], [1], [0, 0, 1, 1], [], []>} : vector<512x4xf32>, vector<4x128xf32>, vector<512x128xf32> -> vector<512x128xf32>
    %c0_37 = arith.constant 0 : index
    %c0_38 = arith.constant 0 : index
    %27 = vector.load %arg8[%c0_37, %c0_38] : memref<512x128xf32, #tpu.memory_space<vmem>>, vector<512x128xf32>
    %28 = arith.addf %27, %26 : vector<512x128xf32>
    %c0_39 = arith.constant 0 : index
    %c0_40 = arith.constant 0 : index
    %29 = vector.load %arg8[%c0_39, %c0_40] : memref<512x128xf32, #tpu.memory_space<vmem>>, vector<512x128xf32>
    tpu.vector_store %arg8[%c0_39, %c0_40], %28 {strides = array<i32>} : memref<512x128xf32, #tpu.memory_space<vmem>>, vector<512x128xf32>,
    %c0_41 = arith.constant 0 : index
    %c1_42 = arith.constant 1 : index
    %c1_43 = arith.constant 1 : index
    %c0_44 = arith.constant 0 : index
    %30 = vector.load %arg1[%c0_41, %c1_42, %c1_43, %c0_44] : memref<2x18x18x4xf32, #tpu.memory_space<vmem>>, vector<2x16x16x4xf32>
    %31 = vector.shape_cast %30 : vector<2x16x16x4xf32> to vector<512x4xf32>
    %c4 = arith.constant 4 : index
    %c0_45 = arith.constant 0 : index
    %c0_46 = arith.constant 0 : index
    %32 = vector.load %arg2[%c4, %c0_45, %c0_46] : memref<9x4x128xf32, #tpu.memory_space<vmem>>, vector<1x4x128xf32>
    %33 = vector.shape_cast %32 : vector<1x4x128xf32> to vector<4x128xf32>
    %cst_47 = arith.constant dense<0.000000e+00> : vector<512x128xf32>
    %34 = tpu.matmul %31, %33, %cst_47 {dimension_numbers = #tpu.dot_dimension_numbers<[1], [0], [0], [1], [0, 0, 1, 1], [], []>} : vector<512x4xf32>, vector<4x128xf32>, vector<512x128xf32> -> vector<512x128xf32>
    %c0_48 = arith.constant 0 : index
    %c0_49 = arith.constant 0 : index
    %35 = vector.load %arg8[%c0_48, %c0_49] : memref<512x128xf32, #tpu.memory_space<vmem>>, vector<512x128xf32>
    %36 = arith.addf %35, %34 : vector<512x128xf32>
    %c0_50 = arith.constant 0 : index
    %c0_51 = arith.constant 0 : index
    %37 = vector.load %arg8[%c0_50, %c0_51] : memref<512x128xf32, #tpu.memory_space<vmem>>, vector<512x128xf32>
    tpu.vector_store %arg8[%c0_50, %c0_51], %36 {strides = array<i32>} : memref<512x128xf32, #tpu.memory_space<vmem>>, vector<512x128xf32>,
    %c0_52 = arith.constant 0 : index
    %c1_53 = arith.constant 1 : index
    %c2_54 = arith.constant 2 : index
    %c0_55 = arith.constant 0 : index
    %38 = vector.load %arg1[%c0_52, %c1_53, %c2_54, %c0_55] : memref<2x18x18x4xf32, #tpu.memory_space<vmem>>, vector<2x16x16x4xf32>
    %39 = vector.shape_cast %38 : vector<2x16x16x4xf32> to vector<512x4xf32>
    %c5 = arith.constant 5 : index
    %c0_56 = arith.constant 0 : index
    %c0_57 = arith.constant 0 : index
    %40 = vector.load %arg2[%c5, %c0_56, %c0_57] : memref<9x4x128xf32, #tpu.memory_space<vmem>>, vector<1x4x128xf32>
    %41 = vector.shape_cast %40 : vector<1x4x128xf32> to vector<4x128xf32>
    %cst_58 = arith.constant dense<0.000000e+00> : vector<512x128xf32>
    %42 = tpu.matmul %39, %41, %cst_58 {dimension_numbers = #tpu.dot_dimension_numbers<[1], [0], [0], [1], [0, 0, 1, 1], [], []>} : vector<512x4xf32>, vector<4x128xf32>, vector<512x128xf32> -> vector<512x128xf32>
    %c0_59 = arith.constant 0 : index
    %c0_60 = arith.constant 0 : index
    %43 = vector.load %arg8[%c0_59, %c0_60] : memref<512x128xf32, #tpu.memory_space<vmem>>, vector<512x128xf32>
    %44 = arith.addf %43, %42 : vector<512x128xf32>
    %c0_61 = arith.constant 0 : index
    %c0_62 = arith.constant 0 : index
    %45 = vector.load %arg8[%c0_61, %c0_62] : memref<512x128xf32, #tpu.memory_space<vmem>>, vector<512x128xf32>
    tpu.vector_store %arg8[%c0_61, %c0_62], %44 {strides = array<i32>} : memref<512x128xf32, #tpu.memory_space<vmem>>, vector<512x128xf32>,
    %c0_63 = arith.constant 0 : index
    %c2_64 = arith.constant 2 : index
    %c0_65 = arith.constant 0 : index
    %c0_66 = arith.constant 0 : index
    %46 = vector.load %arg1[%c0_63, %c2_64, %c0_65, %c0_66] : memref<2x18x18x4xf32, #tpu.memory_space<vmem>>, vector<2x16x16x4xf32>
    %47 = vector.shape_cast %46 : vector<2x16x16x4xf32> to vector<512x4xf32>
    %c6 = arith.constant 6 : index
    %c0_67 = arith.constant 0 : index
    %c0_68 = arith.constant 0 : index
    %48 = vector.load %arg2[%c6, %c0_67, %c0_68] : memref<9x4x128xf32, #tpu.memory_space<vmem>>, vector<1x4x128xf32>
    %49 = vector.shape_cast %48 : vector<1x4x128xf32> to vector<4x128xf32>
    %cst_69 = arith.constant dense<0.000000e+00> : vector<512x128xf32>
    %50 = tpu.matmul %47, %49, %cst_69 {dimension_numbers = #tpu.dot_dimension_numbers<[1], [0], [0], [1], [0, 0, 1, 1], [], []>} : vector<512x4xf32>, vector<4x128xf32>, vector<512x128xf32> -> vector<512x128xf32>
    %c0_70 = arith.constant 0 : index
    %c0_71 = arith.constant 0 : index
    %51 = vector.load %arg8[%c0_70, %c0_71] : memref<512x128xf32, #tpu.memory_space<vmem>>, vector<512x128xf32>
    %52 = arith.addf %51, %50 : vector<512x128xf32>
    %c0_72 = arith.constant 0 : index
    %c0_73 = arith.constant 0 : index
    %53 = vector.load %arg8[%c0_72, %c0_73] : memref<512x128xf32, #tpu.memory_space<vmem>>, vector<512x128xf32>
    tpu.vector_store %arg8[%c0_72, %c0_73], %52 {strides = array<i32>} : memref<512x128xf32, #tpu.memory_space<vmem>>, vector<512x128xf32>,
    %c0_74 = arith.constant 0 : index
    %c2_75 = arith.constant 2 : index
    %c1_76 = arith.constant 1 : index
    %c0_77 = arith.constant 0 : index
    %54 = vector.load %arg1[%c0_74, %c2_75, %c1_76, %c0_77] : memref<2x18x18x4xf32, #tpu.memory_space<vmem>>, vector<2x16x16x4xf32>
    %55 = vector.shape_cast %54 : vector<2x16x16x4xf32> to vector<512x4xf32>
    %c7 = arith.constant 7 : index
    %c0_78 = arith.constant 0 : index
    %c0_79 = arith.constant 0 : index
    %56 = vector.load %arg2[%c7, %c0_78, %c0_79] : memref<9x4x128xf32, #tpu.memory_space<vmem>>, vector<1x4x128xf32>
    %57 = vector.shape_cast %56 : vector<1x4x128xf32> to vector<4x128xf32>
    %cst_80 = arith.constant dense<0.000000e+00> : vector<512x128xf32>
    %58 = tpu.matmul %55, %57, %cst_80 {dimension_numbers = #tpu.dot_dimension_numbers<[1], [0], [0], [1], [0, 0, 1, 1], [], []>} : vector<512x4xf32>, vector<4x128xf32>, vector<512x128xf32> -> vector<512x128xf32>
    %c0_81 = arith.constant 0 : index
    %c0_82 = arith.constant 0 : index
    %59 = vector.load %arg8[%c0_81, %c0_82] : memref<512x128xf32, #tpu.memory_space<vmem>>, vector<512x128xf32>
    %60 = arith.addf %59, %58 : vector<512x128xf32>
    %c0_83 = arith.constant 0 : index
    %c0_84 = arith.constant 0 : index
    %61 = vector.load %arg8[%c0_83, %c0_84] : memref<512x128xf32, #tpu.memory_space<vmem>>, vector<512x128xf32>
    tpu.vector_store %arg8[%c0_83, %c0_84], %60 {strides = array<i32>} : memref<512x128xf32, #tpu.memory_space<vmem>>, vector<512x128xf32>,
    %c0_85 = arith.constant 0 : index
    %c2_86 = arith.constant 2 : index
    %c2_87 = arith.constant 2 : index
    %c0_88 = arith.constant 0 : index
    %62 = vector.load %arg1[%c0_85, %c2_86, %c2_87, %c0_88] : memref<2x18x18x4xf32, #tpu.memory_space<vmem>>, vector<2x16x16x4xf32>
    %63 = vector.shape_cast %62 : vector<2x16x16x4xf32> to vector<512x4xf32>
    %c8 = arith.constant 8 : index
    %c0_89 = arith.constant 0 : index
    %c0_90 = arith.constant 0 : index
    %64 = vector.load %arg2[%c8, %c0_89, %c0_90] : memref<9x4x128xf32, #tpu.memory_space<vmem>>, vector<1x4x128xf32>
    %65 = vector.shape_cast %64 : vector<1x4x128xf32> to vector<4x128xf32>
    %cst_91 = arith.constant dense<0.000000e+00> : vector<512x128xf32>
    %66 = tpu.matmul %63, %65, %cst_91 {dimension_numbers = #tpu.dot_dimension_numbers<[1], [0], [0], [1], [0, 0, 1, 1], [], []>} : vector<512x4xf32>, vector<4x128xf32>, vector<512x128xf32> -> vector<512x128xf32>
    %c0_92 = arith.constant 0 : index
    %c0_93 = arith.constant 0 : index
    %67 = vector.load %arg8[%c0_92, %c0_93] : memref<512x128xf32, #tpu.memory_space<vmem>>, vector<512x128xf32>
    %68 = arith.addf %67, %66 : vector<512x128xf32>
    %c0_94 = arith.constant 0 : index
    %c0_95 = arith.constant 0 : index
    %69 = vector.load %arg8[%c0_94, %c0_95] : memref<512x128xf32, #tpu.memory_space<vmem>>, vector<512x128xf32>
    tpu.vector_store %arg8[%c0_94, %c0_95], %68 {strides = array<i32>} : memref<512x128xf32, #tpu.memory_space<vmem>>, vector<512x128xf32>,
    %c0_96 = arith.constant 0 : index
    %c0_97 = arith.constant 0 : index
    %70 = vector.load %arg8[%c0_96, %c0_97] : memref<512x128xf32, #tpu.memory_space<vmem>>, vector<512x128xf32>
    %c0_98 = arith.constant 0 : index
    %c0_99 = arith.constant 0 : index
    %71 = vector.load %arg3[%c0_98, %c0_99] : memref<1x128xf32, #tpu.memory_space<vmem>>, vector<1x128xf32>
    %72 = vector.broadcast %71 : vector<1x128xf32> to vector<512x128xf32>
    %73 = arith.addf %70, %72 : vector<512x128xf32>
    %cst_100 = arith.constant 0.000000e+00 : f32
    %74 = vector.broadcast %cst_100 : f32 to vector<512x128xf32>
    %75 = arith.maximumf %73, %74 : vector<512x128xf32>
    %c0_101 = arith.constant 0 : index
    %c0_102 = arith.constant 0 : index
    %76 = vector.load %arg4[%c0_101, %c0_102] : memref<2x512xf32, #tpu.memory_space<vmem>>, vector<2x512xf32>
    %cst_103 = arith.constant dense<0.000000e+00> : vector<2x128xf32>
    %77 = tpu.matmul %76, %75, %cst_103 {dimension_numbers = #tpu.dot_dimension_numbers<[1], [0], [0], [1], [0, 0, 1, 1], [], []>} : vector<2x512xf32>, vector<512x128xf32>, vector<2x128xf32> -> vector<2x128xf32>
    %c0_104 = arith.constant 0 : index
    %c0_105 = arith.constant 0 : index
    %78 = vector.load %arg5[%c0_104, %c0_105] : memref<128x128xf32, #tpu.memory_space<vmem>>, vector<128x128xf32>
    %cst_106 = arith.constant dense<0.000000e+00> : vector<2x128xf32>
    %79 = tpu.matmul %77, %78, %cst_106 {dimension_numbers = #tpu.dot_dimension_numbers<[1], [0], [0], [1], [0, 0, 1, 1], [], []>} : vector<2x128xf32>, vector<128x128xf32>, vector<2x128xf32> -> vector<2x128xf32>
    %c0_107 = arith.constant 0 : index
    %c0_108 = arith.constant 0 : index
    %80 = vector.load %arg6[%c0_107, %c0_108] : memref<1x128xf32, #tpu.memory_space<vmem>>, vector<1x128xf32>
    %81 = vector.broadcast %80 : vector<1x128xf32> to vector<2x128xf32>
    %82 = arith.addf %79, %81 : vector<2x128xf32>
    %c0_109 = arith.constant 0 : index
    %c0_110 = arith.constant 0 : index
    %c0_111 = arith.constant 0 : index
    %83 = vector.load %arg7[%c0_109, %c0_110, %c0_111] : memref<1x2x128xf32, #tpu.memory_space<vmem>>, vector<1x2x128xf32>
    %84 = vector.shape_cast %83 : vector<1x2x128xf32> to vector<2x128xf32>
    %85 = vector.shape_cast %82 : vector<2x128xf32> to vector<1x2x128xf32>
    tpu.vector_store %arg7[%c0_109, %c0_110, %c0_111], %85 {strides = array<i32>} : memref<1x2x128xf32, #tpu.memory_space<vmem>>, vector<1x2x128xf32>,
    return
  }
  func.func @transform_0(%arg0: i32) -> (i32, i32, i32, i32) {
    %c0_i32 = arith.constant 0 : i32
    %c0_i32_0 = arith.constant 0 : i32
    %c0_i32_1 = arith.constant 0 : i32
    %c0_i32_2 = arith.constant 0 : i32
    return %arg0, %c0_i32, %c0_i32_0, %c0_i32_1 : i32, i32, i32, i32
  }
  func.func @transform_1(%arg0: i32) -> (i32, i32, i32) {
    %c0_i32 = arith.constant 0 : i32
    %c0_i32_0 = arith.constant 0 : i32
    %c0_i32_1 = arith.constant 0 : i32
    %c0_i32_2 = arith.constant 0 : i32
    return %c0_i32, %c0_i32_0, %c0_i32_1 : i32, i32, i32
  }
  func.func @transform_2(%arg0: i32) -> (i32, i32) {
    %c0_i32 = arith.constant 0 : i32
    %c0_i32_0 = arith.constant 0 : i32
    %c0_i32_1 = arith.constant 0 : i32
    return %c0_i32, %c0_i32_0 : i32, i32
  }
  func.func @transform_3(%arg0: i32) -> (i32, i32) {
    %c0_i32 = arith.constant 0 : i32
    %c0_i32_0 = arith.constant 0 : i32
    %c0_i32_1 = arith.constant 0 : i32
    return %c0_i32, %c0_i32_0 : i32, i32
  }
  func.func @transform_4(%arg0: i32) -> (i32, i32) {
    %c0_i32 = arith.constant 0 : i32
    %c0_i32_0 = arith.constant 0 : i32
    %c0_i32_1 = arith.constant 0 : i32
    return %c0_i32, %c0_i32_0 : i32, i32
  }
  func.func @transform_5(%arg0: i32) -> (i32, i32) {
    %c0_i32 = arith.constant 0 : i32
    %c0_i32_0 = arith.constant 0 : i32
    %c0_i32_1 = arith.constant 0 : i32
    return %c0_i32, %c0_i32_0 : i32, i32
  }
  func.func @transform_6(%arg0: i32) -> (i32, i32, i32) {
    %c0_i32 = arith.constant 0 : i32
    %c0_i32_0 = arith.constant 0 : i32
    %c0_i32_1 = arith.constant 0 : i32
    return %arg0, %c0_i32, %c0_i32_0 : i32, i32, i32
  }
}

module attributes {stable_mosaic.version = 11 : i64} {
  func.func @host_im2col_kernel(%arg0: i32, %arg1: memref<2x256x128xf32, #tpu.memory_space<vmem>>, %arg2: memref<128x128xf32, #tpu.memory_space<vmem>>, %arg3: memref<1x128xf32, #tpu.memory_space<vmem>>, %arg4: memref<2x512xf32, #tpu.memory_space<vmem>>, %arg5: memref<128x128xf32, #tpu.memory_space<vmem>>, %arg6: memref<1x128xf32, #tpu.memory_space<vmem>>, %arg7: memref<1x2x128xf32, #tpu.memory_space<vmem>>) attributes {dimension_semantics = [#tpu.dimension_semantics<parallel>], iteration_bounds = array<i64: 1>, scalar_prefetch = 0 : i64, scratch_operands = 0 : i64, tpu.core_type = #tpu.core_type<tc>, window_params = [{transform_indices = @transform_0, window_bounds = array<i64: 2, 256, 128>}, {pipeline_mode = #tpu.pipeline_mode<synchronous>, transform_indices = @transform_1, window_bounds = array<i64: 128, 128>}, {pipeline_mode = #tpu.pipeline_mode<synchronous>, transform_indices = @transform_2, window_bounds = array<i64: 1, 128>}, {pipeline_mode = #tpu.pipeline_mode<synchronous>, transform_indices = @transform_3, window_bounds = array<i64: 2, 512>}, {pipeline_mode = #tpu.pipeline_mode<synchronous>, transform_indices = @transform_4, window_bounds = array<i64: 128, 128>}, {pipeline_mode = #tpu.pipeline_mode<synchronous>, transform_indices = @transform_5, window_bounds = array<i64: 1, 128>}, {transform_indices = @transform_6, window_bounds = array<i64: 1, 2, 128>}]} {
    %c0 = arith.constant 0 : index
    %c0_0 = arith.constant 0 : index
    %c0_1 = arith.constant 0 : index
    %0 = vector.load %arg1[%c0, %c0_0, %c0_1] : memref<2x256x128xf32, #tpu.memory_space<vmem>>, vector<2x256x128xf32>
    %1 = vector.shape_cast %0 : vector<2x256x128xf32> to vector<512x128xf32>
    %c0_2 = arith.constant 0 : index
    %c0_3 = arith.constant 0 : index
    %2 = vector.load %arg2[%c0_2, %c0_3] : memref<128x128xf32, #tpu.memory_space<vmem>>, vector<128x128xf32>
    %cst = arith.constant dense<0.000000e+00> : vector<512x128xf32>
    %3 = tpu.matmul %1, %2, %cst {dimension_numbers = #tpu.dot_dimension_numbers<[1], [0], [0], [1], [0, 0, 1, 1], [], []>} : vector<512x128xf32>, vector<128x128xf32>, vector<512x128xf32> -> vector<512x128xf32>
    %c0_4 = arith.constant 0 : index
    %c0_5 = arith.constant 0 : index
    %4 = vector.load %arg3[%c0_4, %c0_5] : memref<1x128xf32, #tpu.memory_space<vmem>>, vector<1x128xf32>
    %5 = vector.broadcast %4 : vector<1x128xf32> to vector<512x128xf32>
    %6 = arith.addf %3, %5 : vector<512x128xf32>
    %cst_6 = arith.constant 0.000000e+00 : f32
    %7 = vector.broadcast %cst_6 : f32 to vector<512x128xf32>
    %8 = arith.maximumf %6, %7 : vector<512x128xf32>
    %c0_7 = arith.constant 0 : index
    %c0_8 = arith.constant 0 : index
    %9 = vector.load %arg4[%c0_7, %c0_8] : memref<2x512xf32, #tpu.memory_space<vmem>>, vector<2x512xf32>
    %cst_9 = arith.constant dense<0.000000e+00> : vector<2x128xf32>
    %10 = tpu.matmul %9, %8, %cst_9 {dimension_numbers = #tpu.dot_dimension_numbers<[1], [0], [0], [1], [0, 0, 1, 1], [], []>} : vector<2x512xf32>, vector<512x128xf32>, vector<2x128xf32> -> vector<2x128xf32>
    %c0_10 = arith.constant 0 : index
    %c0_11 = arith.constant 0 : index
    %11 = vector.load %arg5[%c0_10, %c0_11] : memref<128x128xf32, #tpu.memory_space<vmem>>, vector<128x128xf32>
    %cst_12 = arith.constant dense<0.000000e+00> : vector<2x128xf32>
    %12 = tpu.matmul %10, %11, %cst_12 {dimension_numbers = #tpu.dot_dimension_numbers<[1], [0], [0], [1], [0, 0, 1, 1], [], []>} : vector<2x128xf32>, vector<128x128xf32>, vector<2x128xf32> -> vector<2x128xf32>
    %c0_13 = arith.constant 0 : index
    %c0_14 = arith.constant 0 : index
    %13 = vector.load %arg6[%c0_13, %c0_14] : memref<1x128xf32, #tpu.memory_space<vmem>>, vector<1x128xf32>
    %14 = vector.broadcast %13 : vector<1x128xf32> to vector<2x128xf32>
    %15 = arith.addf %12, %14 : vector<2x128xf32>
    %c0_15 = arith.constant 0 : index
    %c0_16 = arith.constant 0 : index
    %c0_17 = arith.constant 0 : index
    %16 = vector.load %arg7[%c0_15, %c0_16, %c0_17] : memref<1x2x128xf32, #tpu.memory_space<vmem>>, vector<1x2x128xf32>
    %17 = vector.shape_cast %16 : vector<1x2x128xf32> to vector<2x128xf32>
    %18 = vector.shape_cast %15 : vector<2x128xf32> to vector<1x2x128xf32>
    tpu.vector_store %arg7[%c0_15, %c0_16, %c0_17], %18 {strides = array<i32>} : memref<1x2x128xf32, #tpu.memory_space<vmem>>, vector<1x2x128xf32>,
    return
  }
  func.func @transform_0(%arg0: i32) -> (i32, i32, i32) {
    %c0_i32 = arith.constant 0 : i32
    %c0_i32_0 = arith.constant 0 : i32
    %c0_i32_1 = arith.constant 0 : i32
    return %arg0, %c0_i32, %c0_i32_0 : i32, i32, i32
  }
  func.func @transform_1(%arg0: i32) -> (i32, i32) {
    %c0_i32 = arith.constant 0 : i32
    %c0_i32_0 = arith.constant 0 : i32
    %c0_i32_1 = arith.constant 0 : i32
    return %c0_i32, %c0_i32_0 : i32, i32
  }
  func.func @transform_2(%arg0: i32) -> (i32, i32) {
    %c0_i32 = arith.constant 0 : i32
    %c0_i32_0 = arith.constant 0 : i32
    %c0_i32_1 = arith.constant 0 : i32
    return %c0_i32, %c0_i32_0 : i32, i32
  }
  func.func @transform_3(%arg0: i32) -> (i32, i32) {
    %c0_i32 = arith.constant 0 : i32
    %c0_i32_0 = arith.constant 0 : i32
    %c0_i32_1 = arith.constant 0 : i32
    return %c0_i32, %c0_i32_0 : i32, i32
  }
  func.func @transform_4(%arg0: i32) -> (i32, i32) {
    %c0_i32 = arith.constant 0 : i32
    %c0_i32_0 = arith.constant 0 : i32
    %c0_i32_1 = arith.constant 0 : i32
    return %c0_i32, %c0_i32_0 : i32, i32
  }
  func.func @transform_5(%arg0: i32) -> (i32, i32) {
    %c0_i32 = arith.constant 0 : i32
    %c0_i32_0 = arith.constant 0 : i32
    %c0_i32_1 = arith.constant 0 : i32
    return %c0_i32, %c0_i32_0 : i32, i32
  }
  func.func @transform_6(%arg0: i32) -> (i32, i32, i32) {
    %c0_i32 = arith.constant 0 : i32
    %c0_i32_0 = arith.constant 0 : i32
    %c0_i32_1 = arith.constant 0 : i32
    return %arg0, %c0_i32, %c0_i32_0 : i32, i32, i32
  }
}

</mosaic_0001>

<bundles_post_ra>
// kernel: tpu_custom_call.1
= control target key start
LH: loop header
LB: loop body
LE: loop exit
PB: predicated region body
PF: predicated region fallthrough
CT: control target
= control target key end

     0   :  { %vm282_vm0 = vcmask 1043456   ;;  %vm89_vm1 = vcmask 31744   ;;  %s14075_s0 = inlined_call_operand.vmem [shape: f32[2,18,18,4], index: 0, kind: input, shape index: {}]   ;;  %s14076_s1 = inlined_call_operand.vmem [shape: f32[9,4,128], index: 1, kind: input, shape index: {}]   ;;  %s14077_s2 = inlined_call_operand.vmem [shape: f32[1,128], index: 2, kind: input, shape index: {}]   ;;  %s14078_s3 = inlined_call_operand.vmem [shape: f32[2,512], index: 3, kind: input, shape index: {}]   ;;  %s14079_s4 = inlined_call_operand.vmem [shape: f32[128,128], index: 4, kind: input, shape index: {}]   ;;  %s14080_s5 = inlined_call_operand.vmem [shape: f32[1,128], index: 5, kind: input, shape index: {}]   ;;  %s14081_s6 = inlined_call_operand.hbm [shape: f32[1,2,128], index: 6, kind: output, shape index: {}]  }
   0x1   :  { %v88_v0 = vld [vmem:[%s14076_s1] sm:$0xf]  ;;  %v8302_v1 = vld [vmem:[%s14076_s1 + $0x10] sm:$0xf]  ;;  %v25_v4 = vld [vmem:[%s14075_s0 + $0x8] sm:$0xff] }
   0x2   :  { %v24_v2 = vld [vmem:[%s14075_s0] sm:$0xff]  ;;  %9562 = vmatprep.subr.msk.mxu1 %vm282_vm0, %v88_v0  ;;  %9954 = vmatprep.subr.msk.mxu0 %vm282_vm0, %v8302_v1  ;;  %v26_v6 = vld [vmem:[%s14075_s0 + $0x18] sm:$0xff]  ;;  %v11203_v10 = vld [vmem:[%s14075_s0 + $0x30] sm:$0xff] }
   0x3   :  { %v11163_v3 = vld [vmem:[%s14075_s0 + $0x19] sm:$0xff]  ;;  %v11171_v5 = vld [vmem:[%s14075_s0 + $0x21] sm:$0xff]  ;;  %9563 = vmatpush3.msk.msra.mxu1 %vm282_vm0, %v88_v0  ;;  %9564 = vmatprep.mubr.msk.f32.mxu1 %vm89_vm1, %v24_v2  ;;  %v11181_v7 = vld [vmem:[%s14075_s0 + $0x31] sm:$0xff]  ;;  %14145 = vst [vmem:[#allocation6_spill] sm:$0xff] %v11203_v10 }
   0x4   :  { %9955 = vmatpush3.msk.msra.mxu0 %vm282_vm0, %v8302_v1  ;;  %9956 = vmatprep.mubr.msk.f32.mxu0 %vm89_vm1, %v11163_v3  ;;  %v27_v8 = vld [vmem:[%s14075_s0 + $0x20] sm:$0xff]  ;;  %v11208_v11 = vld [vmem:[%s14075_s0 + $0x49] sm:$0xff]  ;;  %v11220_v12 = vld [vmem:[%s14075_s0 + $0x38] sm:$0xff] }
   0x5   :  { %9565 = vmatmul.mubr.msk.f32.vlgmr.msra.gmra.mrb[0].mxu1 %vm89_vm1, %v25_v4  ;;  %9957 = vmatmul.mubr.msk.f32.vlgmr.msra.gmra.mrb[0].mxu0 %vm89_vm1, %v11171_v5  ;;  %v11198_v9 = vld [vmem:[%s14075_s0 + $0x39] sm:$0xff]  ;;  %14146 = vst [vmem:[#allocation7_spill] sm:$0xff] %v11220_v12  ;;  %v11225_v13 = vld [vmem:[%s14075_s0 + $0x51] sm:$0xff]  ;;  %v11230_v14 = vld [vmem:[%s14075_s0 + $0x48] sm:$0xff] }
   0x6   :  { %9567 = vmatprep.mubr.msk.f32.mxu1 %vm89_vm1, %v26_v6  ;;  %9959 = vmatprep.mubr.msk.f32.mxu0 %vm89_vm1, %v11181_v7  ;;  %14147 = vst [vmem:[#allocation8_spill] sm:$0xff] %v11230_v14  ;;  %v11235_v15 = vld [vmem:[%s14075_s0 + $0x61] sm:$0xff]  ;;  %v11248_v16 = vld [vmem:[%s14075_s0 + $0x50] sm:$0xff]  ;;  %v11263_v19 = vld [vmem:[%s14075_s0 + $0x79] sm:$0xff] }
   0x7   :  { %14148 = vst [vmem:[#allocation9_spill] sm:$0xff] %v11248_v16  ;;  %v11253_v17 = vld [vmem:[%s14075_s0 + $0x69] sm:$0xff]  ;;  %v11258_v18 = vld [vmem:[%s14075_s0 + $0x60] sm:$0xff]  ;;  %v11286_v22 = vld [vmem:[%s14075_s0 + $0x78] sm:$0xff] }
   0x8   :  { %14149 = vst [vmem:[#allocation10_spill] sm:$0xff] %v11258_v18  ;;  %v11276_v20 = vld [vmem:[%s14075_s0 + $0x68] sm:$0xff]  ;;  %14151 = vst [vmem:[#allocation12_spill] sm:$0xff] %v11286_v22  ;;  %v11291_v23 = vld [vmem:[%s14075_s0 + $0x91] sm:$0xff] }
   0x9   :  { %9568 = vmatmul.mubr.msk.f32.gmra.mrb[2].mxu1 %vm89_vm1, %v27_v8  ;;  %9960 = vmatmul.mubr.msk.f32.gmra.mrb[2].mxu0 %vm89_vm1, %v11198_v9  ;;  %14150 = vst [vmem:[#allocation11_spill] sm:$0xff] %v11276_v20  ;;  %v11281_v21 = vld [vmem:[%s14075_s0 + $0x81] sm:$0xff]  ;;  %v11309_v25 = vld [vmem:[%s14075_s0 + $0x99] sm:$0xff]  ;;  %v11314_v26 = vld [vmem:[%s14075_s0 + $0x90] sm:$0xff] }
   0xa   :  { %9570 = vmatprep.mubr.msk.f32.mxu1 %vm89_vm1, %v11203_v10  ;;  %9962 = vmatprep.mubr.msk.f32.mxu0 %vm89_vm1, %v11208_v11  ;;  %v11304_v24 = vld [vmem:[%s14075_s0 + $0x80] sm:$0xff]  ;;  %14153 = vst [vmem:[#allocation14_spill] sm:$0xff] %v11314_v26  ;;  %v11319_v27 = vld [vmem:[%s14075_s0 + $0xa9] sm:$0xff]  ;;  %v8432_v28 = vld [vmem:[%s14076_s1 + $0x14] sm:$0xf] }
   0xb   :  { %14152 = vst [vmem:[#allocation13_spill] sm:$0xff] %v11304_v24  ;;  %10052 = vmatprep.subr.msk.mxu0 %vm282_vm0, %v8432_v28  ;;  %v11336_v29 = vld [vmem:[%s14075_s0 + $0x98] sm:$0xff]  ;;  %v11346_v31 = vld [vmem:[%s14075_s0 + $0xa8] sm:$0xff]  ;;  %v11365_v33 = vld [vmem:[%s14075_s0 + $0xb0] sm:$0xff] }
   0xc   :  { %14154 = vst [vmem:[#allocation15_spill] sm:$0xff] %v11336_v29  ;;  %v11341_v30 = vld [vmem:[%s14075_s0 + $0xb1] sm:$0xff]  ;;  %14155 = vst [vmem:[#allocation16_spill] sm:$0xff] %v11346_v31  ;;  %v11351_v32 = vld [vmem:[%s14075_s0 + $0xc1] sm:$0xff]  ;;  %10053 = vmatpush3.msk.msra.mxu0 %vm282_vm0, %v8432_v28 }
   0xd   :  { %9571 = vmatmul.mubr.msk.f32.gmra.mrb[4].mxu1 %vm89_vm1, %v11220_v12  ;;  %9963 = vmatmul.mubr.msk.f32.gmra.mrb[4].mxu0 %vm89_vm1, %v11225_v13  ;;  %14156 = vst [vmem:[#allocation17_spill] sm:$0xff] %v11365_v33  ;;  %v11370_v34 = vld [vmem:[%s14075_s0 + $0xc9] sm:$0xff]  ;;  %v11375_v35 = vld [vmem:[%s14075_s0 + $0xc0] sm:$0xff]  ;;  %v11403_v39 = vld [vmem:[%s14075_s0 + $0xd8] sm:$0xff] }
   0xe   :  { %9573 = vmatprep.mubr.msk.f32.mxu1 %vm89_vm1, %v11230_v14  ;;  %9965 = vmatprep.mubr.msk.f32.mxu0 %vm89_vm1, %v11235_v15  ;;  %14157 = vst [vmem:[#allocation18_spill] sm:$0xff] %v11375_v35  ;;  %v11380_v36 = vld [vmem:[%s14075_s0 + $0xd9] sm:$0xff]  ;;  %v11393_v37 = vld [vmem:[%s14075_s0 + $0xc8] sm:$0xff]  ;;  %14159 = vst [vmem:[#allocation20_spill] sm:$0xff] %v11403_v39 }
   0xf   :  { %14158 = vst [vmem:[#allocation19_spill] sm:$0xff] %v11393_v37  ;;  %v11398_v38 = vld [vmem:[%s14075_s0 + $0xe1] sm:$0xff]  ;;  %v11408_v40 = vld [vmem:[%s14075_s0 + $0xf1] sm:$0xff]  ;;  %v11426_v42 = vld [vmem:[%s14075_s0 + $0xf9] sm:$0xff] }
  0x10   :  { %v11421_v41 = vld [vmem:[%s14075_s0 + $0xe0] sm:$0xff]  ;;  %v11431_v43 = vld [vmem:[%s14075_s0 + $0xf0] sm:$0xff]  ;;  %v11449_v45 = vld [vmem:[%s14075_s0 + $0xf8] sm:$0xff] }
  0x11   :  { %9574 = vmatmul.mubr.msk.f32.gmra.mrb[6].mxu1 %vm89_vm1, %v11248_v16  ;;  %9966 = vmatmul.mubr.msk.f32.gmra.mrb[6].mxu0 %vm89_vm1, %v11253_v17  ;;  %14160 = vst [vmem:[#allocation21_spill] sm:$0xff] %v11421_v41  ;;  %14161 = vst [vmem:[#allocation22_spill] sm:$0xff] %v11431_v43  ;;  %v11436_v44 = vld [vmem:[%s14075_s0 + $0x109] sm:$0xff]  ;;  %v11454_v46 = vld [vmem:[%s14075_s0 + $0x111] sm:$0xff] }
  0x12   :  { %9576 = vmatprep.mubr.msk.f32.mxu1 %vm89_vm1, %v11258_v18  ;;  %9968 = vmatprep.mubr.msk.f32.mxu0 %vm89_vm1, %v11263_v19  ;;  %14162 = vst [vmem:[#allocation23_spill] sm:$0xff] %v11449_v45  ;;  %v11459_v47 = vld [vmem:[%s14075_s0 + $0x108] sm:$0xff]  ;;  %v7976_v49 = vld [vmem:[%s14076_s1 + $0x4] sm:$0xf]  ;;  %v11480_v50 = vld [vmem:[%s14075_s0 + $0x110] sm:$0xff] }
  0x13   :  { %14163 = vst [vmem:[#allocation24_spill] sm:$0xff] %v11459_v47  ;;  %v11464_v48 = vld [vmem:[%s14075_s0 + $0x121] sm:$0xff]  ;;  %14164 = vst [vmem:[#allocation25_spill] sm:$0xff] %v11480_v50  ;;  %v11485_v51 = vld [vmem:[%s14075_s0 + $0x129] sm:$0xff]  ;;  %9660 = vmatprep.subr.msk.mxu1 %vm282_vm0, %v7976_v49 }
  0x14   :  { %v11490_v52 = vld [vmem:[%s14075_s0 + $0x120] sm:$0xff]  ;;  %9661 = vmatpush3.msk.msra.mxu1 %vm282_vm0, %v7976_v49  ;;  %v11510_v54 = vld [vmem:[%s14075_s0 + $0x128] sm:$0xff]  ;;  %v11520_v56 = vld [vmem:[%s14075_s0 + $0x138] sm:$0xff] }
  0x15   :  { %9577 = vmatmul.mubr.msk.f32.gmra.mrb[8].mxu1 %vm89_vm1, %v11276_v20  ;;  %9969 = vmatmul.mubr.msk.f32.gmra.mrb[8].mxu0 %vm89_vm1, %v11281_v21  ;;  %14165 = vst [vmem:[#allocation26_spill] sm:$0xff] %v11490_v52  ;;  %v11495_v53 = vld [vmem:[%s14075_s0 + $0x139] sm:$0xff]  ;;  %14166 = vst [vmem:[#allocation27_spill] sm:$0xff] %v11510_v54  ;;  %v11515_v55 = vld [vmem:[%s14075_s0 + $0x141] sm:$0xff] }
  0x16   :  { %9579 = vmatprep.mubr.msk.f32.mxu1 %vm89_vm1, %v11286_v22  ;;  %9971 = vmatprep.mubr.msk.f32.mxu0 %vm89_vm1, %v11291_v23  ;;  %14167 = vst [vmem:[#allocation28_spill] sm:$0xff] %v11520_v56  ;;  %v11525_v57 = vld [vmem:[%s14075_s0 + $0x151] sm:$0xff]  ;;  %v11538_v58 = vld [vmem:[%s14075_s0 + $0x140] sm:$0xff] }
  0x17   :  { %14168 = vst [vmem:[#allocation29_spill] sm:$0xff] %v11538_v58  ;;  %v11543_v59 = vld [vmem:[%s14075_s0 + $0x159] sm:$0xff] }
  0x19   :  { %9580 = vmatmul.mubr.msk.f32.gmra.mrb[10].mxu1 %vm89_vm1, %v11304_v24  ;;  %9972 = vmatmul.mubr.msk.f32.gmra.mrb[10].mxu0 %vm89_vm1, %v11309_v25 }
  0x1a   :  { %9582 = vmatprep.mubr.msk.f32.mxu1 %vm89_vm1, %v11314_v26  ;;  %9974 = vmatprep.mubr.msk.f32.mxu0 %vm89_vm1, %v11319_v27 }
  0x1d   :  { %9583 = vmatmul.mubr.msk.f32.gmra.mrb[12].mxu1 %vm89_vm1, %v11336_v29  ;;  %9975 = vmatmul.mubr.msk.f32.gmra.mrb[12].mxu0 %vm89_vm1, %v11341_v30 }
  0x1e   :  { %9585 = vmatprep.mubr.msk.f32.mxu1 %vm89_vm1, %v11346_v31  ;;  %9977 = vmatprep.mubr.msk.f32.mxu0 %vm89_vm1, %v11351_v32 }
  0x21   :  { %9586 = vmatmul.mubr.msk.f32.gmra.mrb[14].mxu1 %vm89_vm1, %v11365_v33  ;;  %9978 = vmatmul.mubr.msk.f32.gmra.mrb[14].mxu0 %vm89_vm1, %v11370_v34 }
  0x22   :  { %9588 = vmatprep.mubr.msk.f32.mxu1 %vm89_vm1, %v11375_v35  ;;  %9980 = vmatprep.mubr.msk.f32.mxu0 %vm89_vm1, %v11380_v36 }
  0x25   :  { %9589 = vmatmul.mubr.msk.f32.gmra.mrb[16].mxu1 %vm89_vm1, %v11393_v37  ;;  %9981 = vmatmul.mubr.msk.f32.gmra.mrb[16].mxu0 %vm89_vm1, %v11398_v38 }
  0x26   :  { %9591 = vmatprep.mubr.msk.f32.mxu1 %vm89_vm1, %v11403_v39  ;;  %9983 = vmatprep.mubr.msk.f32.mxu0 %vm89_vm1, %v11408_v40 }
  0x29   :  { %9592 = vmatmul.mubr.msk.f32.gmra.mrb[18].mxu1 %vm89_vm1, %v11421_v41  ;;  %9984 = vmatmul.mubr.msk.f32.gmra.mrb[18].mxu0 %vm89_vm1, %v11426_v42 }
  0x2a   :  { %9594 = vmatprep.mubr.msk.f32.mxu1 %vm89_vm1, %v11431_v43  ;;  %9986 = vmatprep.mubr.msk.f32.mxu0 %vm89_vm1, %v11436_v44 }
  0x2d   :  { %9595 = vmatmul.mubr.msk.f32.gmra.mrb[20].mxu1 %vm89_vm1, %v11449_v45  ;;  %9987 = vmatmul.mubr.msk.f32.gmra.mrb[20].mxu0 %vm89_vm1, %v11454_v46 }
  0x2e   :  { %9597 = vmatprep.mubr.msk.f32.mxu1 %vm89_vm1, %v11459_v47  ;;  %9989 = vmatprep.mubr.msk.f32.mxu0 %vm89_vm1, %v11464_v48 }
  0x31   :  { %9598 = vmatmul.mubr.msk.f32.gmra.mrb[22].mxu1 %vm89_vm1, %v11480_v50  ;;  %9990 = vmatmul.mubr.msk.f32.gmra.mrb[22].mxu0 %vm89_vm1, %v11485_v51 }
  0x32   :  { %9600 = vmatprep.mubr.msk.f32.mxu1 %vm89_vm1, %v11490_v52  ;;  %9992 = vmatprep.mubr.msk.f32.mxu0 %vm89_vm1, %v11495_v53 }
  0x35   :  { %9601 = vmatmul.mubr.msk.f32.gmra.mrb[24].mxu1 %vm89_vm1, %v11510_v54  ;;  %9993 = vmatmul.mubr.msk.f32.gmra.mrb[24].mxu0 %vm89_vm1, %v11515_v55 }
  0x36   :  { %9603 = vmatprep.mubr.msk.f32.mxu1 %vm89_vm1, %v11520_v56  ;;  %9995 = vmatprep.mubr.msk.f32.mxu0 %vm89_vm1, %v11525_v57 }
  0x37   :  { %11 = vsyncpa [#allocation4], 0  ;;  %v11548_v60 = vld [vmem:[%s14075_s0 + $0x150] sm:$0xff]  ;;  %v11566_v62 = vld [vmem:[%s14075_s0 + $0x158] sm:$0xff]  ;;  %vm11111_vm2 = vmmov 0   ;;  %s11113_s30 = smov [#allocation3]  }
  0x38   :  { %14169 = vst [vmem:[#allocation30_spill] sm:$0xff] %v11548_v60  ;;  %v11553_v61 = vld [vmem:[%s14075_s0 + $0x169] sm:$0xff]  ;;  %14170 = vst [vmem:[#allocation31_spill] sm:$0xff] %v11566_v62  ;;  %v11571_v63 = vld [vmem:[%s14075_s0 + $0x171] sm:$0xff]  ;;  %s7903_s7 = sshll.u32 %s11113_s30, 4  ;;  %s7904_s7 = int_to_ptr.vmem [resolvable:$true] %s7903_s7 }
  0x39   :  { %9604 = vmatmul.mubr.msk.f32.gmra.mrb[26].mxu1 %vm89_vm1, %v11538_v58  ;;  %9996 = vmatmul.mubr.msk.f32.gmra.mrb[26].mxu0 %vm89_vm1, %v11543_v59  ;;  %v11576_v0 = vld [vmem:[%s14075_s0 + $0x168] sm:$0xff]  ;;  %v11591_v2 = vld [vmem:[%s14075_s0 + $0x170] sm:$0xff]  ;;  %v57_v28 = vld [vmem:[%s14075_s0 + $0x1b8] sm:$0xff]  ;;  %p11090_p1 = scmp.lt.s32.totalorder %s7904_s7, %s7904_s7 }
  0x3a   :  { %9606 = vmatprep.mubr.msk.f32.mxu1 %vm89_vm1, %v11548_v60  ;;  %9998 = vmatprep.mubr.msk.f32.mxu0 %vm89_vm1, %v11553_v61  ;;  %14171 = vst [vmem:[#allocation32_spill] sm:$0xff] %v11576_v0  ;;  %v8268_v1 = vld [vmem:[%s14075_s0 + $0x181] sm:$0xff]  ;;  %14172 = vst [vmem:[#allocation33_spill] sm:$0xff] %v11591_v2  ;;  %v8269_v4 = vld [vmem:[%s14075_s0 + $0x189] sm:$0xff] }
  0x3b   :  { %v56_v6 = vld [vmem:[%s14075_s0 + $0x1b0] sm:$0xff]  ;;  %v11672_v60 = vld [vmem:[%s14075_s0 + $0x201] sm:$0xff]  ;;  %v11700_v56 = vld [vmem:[%s14075_s0 + $0x219] sm:$0xff] }
  0x3c   :  { %v11602_v8 = vld [vmem:[%s14075_s0 + $0x1c9] sm:$0xff]  ;;  %v11616_v49 = vld [vmem:[%s14075_s0 + $0x1d1] sm:$0xff]  ;;  %v11695_v58 = vld [vmem:[%s14075_s0 + $0x200] sm:$0xff] }
  0x3d   :  { %9607 = vmatmul.mubr.msk.f32.gmra.mrb[28].mxu1 %vm89_vm1, %v11566_v62  ;;  %9999 = vmatmul.mubr.msk.f32.gmra.mrb[28].mxu0 %vm89_vm1, %v11571_v63  ;;  %v11667_v62 = vld [vmem:[%s14075_s0 + $0x1e8] sm:$0xff]  ;;  %14176 = vst [vmem:[#allocation37_spill] sm:$0xff] %v11695_v58  ;;  %v11723_v54 = vld [vmem:[%s14075_s0 + $0x218] sm:$0xff]  ;;  %v11751_v50 = vld [vmem:[%s14075_s0 + $0x230] sm:$0xff] }
  0x3e   :  { %9609 = vmatprep.mubr.msk.f32.mxu1 %vm89_vm1, %v11576_v0  ;;  %10001 = vmatprep.mubr.msk.f32.mxu0 %vm89_vm1, %v8268_v1  ;;  %v11621_v1 = vld [vmem:[%s14076_s1 + $0x18] sm:$0xf]  ;;  %v11645_v0 = vld [vmem:[%s14075_s0 + $0x1e9] sm:$0xff]  ;;  %14174 = vst [vmem:[#allocation35_spill] sm:$0xff] %v11667_v62  ;;  %14178 = vst [vmem:[#allocation39_spill] sm:$0xff] %v11723_v54 }
  0x3f   :  { %10150 = vmatprep.subr.msk.mxu0 %vm282_vm0, %v11621_v1  ;;  %v11728_v52 = vld [vmem:[%s14075_s0 + $0x231] sm:$0xff]  ;;  %14180 = vst [vmem:[#allocation41_spill] sm:$0xff] %v11751_v50  ;;  %v11756_v47 = vld [vmem:[%s14075_s0 + $0x249] sm:$0xff]  ;;  %v11784_v43 = vld [vmem:[%s14075_s0 + $0x261] sm:$0xff] }
  0x40   :  { %v11779_v45 = vld [vmem:[%s14075_s0 + $0x248] sm:$0xff]  ;;  %v11807_v41 = vld [vmem:[%s14075_s0 + $0x260] sm:$0xff]  ;;  %v11835_v37 = vld [vmem:[%s14075_s0 + $0x278] sm:$0xff] }
  0x41   :  { %9610 = vmatmul.mubr.msk.f32.gmra.mrb[30].mxu1 %vm89_vm1, %v11591_v2  ;;  %10002 = vmatmul.mubr.msk.f32.gmra.mrb[30].mxu0 %vm89_vm1, %v8269_v4  ;;  %v58_v4 = vld [vmem:[%s14075_s0 + $0x1c8] sm:$0xff]  ;;  %v59_v2 = vld [vmem:[%s14075_s0 + $0x1d0] sm:$0xff]  ;;  %14182 = vst [vmem:[#allocation43_spill] sm:$0xff] %v11779_v45  ;;  %14184 = vst [vmem:[#allocation45_spill] sm:$0xff] %v11807_v41 }
  0x42   :  { %9612 = vmatprep.mubr.msk.f32.mxu1 %vm89_vm1, %v56_v6  ;;  %10004 = vmatprep.mubr.msk.f32.mxu0 %vm89_vm1, %v11602_v8  ;;  %v11629_v6 = vld [vmem:[%s14075_s0 + $0x1e1] sm:$0xff]  ;;  %v11812_v39 = vld [vmem:[%s14075_s0 + $0x279] sm:$0xff]  ;;  %14186 = vst [vmem:[#allocation47_spill] sm:$0xff] %v11835_v37  ;;  %v11840_v35 = vld [vmem:[%s14075_s0 + $0x291] sm:$0xff] }
  0x43   :  { %v11863_v33 = vld [vmem:[%s14075_s0 + $0x290] sm:$0xff]  ;;  %v11891_v29 = vld [vmem:[%s14075_s0 + $0x2a8] sm:$0xff]  ;;  %v11919_v24 = vld [vmem:[%s14075_s0 + $0x2c0] sm:$0xff] }
  0x44   :  { %14188 = vst [vmem:[#allocation49_spill] sm:$0xff] %v11863_v33  ;;  %v11868_v31 = vld [vmem:[%s14075_s0 + $0x2a9] sm:$0xff]  ;;  %14190 = vst [vmem:[#allocation51_spill] sm:$0xff] %v11891_v29  ;;  %v11896_v26 = vld [vmem:[%s14075_s0 + $0x2c1] sm:$0xff] }
  0x45   :  { %9613 = vmatmul.mubr.msk.f32.gmra.mrb[32].mxu1 %vm89_vm1, %v57_v28  ;;  %10005 = vmatmul.mubr.msk.f32.gmra.mrb[32].mxu0 %vm89_vm1, %v11616_v49  ;;  %v11650_v28 = vld [vmem:[%s14075_s0 + $0x1e0] sm:$0xff]  ;;  %14192 = vst [vmem:[#allocation53_spill] sm:$0xff] %v11919_v24  ;;  %v11947_v20 = vld [vmem:[%s14075_s0 + $0x2d8] sm:$0xff]  ;;  %v11975_v16 = vld [vmem:[%s14075_s0 + $0x2f0] sm:$0xff] }
  0x46   :  { %9615 = vmatprep.mubr.msk.f32.mxu1 %vm89_vm1, %v58_v4  ;;  %10007 = vmatprep.mubr.msk.f32.mxu0 %vm89_vm1, %v11629_v6  ;;  %14173 = vst [vmem:[#allocation34_spill] sm:$0xff] %v11650_v28  ;;  %v11655_v4 = vld [vmem:[%s14075_s0 + $0x1f9] sm:$0xff]  ;;  %14194 = vst [vmem:[#allocation55_spill] sm:$0xff] %v11947_v20  ;;  %v11952_v18 = vld [vmem:[%s14075_s0 + $0x2f1] sm:$0xff] }
  0x47   :  { %v11924_v22 = vld [vmem:[%s14075_s0 + $0x2d9] sm:$0xff]  ;;  %14197 = vst [vmem:[#allocation58_spill] sm:$0xff] %v11975_v16  ;;  %v11980_v14 = vld [vmem:[%s14075_s0 + $0x309] sm:$0xff]  ;;  %v12008_v10 = vld [vmem:[%s14075_s0 + $0x321] sm:$0xff] }
  0x48   :  { %14198 = vst [vmem:[#allocation59_spill] sm:$0xff] %v11980_v14  ;;  %v12003_v12 = vld [vmem:[%s14075_s0 + $0x308] sm:$0xff]  ;;  %14202 = vst [vmem:[#allocation63_spill] sm:$0xff] %v12008_v10 }
  0x49   :  { %9616 = vmatmul.mubr.msk.f32.gmra.mrb[34].mxu1 %vm89_vm1, %v59_v2  ;;  %10008 = vmatmul.mubr.msk.f32.gmra.mrb[34].mxu0 %vm89_vm1, %v11645_v0  ;;  %v11677_v2 = vld [vmem:[%s14075_s0 + $0x1f8] sm:$0xff]  ;;  %14201 = vst [vmem:[#allocation62_spill] sm:$0xff] %v12003_v12 }
  0x4a   :  { %9618 = vmatprep.mubr.msk.f32.mxu1 %vm89_vm1, %v11650_v28  ;;  %10010 = vmatprep.mubr.msk.f32.mxu0 %vm89_vm1, %v11655_v4  ;;  %14175 = vst [vmem:[#allocation36_spill] sm:$0xff] %v11677_v2  ;;  %v11682_v28 = vld [vmem:[%s14075_s0 + $0x211] sm:$0xff] }
  0x4d   :  { %9619 = vmatmul.mubr.msk.f32.gmra.mrb[36].mxu1 %vm89_vm1, %v11667_v62  ;;  %10011 = vmatmul.mubr.msk.f32.gmra.mrb[36].mxu0 %vm89_vm1, %v11672_v60  ;;  %v11705_v62 = vld [vmem:[%s14075_s0 + $0x210] sm:$0xff] }
  0x4e   :  { %9621 = vmatprep.mubr.msk.f32.mxu1 %vm89_vm1, %v11677_v2  ;;  %10013 = vmatprep.mubr.msk.f32.mxu0 %vm89_vm1, %v11682_v28  ;;  %14177 = vst [vmem:[#allocation38_spill] sm:$0xff] %v11705_v62  ;;  %v11710_v2 = vld [vmem:[%s14075_s0 + $0x229] sm:$0xff] }
  0x51   :  { %9622 = vmatmul.mubr.msk.f32.gmra.mrb[38].mxu1 %vm89_vm1, %v11695_v58  ;;  %10014 = vmatmul.mubr.msk.f32.gmra.mrb[38].mxu0 %vm89_vm1, %v11700_v56  ;;  %v11733_v58 = vld [vmem:[%s14075_s0 + $0x228] sm:$0xff] }
  0x52   :  { %9624 = vmatprep.mubr.msk.f32.mxu1 %vm89_vm1, %v11705_v62  ;;  %10016 = vmatprep.mubr.msk.f32.mxu0 %vm89_vm1, %v11710_v2  ;;  %14179 = vst [vmem:[#allocation40_spill] sm:$0xff] %v11733_v58  ;;  %v11738_v62 = vld [vmem:[%s14075_s0 + $0x241] sm:$0xff] }
  0x55   :  { %9625 = vmatmul.mubr.msk.f32.gmra.mrb[40].mxu1 %vm89_vm1, %v11723_v54  ;;  %10017 = vmatmul.mubr.msk.f32.gmra.mrb[40].mxu0 %vm89_vm1, %v11728_v52  ;;  %v11761_v54 = vld [vmem:[%s14075_s0 + $0x240] sm:$0xff] }
  0x56   :  { %9627 = vmatprep.mubr.msk.f32.mxu1 %vm89_vm1, %v11733_v58  ;;  %10019 = vmatprep.mubr.msk.f32.mxu0 %vm89_vm1, %v11738_v62  ;;  %14181 = vst [vmem:[#allocation42_spill] sm:$0xff] %v11761_v54  ;;  %v11766_v58 = vld [vmem:[%s14075_s0 + $0x259] sm:$0xff] }
  0x59   :  { %9628 = vmatmul.mubr.msk.f32.gmra.mrb[42].mxu1 %vm89_vm1, %v11751_v50  ;;  %10020 = vmatmul.mubr.msk.f32.gmra.mrb[42].mxu0 %vm89_vm1, %v11756_v47  ;;  %v11789_v50 = vld [vmem:[%s14075_s0 + $0x258] sm:$0xff] }
  0x5a   :  { %9630 = vmatprep.mubr.msk.f32.mxu1 %vm89_vm1, %v11761_v54  ;;  %10022 = vmatprep.mubr.msk.f32.mxu0 %vm89_vm1, %v11766_v58  ;;  %14183 = vst [vmem:[#allocation44_spill] sm:$0xff] %v11789_v50  ;;  %v11794_v54 = vld [vmem:[%s14075_s0 + $0x271] sm:$0xff] }
  0x5d   :  { %9631 = vmatmul.mubr.msk.f32.gmra.mrb[44].mxu1 %vm89_vm1, %v11779_v45  ;;  %10023 = vmatmul.mubr.msk.f32.gmra.mrb[44].mxu0 %vm89_vm1, %v11784_v43  ;;  %v11817_v45 = vld [vmem:[%s14075_s0 + $0x270] sm:$0xff] }
  0x5e   :  { %9633 = vmatprep.mubr.msk.f32.mxu1 %vm89_vm1, %v11789_v50  ;;  %10025 = vmatprep.mubr.msk.f32.mxu0 %vm89_vm1, %v11794_v54  ;;  %14185 = vst [vmem:[#allocation46_spill] sm:$0xff] %v11817_v45  ;;  %v11822_v50 = vld [vmem:[%s14075_s0 + $0x289] sm:$0xff] }
  0x61   :  { %9634 = vmatmul.mubr.msk.f32.gmra.mrb[46].mxu1 %vm89_vm1, %v11807_v41  ;;  %10026 = vmatmul.mubr.msk.f32.gmra.mrb[46].mxu0 %vm89_vm1, %v11812_v39  ;;  %v11845_v41 = vld [vmem:[%s14075_s0 + $0x288] sm:$0xff] }
  0x62   :  { %9636 = vmatprep.mubr.msk.f32.mxu1 %vm89_vm1, %v11817_v45  ;;  %10028 = vmatprep.mubr.msk.f32.mxu0 %vm89_vm1, %v11822_v50  ;;  %14187 = vst [vmem:[#allocation48_spill] sm:$0xff] %v11845_v41  ;;  %v11850_v45 = vld [vmem:[%s14075_s0 + $0x2a1] sm:$0xff] }
  0x65   :  { %9637 = vmatmul.mubr.msk.f32.gmra.mrb[48].mxu1 %vm89_vm1, %v11835_v37  ;;  %10029 = vmatmul.mubr.msk.f32.gmra.mrb[48].mxu0 %vm89_vm1, %v11840_v35  ;;  %v11873_v37 = vld [vmem:[%s14075_s0 + $0x2a0] sm:$0xff] }
  0x66   :  { %9639 = vmatprep.mubr.msk.f32.mxu1 %vm89_vm1, %v11845_v41  ;;  %10031 = vmatprep.mubr.msk.f32.mxu0 %vm89_vm1, %v11850_v45  ;;  %14189 = vst [vmem:[#allocation50_spill] sm:$0xff] %v11873_v37  ;;  %v11878_v41 = vld [vmem:[%s14075_s0 + $0x2b9] sm:$0xff] }
  0x69   :  { %9640 = vmatmul.mubr.msk.f32.gmra.mrb[50].mxu1 %vm89_vm1, %v11863_v33  ;;  %10032 = vmatmul.mubr.msk.f32.gmra.mrb[50].mxu0 %vm89_vm1, %v11868_v31  ;;  %v11901_v33 = vld [vmem:[%s14075_s0 + $0x2b8] sm:$0xff] }
  0x6a   :  { %9642 = vmatprep.mubr.msk.f32.mxu1 %vm89_vm1, %v11873_v37  ;;  %10034 = vmatprep.mubr.msk.f32.mxu0 %vm89_vm1, %v11878_v41  ;;  %14191 = vst [vmem:[#allocation52_spill] sm:$0xff] %v11901_v33  ;;  %v11906_v37 = vld [vmem:[%s14075_s0 + $0x2d1] sm:$0xff] }
  0x6d   :  { %9643 = vmatmul.mubr.msk.f32.gmra.mrb[52].mxu1 %vm89_vm1, %v11891_v29  ;;  %10035 = vmatmul.mubr.msk.f32.gmra.mrb[52].mxu0 %vm89_vm1, %v11896_v26  ;;  %v11929_v29 = vld [vmem:[%s14075_s0 + $0x2d0] sm:$0xff] }
  0x6e   :  { %9645 = vmatprep.mubr.msk.f32.mxu1 %vm89_vm1, %v11901_v33  ;;  %10037 = vmatprep.mubr.msk.f32.mxu0 %vm89_vm1, %v11906_v37  ;;  %14193 = vst [vmem:[#allocation54_spill] sm:$0xff] %v11929_v29  ;;  %v11934_v33 = vld [vmem:[%s14075_s0 + $0x2e9] sm:$0xff] }
  0x71   :  { %9646 = vmatmul.mubr.msk.f32.gmra.mrb[54].mxu1 %vm89_vm1, %v11919_v24  ;;  %10038 = vmatmul.mubr.msk.f32.gmra.mrb[54].mxu0 %vm89_vm1, %v11924_v22  ;;  %v11957_v24 = vld [vmem:[%s14075_s0 + $0x2e8] sm:$0xff] }
  0x72   :  { %9648 = vmatprep.mubr.msk.f32.mxu1 %vm89_vm1, %v11929_v29  ;;  %10040 = vmatprep.mubr.msk.f32.mxu0 %vm89_vm1, %v11934_v33  ;;  %14195 = vst [vmem:[#allocation56_spill] sm:$0xff] %v11957_v24  ;;  %v11962_v29 = vld [vmem:[%s14075_s0 + $0x301] sm:$0xff] }
  0x73   :  { %14196 = vst [vmem:[#allocation57_spill] sm:$0xff] %v11962_v29 }
  0x75   :  { %9649 = vmatmul.mubr.msk.f32.gmra.mrb[56].mxu1 %vm89_vm1, %v11947_v20  ;;  %10041 = vmatmul.mubr.msk.f32.gmra.mrb[56].mxu0 %vm89_vm1, %v11952_v18  ;;  %v11985_v20 = vld [vmem:[%s14075_s0 + $0x300] sm:$0xff] }
  0x76   :  { %9651 = vmatprep.mubr.msk.f32.mxu1 %vm89_vm1, %v11957_v24  ;;  %10043 = vmatprep.mubr.msk.f32.mxu0 %vm89_vm1, %v11962_v29  ;;  %14199 = vst [vmem:[#allocation60_spill] sm:$0xff] %v11985_v20  ;;  %v11990_v24 = vld [vmem:[%s14075_s0 + $0x319] sm:$0xff]  ;;  %v12056_v29 = vld [vmem:[%s14075_s0 + $0x22] sm:$0xff] }
  0x77   :  { %14200 = vst [vmem:[#allocation61_spill] sm:$0xff] %v11990_v24 }
  0x79   :  { %9652 = vmatmul.mubr.msk.f32.gmra.mrb[58].mxu1 %vm89_vm1, %v11975_v16  ;;  %10044 = vmatmul.mubr.msk.f32.gmra.mrb[58].mxu0 %vm89_vm1, %v11980_v14  ;;  %v12013_v16 = vld [vmem:[%s14075_s0 + $0x318] sm:$0xff] }
  0x7a   :  { %9654 = vmatprep.mubr.msk.f32.mxu1 %vm89_vm1, %v11985_v20  ;;  %10046 = vmatprep.mubr.msk.f32.mxu0 %vm89_vm1, %v11990_v24  ;;  %14203 = vst [vmem:[#allocation64_spill] sm:$0xff] %v12013_v16  ;;  %v8300_v20 = vld [vmem:[%s14075_s0 + $0x331] sm:$0xff]  ;;  %v12028_v24 = vld [vmem:[%s14075_s0 + $0x320] sm:$0xff] }
  0x7b   :  { %14204 = vst [vmem:[#allocation65_spill] sm:$0xff] %v12028_v24  ;;  %v8301_v14 = vld [vmem:[%s14075_s0 + $0x339] sm:$0xff] }
  0x7d   :  { %9655 = vmatmul.mubr.msk.f32.gmra.mrb[60].mxu1 %vm89_vm1, %v12003_v12  ;;  %10047 = vmatmul.mubr.msk.f32.gmra.mrb[60].mxu0 %vm89_vm1, %v12008_v10  ;;  %v735_v12 = vld [vmem:[%s14075_s0 + $0x1] sm:$0xff] }
  0x7e   :  { %9657 = vmatprep.mubr.msk.f32.mxu1 %vm89_vm1, %v12013_v16  ;;  %10049 = vmatprep.mubr.msk.f32.mxu0 %vm89_vm1, %v8300_v20  ;;  %v12039_v10 = vld [vmem:[%s14075_s0 + $0x1a] sm:$0xff]  ;;  %v8042_v20 = vld [vmem:[%s14076_s1 + $0x8] sm:$0xf] }
  0x7f   :  { %v736_v16 = vld [vmem:[%s14075_s0 + $0x9] sm:$0xff]  ;;  %9758 = vmatprep.subr.msk.mxu1 %vm282_vm0, %v8042_v20 }
  0x81   :  { %9658 = vmatmul.mubr.msk.f32.gmra.mrb[62].mxu1 %vm89_vm1, %v12028_v24  ;;  %10050 = vmatmul.mubr.msk.f32.gmra.mrb[62].mxu0 %vm89_vm1, %v8301_v14  ;;  %v12061_v14 = vld [vmem:[%s14075_s0 + $0x32] sm:$0xff]  ;;  %v12079_v24 = vld [vmem:[%s14075_s0 + $0x4a] sm:$0xff] }
  0x82   :  { %9662 = vmatprep.mubr.msk.f32.mxu1 %vm89_vm1, %v735_v12  ;;  %10054 = vmatprep.mubr.msk.f32.mxu0 %vm89_vm1, %v12039_v10  ;;  %v12074_v12 = vld [vmem:[%s14075_s0 + $0x3a] sm:$0xff] }
  0x85   :  { %9663 = vmatmul.mubr.msk.f32.vlgmr.msra.gmra.mrb[0].mxu1 %vm89_vm1, %v736_v16  ;;  %10055 = vmatmul.mubr.msk.f32.vlgmr.msra.gmra.mrb[0].mxu0 %vm89_vm1, %v12056_v29  ;;  %v12100_v16 = vld [vmem:[%s14075_s0 + $0x62] sm:$0xff] }
  0x86   :  { %9665 = vmatprep.mubr.msk.f32.mxu1 %vm89_vm1, %v11163_v3  ;;  %10057 = vmatprep.mubr.msk.f32.mxu0 %vm89_vm1, %v12061_v14  ;;  %v12095_v3 = vld [vmem:[%s14075_s0 + $0x52] sm:$0xff] }
  0x87   :  { %10151 = vmatpush3.msk.msra.mxu0 %vm282_vm0, %v11621_v1  ;;  %9759 = vmatpush3.msk.msra.mxu1 %vm282_vm0, %v8042_v20  ;;  %v12346_v1 = vld [vmem:[%s14075_s0 + $0x1d2] sm:$0xff]  ;;  %v12356_v20 = vld [vmem:[%s14075_s0 + $0x1e2] sm:$0xff] }
  0x89   :  { %9666 = vmatmul.mubr.msk.f32.gmra.mrb[2].mxu1 %vm89_vm1, %v11171_v5  ;;  %10058 = vmatmul.mubr.msk.f32.gmra.mrb[2].mxu0 %vm89_vm1, %v12074_v12  ;;  %v12113_v5 = vld [vmem:[%s14075_s0 + $0x6a] sm:$0xff] }
  0x8a   :  { %9668 = vmatprep.mubr.msk.f32.mxu1 %vm89_vm1, %v11181_v7  ;;  %10060 = vmatprep.mubr.msk.f32.mxu0 %vm89_vm1, %v12079_v24  ;;  %v12118_v7 = vld [vmem:[%s14075_s0 + $0x7a] sm:$0xff] }
  0x8d   :  { %9669 = vmatmul.mubr.msk.f32.gmra.mrb[4].mxu1 %vm89_vm1, %v11198_v9  ;;  %10061 = vmatmul.mubr.msk.f32.gmra.mrb[4].mxu0 %vm89_vm1, %v12095_v3  ;;  %v12131_v9 = vld [vmem:[%s14075_s0 + $0x82] sm:$0xff] }
  0x8e   :  { %9671 = vmatprep.mubr.msk.f32.mxu1 %vm89_vm1, %v11208_v11  ;;  %10063 = vmatprep.mubr.msk.f32.mxu0 %vm89_vm1, %v12100_v16  ;;  %v12136_v11 = vld [vmem:[%s14075_s0 + $0x92] sm:$0xff] }
  0x91   :  { %9672 = vmatmul.mubr.msk.f32.gmra.mrb[6].mxu1 %vm89_vm1, %v11225_v13  ;;  %10064 = vmatmul.mubr.msk.f32.gmra.mrb[6].mxu0 %vm89_vm1, %v12113_v5  ;;  %v12149_v13 = vld [vmem:[%s14075_s0 + $0x9a] sm:$0xff] }
  0x92   :  { %9674 = vmatprep.mubr.msk.f32.mxu1 %vm89_vm1, %v11235_v15  ;;  %10066 = vmatprep.mubr.msk.f32.mxu0 %vm89_vm1, %v12118_v7  ;;  %v12154_v15 = vld [vmem:[%s14075_s0 + $0xaa] sm:$0xff] }
  0x95   :  { %9675 = vmatmul.mubr.msk.f32.gmra.mrb[8].mxu1 %vm89_vm1, %v11253_v17  ;;  %10067 = vmatmul.mubr.msk.f32.gmra.mrb[8].mxu0 %vm89_vm1, %v12131_v9  ;;  %v12167_v17 = vld [vmem:[%s14075_s0 + $0xb2] sm:$0xff] }
  0x96   :  { %9677 = vmatprep.mubr.msk.f32.mxu1 %vm89_vm1, %v11263_v19  ;;  %10069 = vmatprep.mubr.msk.f32.mxu0 %vm89_vm1, %v12136_v11  ;;  %v12172_v19 = vld [vmem:[%s14075_s0 + $0xc2] sm:$0xff] }
  0x99   :  { %9678 = vmatmul.mubr.msk.f32.gmra.mrb[10].mxu1 %vm89_vm1, %v11281_v21  ;;  %10070 = vmatmul.mubr.msk.f32.gmra.mrb[10].mxu0 %vm89_vm1, %v12149_v13  ;;  %v12185_v21 = vld [vmem:[%s14075_s0 + $0xca] sm:$0xff] }
  0x9a   :  { %9680 = vmatprep.mubr.msk.f32.mxu1 %vm89_vm1, %v11291_v23  ;;  %10072 = vmatprep.mubr.msk.f32.mxu0 %vm89_vm1, %v12154_v15  ;;  %v12190_v23 = vld [vmem:[%s14075_s0 + $0xda] sm:$0xff] }
  0x9d   :  { %9681 = vmatmul.mubr.msk.f32.gmra.mrb[12].mxu1 %vm89_vm1, %v11309_v25  ;;  %10073 = vmatmul.mubr.msk.f32.gmra.mrb[12].mxu0 %vm89_vm1, %v12167_v17  ;;  %v12203_v25 = vld [vmem:[%s14075_s0 + $0xe2] sm:$0xff] }
  0x9e   :  { %9683 = vmatprep.mubr.msk.f32.mxu1 %vm89_vm1, %v11319_v27  ;;  %10075 = vmatprep.mubr.msk.f32.mxu0 %vm89_vm1, %v12172_v19  ;;  %v12208_v27 = vld [vmem:[%s14075_s0 + $0xf2] sm:$0xff] }
  0xa1   :  { %9684 = vmatmul.mubr.msk.f32.gmra.mrb[14].mxu1 %vm89_vm1, %v11341_v30  ;;  %10076 = vmatmul.mubr.msk.f32.gmra.mrb[14].mxu0 %vm89_vm1, %v12185_v21  ;;  %v12221_v30 = vld [vmem:[%s14075_s0 + $0xfa] sm:$0xff] }
  0xa2   :  { %9686 = vmatprep.mubr.msk.f32.mxu1 %vm89_vm1, %v11351_v32  ;;  %10078 = vmatprep.mubr.msk.f32.mxu0 %vm89_vm1, %v12190_v23  ;;  %v12226_v32 = vld [vmem:[%s14075_s0 + $0x10a] sm:$0xff] }
  0xa5   :  { %9687 = vmatmul.mubr.msk.f32.gmra.mrb[16].mxu1 %vm89_vm1, %v11370_v34  ;;  %10079 = vmatmul.mubr.msk.f32.gmra.mrb[16].mxu0 %vm89_vm1, %v12203_v25  ;;  %v12239_v34 = vld [vmem:[%s14075_s0 + $0x112] sm:$0xff] }
  0xa6   :  { %9689 = vmatprep.mubr.msk.f32.mxu1 %vm89_vm1, %v11380_v36  ;;  %10081 = vmatprep.mubr.msk.f32.mxu0 %vm89_vm1, %v12208_v27  ;;  %v12244_v36 = vld [vmem:[%s14075_s0 + $0x122] sm:$0xff] }
  0xa9   :  { %9690 = vmatmul.mubr.msk.f32.gmra.mrb[18].mxu1 %vm89_vm1, %v11398_v38  ;;  %10082 = vmatmul.mubr.msk.f32.gmra.mrb[18].mxu0 %vm89_vm1, %v12221_v30  ;;  %v12257_v38 = vld [vmem:[%s14075_s0 + $0x12a] sm:$0xff] }
  0xaa   :  { %9692 = vmatprep.mubr.msk.f32.mxu1 %vm89_vm1, %v11408_v40  ;;  %10084 = vmatprep.mubr.msk.f32.mxu0 %vm89_vm1, %v12226_v32  ;;  %v12262_v40 = vld [vmem:[%s14075_s0 + $0x13a] sm:$0xff] }
  0xad   :  { %9693 = vmatmul.mubr.msk.f32.gmra.mrb[20].mxu1 %vm89_vm1, %v11426_v42  ;;  %10085 = vmatmul.mubr.msk.f32.gmra.mrb[20].mxu0 %vm89_vm1, %v12239_v34  ;;  %v12275_v42 = vld [vmem:[%s14075_s0 + $0x142] sm:$0xff] }
  0xae   :  { %9695 = vmatprep.mubr.msk.f32.mxu1 %vm89_vm1, %v11436_v44  ;;  %10087 = vmatprep.mubr.msk.f32.mxu0 %vm89_vm1, %v12244_v36  ;;  %v12280_v44 = vld [vmem:[%s14075_s0 + $0x152] sm:$0xff] }
  0xb1   :  { %9696 = vmatmul.mubr.msk.f32.gmra.mrb[22].mxu1 %vm89_vm1, %v11454_v46  ;;  %10088 = vmatmul.mubr.msk.f32.gmra.mrb[22].mxu0 %vm89_vm1, %v12257_v38  ;;  %v12293_v46 = vld [vmem:[%s14075_s0 + $0x15a] sm:$0xff] }
  0xb2   :  { %9698 = vmatprep.mubr.msk.f32.mxu1 %vm89_vm1, %v11464_v48  ;;  %10090 = vmatprep.mubr.msk.f32.mxu0 %vm89_vm1, %v12262_v40  ;;  %v12298_v48 = vld [vmem:[%s14075_s0 + $0x16a] sm:$0xff] }
  0xb5   :  { %9699 = vmatmul.mubr.msk.f32.gmra.mrb[24].mxu1 %vm89_vm1, %v11485_v51  ;;  %10091 = vmatmul.mubr.msk.f32.gmra.mrb[24].mxu0 %vm89_vm1, %v12275_v42  ;;  %v12311_v51 = vld [vmem:[%s14075_s0 + $0x172] sm:$0xff] }
  0xb6   :  { %9701 = vmatprep.mubr.msk.f32.mxu1 %vm89_vm1, %v11495_v53  ;;  %10093 = vmatprep.mubr.msk.f32.mxu0 %vm89_vm1, %v12280_v44  ;;  %v8398_v53 = vld [vmem:[%s14075_s0 + $0x182] sm:$0xff] }
  0xb9   :  { %9702 = vmatmul.mubr.msk.f32.gmra.mrb[26].mxu1 %vm89_vm1, %v11515_v55  ;;  %10094 = vmatmul.mubr.msk.f32.gmra.mrb[26].mxu0 %vm89_vm1, %v12293_v46  ;;  %v8399_v55 = vld [vmem:[%s14075_s0 + $0x18a] sm:$0xff] }
  0xba   :  { %9704 = vmatprep.mubr.msk.f32.mxu1 %vm89_vm1, %v11525_v57  ;;  %10096 = vmatprep.mubr.msk.f32.mxu0 %vm89_vm1, %v12298_v48  ;;  %v767_v57 = vld [vmem:[%s14075_s0 + $0x1b1] sm:$0xff] }
  0xbd   :  { %9705 = vmatmul.mubr.msk.f32.gmra.mrb[28].mxu1 %vm89_vm1, %v11543_v59  ;;  %10097 = vmatmul.mubr.msk.f32.gmra.mrb[28].mxu0 %vm89_vm1, %v12311_v51  ;;  %v12332_v59 = vld [vmem:[%s14075_s0 + $0x1ca] sm:$0xff] }
  0xbe   :  { %9707 = vmatprep.mubr.msk.f32.mxu1 %vm89_vm1, %v11553_v61  ;;  %10099 = vmatprep.mubr.msk.f32.mxu0 %vm89_vm1, %v8398_v53  ;;  %v768_v61 = vld [vmem:[%s14075_s0 + $0x1b9] sm:$0xff]  ;;  %v12370_v53 = vld [vmem:[%s14075_s0 + $0x1ea] sm:$0xff] }
  0xc1   :  { %9708 = vmatmul.mubr.msk.f32.gmra.mrb[30].mxu1 %vm89_vm1, %v11571_v63  ;;  %10100 = vmatmul.mubr.msk.f32.gmra.mrb[30].mxu0 %vm89_vm1, %v8399_v55  ;;  %v12351_v63 = vld [vmem:[%s14076_s1 + $0x1c] sm:$0xf] }
  0xc2   :  { %9710 = vmatprep.mubr.msk.f32.mxu1 %vm89_vm1, %v767_v57  ;;  %10102 = vmatprep.mubr.msk.f32.mxu0 %vm89_vm1, %v12332_v59  ;;  %v12375_v55 = vld [vmem:[%s14075_s0 + $0x1fa] sm:$0xff]  ;;  %v12393_v57 = vld [vmem:[%s14075_s0 + $0x212] sm:$0xff] }
  0xc3   :  { %10248 = vmatprep.subr.msk.mxu0 %vm282_vm0, %v12351_v63 }
  0xc5   :  { %9711 = vmatmul.mubr.msk.f32.gmra.mrb[32].mxu1 %vm89_vm1, %v768_v61  ;;  %10103 = vmatmul.mubr.msk.f32.gmra.mrb[32].mxu0 %vm89_vm1, %v12346_v1  ;;  %v8430_v61 = vld [vmem:[%s14075_s0 + $0x332] sm:$0xff] }
  0xc6   :  { %9713 = vmatprep.mubr.msk.f32.mxu1 %vm89_vm1, %v11602_v8  ;;  %10105 = vmatprep.mubr.msk.f32.mxu0 %vm89_vm1, %v12356_v20  ;;  %v12388_v8 = vld [vmem:[%s14075_s0 + $0x202] sm:$0xff] }
  0xc9   :  { %9714 = vmatmul.mubr.msk.f32.gmra.mrb[34].mxu1 %vm89_vm1, %v11616_v49  ;;  %10106 = vmatmul.mubr.msk.f32.gmra.mrb[34].mxu0 %vm89_vm1, %v12370_v53  ;;  %v12406_v49 = vld [vmem:[%s14075_s0 + $0x21a] sm:$0xff] }
  0xca   :  { %9716 = vmatprep.mubr.msk.f32.mxu1 %vm89_vm1, %v11629_v6  ;;  %10108 = vmatprep.mubr.msk.f32.mxu0 %vm89_vm1, %v12375_v55  ;;  %v12411_v6 = vld [vmem:[%s14075_s0 + $0x22a] sm:$0xff] }
  0xcd   :  { %9717 = vmatmul.mubr.msk.f32.gmra.mrb[36].mxu1 %vm89_vm1, %v11645_v0  ;;  %10109 = vmatmul.mubr.msk.f32.gmra.mrb[36].mxu0 %vm89_vm1, %v12388_v8  ;;  %v12424_v0 = vld [vmem:[%s14075_s0 + $0x232] sm:$0xff] }
  0xce   :  { %9719 = vmatprep.mubr.msk.f32.mxu1 %vm89_vm1, %v11655_v4  ;;  %10111 = vmatprep.mubr.msk.f32.mxu0 %vm89_vm1, %v12393_v57  ;;  %v12429_v4 = vld [vmem:[%s14075_s0 + $0x242] sm:$0xff] }
  0xd1   :  { %9720 = vmatmul.mubr.msk.f32.gmra.mrb[38].mxu1 %vm89_vm1, %v11672_v60  ;;  %10112 = vmatmul.mubr.msk.f32.gmra.mrb[38].mxu0 %vm89_vm1, %v12406_v49  ;;  %v12442_v60 = vld [vmem:[%s14075_s0 + $0x24a] sm:$0xff] }
  0xd2   :  { %9722 = vmatprep.mubr.msk.f32.mxu1 %vm89_vm1, %v11682_v28  ;;  %10114 = vmatprep.mubr.msk.f32.mxu0 %vm89_vm1, %v12411_v6  ;;  %v12447_v28 = vld [vmem:[%s14075_s0 + $0x25a] sm:$0xff] }
  0xd5   :  { %9723 = vmatmul.mubr.msk.f32.gmra.mrb[40].mxu1 %vm89_vm1, %v11700_v56  ;;  %10115 = vmatmul.mubr.msk.f32.gmra.mrb[40].mxu0 %vm89_vm1, %v12424_v0  ;;  %v12460_v56 = vld [vmem:[%s14075_s0 + $0x262] sm:$0xff] }
  0xd6   :  { %9725 = vmatprep.mubr.msk.f32.mxu1 %vm89_vm1, %v11710_v2  ;;  %10117 = vmatprep.mubr.msk.f32.mxu0 %vm89_vm1, %v12429_v4  ;;  %v12465_v2 = vld [vmem:[%s14075_s0 + $0x272] sm:$0xff] }
  0xd9   :  { %9726 = vmatmul.mubr.msk.f32.gmra.mrb[42].mxu1 %vm89_vm1, %v11728_v52  ;;  %10118 = vmatmul.mubr.msk.f32.gmra.mrb[42].mxu0 %vm89_vm1, %v12442_v60  ;;  %v12478_v52 = vld [vmem:[%s14075_s0 + $0x27a] sm:$0xff] }
  0xda   :  { %9728 = vmatprep.mubr.msk.f32.mxu1 %vm89_vm1, %v11738_v62  ;;  %10120 = vmatprep.mubr.msk.f32.mxu0 %vm89_vm1, %v12447_v28  ;;  %v12483_v62 = vld [vmem:[%s14075_s0 + $0x28a] sm:$0xff] }
  0xdd   :  { %9729 = vmatmul.mubr.msk.f32.gmra.mrb[44].mxu1 %vm89_vm1, %v11756_v47  ;;  %10121 = vmatmul.mubr.msk.f32.gmra.mrb[44].mxu0 %vm89_vm1, %v12460_v56  ;;  %v12496_v47 = vld [vmem:[%s14075_s0 + $0x292] sm:$0xff] }
  0xde   :  { %9731 = vmatprep.mubr.msk.f32.mxu1 %vm89_vm1, %v11766_v58  ;;  %10123 = vmatprep.mubr.msk.f32.mxu0 %vm89_vm1, %v12465_v2  ;;  %v12501_v58 = vld [vmem:[%s14075_s0 + $0x2a2] sm:$0xff] }
  0xe1   :  { %9732 = vmatmul.mubr.msk.f32.gmra.mrb[46].mxu1 %vm89_vm1, %v11784_v43  ;;  %10124 = vmatmul.mubr.msk.f32.gmra.mrb[46].mxu0 %vm89_vm1, %v12478_v52  ;;  %v12514_v43 = vld [vmem:[%s14075_s0 + $0x2aa] sm:$0xff] }
  0xe2   :  { %9734 = vmatprep.mubr.msk.f32.mxu1 %vm89_vm1, %v11794_v54  ;;  %10126 = vmatprep.mubr.msk.f32.mxu0 %vm89_vm1, %v12483_v62  ;;  %v12519_v54 = vld [vmem:[%s14075_s0 + $0x2ba] sm:$0xff] }
  0xe5   :  { %9735 = vmatmul.mubr.msk.f32.gmra.mrb[48].mxu1 %vm89_vm1, %v11812_v39  ;;  %10127 = vmatmul.mubr.msk.f32.gmra.mrb[48].mxu0 %vm89_vm1, %v12496_v47  ;;  %v12532_v39 = vld [vmem:[%s14075_s0 + $0x2c2] sm:$0xff] }
  0xe6   :  { %9737 = vmatprep.mubr.msk.f32.mxu1 %vm89_vm1, %v11822_v50  ;;  %10129 = vmatprep.mubr.msk.f32.mxu0 %vm89_vm1, %v12501_v58  ;;  %v12537_v50 = vld [vmem:[%s14075_s0 + $0x2d2] sm:$0xff] }
  0xe9   :  { %9738 = vmatmul.mubr.msk.f32.gmra.mrb[50].mxu1 %vm89_vm1, %v11840_v35  ;;  %10130 = vmatmul.mubr.msk.f32.gmra.mrb[50].mxu0 %vm89_vm1, %v12514_v43  ;;  %v12550_v35 = vld [vmem:[%s14075_s0 + $0x2da] sm:$0xff] }
  0xea   :  { %9740 = vmatprep.mubr.msk.f32.mxu1 %vm89_vm1, %v11850_v45  ;;  %10132 = vmatprep.mubr.msk.f32.mxu0 %vm89_vm1, %v12519_v54  ;;  %v12555_v45 = vld [vmem:[%s14075_s0 + $0x2ea] sm:$0xff] }
  0xed   :  { %9741 = vmatmul.mubr.msk.f32.gmra.mrb[52].mxu1 %vm89_vm1, %v11868_v31  ;;  %10133 = vmatmul.mubr.msk.f32.gmra.mrb[52].mxu0 %vm89_vm1, %v12532_v39  ;;  %v12568_v31 = vld [vmem:[%s14075_s0 + $0x2f2] sm:$0xff] }
  0xee   :  { %9743 = vmatprep.mubr.msk.f32.mxu1 %vm89_vm1, %v11878_v41  ;;  %10135 = vmatprep.mubr.msk.f32.mxu0 %vm89_vm1, %v12537_v50  ;;  %v12573_v41 = vld [vmem:[%s14075_s0 + $0x302] sm:$0xff] }
  0xef   :  { %14205 = vst [vmem:[#allocation66_spill] sm:$0xff] %v12573_v41 }
  0xf1   :  { %9744 = vmatmul.mubr.msk.f32.gmra.mrb[54].mxu1 %vm89_vm1, %v11896_v26  ;;  %10136 = vmatmul.mubr.msk.f32.gmra.mrb[54].mxu0 %vm89_vm1, %v12550_v35  ;;  %v12586_v26 = vld [vmem:[%s14075_s0 + $0x30a] sm:$0xff] }
  0xf2   :  { %9746 = vmatprep.mubr.msk.f32.mxu1 %vm89_vm1, %v11906_v37  ;;  %10138 = vmatprep.mubr.msk.f32.mxu0 %vm89_vm1, %v12555_v45  ;;  %14206 = vst [vmem:[#allocation67_spill] sm:$0xff] %v12586_v26  ;;  %v12591_v37 = vld [vmem:[%s14075_s0 + $0x31a] sm:$0xff] }
  0xf3   :  { %14207 = vst [vmem:[#allocation68_spill] sm:$0xff] %v12591_v37 }
  0xf5   :  { %9747 = vmatmul.mubr.msk.f32.gmra.mrb[56].mxu1 %vm89_vm1, %v11924_v22  ;;  %10139 = vmatmul.mubr.msk.f32.gmra.mrb[56].mxu0 %vm89_vm1, %v12568_v31  ;;  %v14208_v22 = vld [vmem:[#allocation57_spill] sm:$0xff] }
  0xf6   :  { %9749 = vmatprep.mubr.msk.f32.mxu1 %vm89_vm1, %v11934_v33  ;;  %10141 = vmatprep.mubr.msk.f32.mxu0 %vm89_vm1, %v12573_v41  ;;  %v12604_v33 = vld [vmem:[%s14075_s0 + $0x322] sm:$0xff]  ;;  %v14209_v41 = vld [vmem:[#allocation59_spill] sm:$0xff] }
  0xf9   :  { %9750 = vmatmul.mubr.msk.f32.gmra.mrb[58].mxu1 %vm89_vm1, %v11952_v18  ;;  %10142 = vmatmul.mubr.msk.f32.gmra.mrb[58].mxu0 %vm89_vm1, %v12586_v26  ;;  %v14210_v18 = vld [vmem:[#allocation61_spill] sm:$0xff]  ;;  %v14211_v26 = vld [vmem:[#allocation63_spill] sm:$0xff] }
  0xfa   :  { %9752 = vmatprep.mubr.msk.f32.mxu1 %vm89_vm1, %v14208_v22  ;;  %10144 = vmatprep.mubr.msk.f32.mxu0 %vm89_vm1, %v12591_v37  ;;  %v8431_v22 = vld [vmem:[%s14075_s0 + $0x33a] sm:$0xff]  ;;  %v1573_v37 = vld [vmem:[%s14075_s0 + $0x2] sm:$0xff] }
  0xfd   :  { %9753 = vmatmul.mubr.msk.f32.gmra.mrb[60].mxu1 %vm89_vm1, %v14209_v41  ;;  %10145 = vmatmul.mubr.msk.f32.gmra.mrb[60].mxu0 %vm89_vm1, %v12604_v33  ;;  %v8172_v41 = vld [vmem:[%s14076_s1 + $0xc] sm:$0xf] }
  0xfe   :  { %9755 = vmatprep.mubr.msk.f32.mxu1 %vm89_vm1, %v14210_v18  ;;  %10147 = vmatprep.mubr.msk.f32.mxu0 %vm89_vm1, %v8430_v61  ;;  %v14212_v61 = vld [vmem:[#allocation6_spill] sm:$0xff]  ;;  %v1574_v18 = vld [vmem:[%s14075_s0 + $0xa] sm:$0xff] }
  0xff   :  { %9856 = vmatprep.subr.msk.mxu1 %vm282_vm0, %v8172_v41 }
 0x101   :  { %9756 = vmatmul.mubr.msk.f32.gmra.mrb[62].mxu1 %vm89_vm1, %v14211_v26  ;;  %10148 = vmatmul.mubr.msk.f32.gmra.mrb[62].mxu0 %vm89_vm1, %v8431_v22  ;;  %v14213_v26 = vld [vmem:[#allocation7_spill] sm:$0xff]  ;;  %v14214_v22 = vld [vmem:[#allocation8_spill] sm:$0xff] }
 0x102   :  { %9760 = vmatprep.mubr.msk.f32.mxu1 %vm89_vm1, %v1573_v37  ;;  %10152 = vmatprep.mubr.msk.f32.mxu0 %vm89_vm1, %v14212_v61  ;;  %v14215_v37 = vld [vmem:[#allocation9_spill] sm:$0xff]  ;;  %v14216_v61 = vld [vmem:[#allocation10_spill] sm:$0xff] }
 0x105   :  { %9761 = vmatmul.mubr.msk.f32.vlgmr.msra.gmra.mrb[0].mxu1 %vm89_vm1, %v1574_v18  ;;  %10153 = vmatmul.mubr.msk.f32.vlgmr.msra.gmra.mrb[0].mxu0 %vm89_vm1, %v14213_v26  ;;  %v14242_v18 = vld [vmem:[#allocation36_spill] sm:$0xff]  ;;  %v14243_v26 = vld [vmem:[#allocation37_spill] sm:$0xff] }
 0x106   :  { %9763 = vmatprep.mubr.msk.f32.mxu1 %vm89_vm1, %v12039_v10  ;;  %10155 = vmatprep.mubr.msk.f32.mxu0 %vm89_vm1, %v14214_v22  ;;  %v14217_v10 = vld [vmem:[#allocation11_spill] sm:$0xff]  ;;  %v14244_v22 = vld [vmem:[#allocation38_spill] sm:$0xff] }
 0x107   :  { %10249 = vmatpush3.msk.msra.mxu0 %vm282_vm0, %v12351_v63  ;;  %9857 = vmatpush3.msk.msra.mxu1 %vm282_vm0, %v8172_v41  ;;  %v14218_v63 = vld [vmem:[#allocation12_spill] sm:$0xff]  ;;  %v12787_v41 = vld [vmem:[%s14076_s1 + $0x20] sm:$0xf] }
 0x108   :  { %10346 = vmatprep.subr.msk.mxu0 %vm282_vm0, %v12787_v41 }
 0x109   :  { %9764 = vmatmul.mubr.msk.f32.gmra.mrb[2].mxu1 %vm89_vm1, %v12056_v29  ;;  %10156 = vmatmul.mubr.msk.f32.gmra.mrb[2].mxu0 %vm89_vm1, %v14215_v37  ;;  %v14219_v29 = vld [vmem:[#allocation13_spill] sm:$0xff]  ;;  %v14245_v37 = vld [vmem:[#allocation39_spill] sm:$0xff] }
 0x10a   :  { %9766 = vmatprep.mubr.msk.f32.mxu1 %vm89_vm1, %v12061_v14  ;;  %10158 = vmatprep.mubr.msk.f32.mxu0 %vm89_vm1, %v14216_v61  ;;  %v14220_v14 = vld [vmem:[#allocation14_spill] sm:$0xff] }
 0x10b   :  { %v8560_v61 = vld [vmem:[%s14075_s0 + $0x348] sm:$0xff] }
 0x10d   :  { %9767 = vmatmul.mubr.msk.f32.gmra.mrb[4].mxu1 %vm89_vm1, %v12074_v12  ;;  %10159 = vmatmul.mubr.msk.f32.gmra.mrb[4].mxu0 %vm89_vm1, %v14217_v10  ;;  %v14221_v12 = vld [vmem:[#allocation15_spill] sm:$0xff] }
 0x10e   :  { %9769 = vmatprep.mubr.msk.f32.mxu1 %vm89_vm1, %v12079_v24  ;;  %10161 = vmatprep.mubr.msk.f32.mxu0 %vm89_vm1, %v14218_v63  ;;  %v14222_v24 = vld [vmem:[#allocation16_spill] sm:$0xff]  ;;  %v14269_v10 = vld [vmem:[#allocation67_spill] sm:$0xff] }
 0x10f   :  { %v8561_v63 = vld [vmem:[%s14075_s0 + $0x350] sm:$0xff] }
 0x111   :  { %9770 = vmatmul.mubr.msk.f32.gmra.mrb[6].mxu1 %vm89_vm1, %v12095_v3  ;;  %10162 = vmatmul.mubr.msk.f32.gmra.mrb[6].mxu0 %vm89_vm1, %v14219_v29  ;;  %v14223_v3 = vld [vmem:[#allocation17_spill] sm:$0xff] }
 0x112   :  { %9772 = vmatprep.mubr.msk.f32.mxu1 %vm89_vm1, %v12100_v16  ;;  %10164 = vmatprep.mubr.msk.f32.mxu0 %vm89_vm1, %v14220_v14  ;;  %v14224_v16 = vld [vmem:[#allocation18_spill] sm:$0xff]  ;;  %v8108_v29 = vld [vmem:[%s14075_s0 + $0x18] sm:$0xff] }
 0x113   :  { %v8628_v14 = vld [vmem:[%s14075_s0 + $0x31] sm:$0xff] }
 0x115   :  { %9773 = vmatmul.mubr.msk.f32.gmra.mrb[8].mxu1 %vm89_vm1, %v12113_v5  ;;  %10165 = vmatmul.mubr.msk.f32.gmra.mrb[8].mxu0 %vm89_vm1, %v14221_v12  ;;  %v14225_v5 = vld [vmem:[#allocation19_spill] sm:$0xff]  ;;  %v8109_v12 = vld [vmem:[%s14075_s0 + $0x20] sm:$0xff] }
 0x116   :  { %9775 = vmatprep.mubr.msk.f32.mxu1 %vm89_vm1, %v12118_v7  ;;  %10167 = vmatprep.mubr.msk.f32.mxu0 %vm89_vm1, %v14222_v24  ;;  %v14226_v7 = vld [vmem:[#allocation20_spill] sm:$0xff] }
 0x117   :  { %v8629_v24 = vld [vmem:[%s14075_s0 + $0x39] sm:$0xff] }
 0x119   :  { %9776 = vmatmul.mubr.msk.f32.gmra.mrb[10].mxu1 %vm89_vm1, %v12131_v9  ;;  %10168 = vmatmul.mubr.msk.f32.gmra.mrb[10].mxu0 %vm89_vm1, %v14223_v3  ;;  %v14227_v9 = vld [vmem:[#allocation21_spill] sm:$0xff]  ;;  %v8110_v3 = vld [vmem:[%s14075_s0 + $0x30] sm:$0xff] }
 0x11a   :  { %9778 = vmatprep.mubr.msk.f32.mxu1 %vm89_vm1, %v12136_v11  ;;  %10170 = vmatprep.mubr.msk.f32.mxu0 %vm89_vm1, %v14224_v16  ;;  %v14228_v11 = vld [vmem:[#allocation22_spill] sm:$0xff]  ;;  %v8111_v16 = vld [vmem:[%s14075_s0 + $0x38] sm:$0xff] }
 0x11d   :  { %9779 = vmatmul.mubr.msk.f32.gmra.mrb[12].mxu1 %vm89_vm1, %v12149_v13  ;;  %10171 = vmatmul.mubr.msk.f32.gmra.mrb[12].mxu0 %vm89_vm1, %v14225_v5  ;;  %v14229_v13 = vld [vmem:[#allocation23_spill] sm:$0xff] }
 0x11e   :  { %9781 = vmatprep.mubr.msk.f32.mxu1 %vm89_vm1, %v12154_v15  ;;  %10173 = vmatprep.mubr.msk.f32.mxu0 %vm89_vm1, %v14226_v7  ;;  %v14230_v15 = vld [vmem:[#allocation24_spill] sm:$0xff]  ;;  %v8112_v7 = vld [vmem:[%s14075_s0 + $0x48] sm:$0xff] }
 0x11f   :  { %v8631_v5 = vld [vmem:[%s14075_s0 + $0x51] sm:$0xff] }
 0x121   :  { %9782 = vmatmul.mubr.msk.f32.gmra.mrb[14].mxu1 %vm89_vm1, %v12167_v17  ;;  %10174 = vmatmul.mubr.msk.f32.gmra.mrb[14].mxu0 %vm89_vm1, %v14227_v9  ;;  %v14231_v17 = vld [vmem:[#allocation25_spill] sm:$0xff] }
 0x122   :  { %9784 = vmatprep.mubr.msk.f32.mxu1 %vm89_vm1, %v12172_v19  ;;  %10176 = vmatprep.mubr.msk.f32.mxu0 %vm89_vm1, %v14228_v11  ;;  %v14232_v19 = vld [vmem:[#allocation26_spill] sm:$0xff]  ;;  %v8113_v11 = vld [vmem:[%s14075_s0 + $0x50] sm:$0xff] }
 0x123   :  { %v8632_v9 = vld [vmem:[%s14075_s0 + $0x61] sm:$0xff] }
 0x125   :  { %9785 = vmatmul.mubr.msk.f32.gmra.mrb[16].mxu1 %vm89_vm1, %v12185_v21  ;;  %10177 = vmatmul.mubr.msk.f32.gmra.mrb[16].mxu0 %vm89_vm1, %v14229_v13  ;;  %v14233_v21 = vld [vmem:[#allocation27_spill] sm:$0xff] }
 0x126   :  { %9787 = vmatprep.mubr.msk.f32.mxu1 %vm89_vm1, %v12190_v23  ;;  %10179 = vmatprep.mubr.msk.f32.mxu0 %vm89_vm1, %v14230_v15  ;;  %v14234_v23 = vld [vmem:[#allocation28_spill] sm:$0xff]  ;;  %v8633_v13 = vld [vmem:[%s14075_s0 + $0x69] sm:$0xff]  ;;  %v8114_v15 = vld [vmem:[%s14075_s0 + $0x60] sm:$0xff] }
 0x129   :  { %9788 = vmatmul.mubr.msk.f32.gmra.mrb[18].mxu1 %vm89_vm1, %v12203_v25  ;;  %10180 = vmatmul.mubr.msk.f32.gmra.mrb[18].mxu0 %vm89_vm1, %v14231_v17  ;;  %v14235_v25 = vld [vmem:[#allocation29_spill] sm:$0xff] }
 0x12a   :  { %9790 = vmatprep.mubr.msk.f32.mxu1 %vm89_vm1, %v12208_v27  ;;  %10182 = vmatprep.mubr.msk.f32.mxu0 %vm89_vm1, %v14232_v19  ;;  %v14236_v27 = vld [vmem:[#allocation30_spill] sm:$0xff]  ;;  %v8634_v17 = vld [vmem:[%s14075_s0 + $0x79] sm:$0xff] }
 0x12b   :  { %v8115_v19 = vld [vmem:[%s14075_s0 + $0x68] sm:$0xff] }
 0x12d   :  { %9791 = vmatmul.mubr.msk.f32.gmra.mrb[20].mxu1 %vm89_vm1, %v12221_v30  ;;  %10183 = vmatmul.mubr.msk.f32.gmra.mrb[20].mxu0 %vm89_vm1, %v14233_v21  ;;  %v14237_v30 = vld [vmem:[#allocation31_spill] sm:$0xff]  ;;  %v8635_v21 = vld [vmem:[%s14075_s0 + $0x81] sm:$0xff] }
 0x12e   :  { %9793 = vmatprep.mubr.msk.f32.mxu1 %vm89_vm1, %v12226_v32  ;;  %10185 = vmatprep.mubr.msk.f32.mxu0 %vm89_vm1, %v14234_v23  ;;  %v14238_v32 = vld [vmem:[#allocation32_spill] sm:$0xff] }
 0x12f   :  { %v8116_v23 = vld [vmem:[%s14075_s0 + $0x78] sm:$0xff] }
 0x131   :  { %9794 = vmatmul.mubr.msk.f32.gmra.mrb[22].mxu1 %vm89_vm1, %v12239_v34  ;;  %10186 = vmatmul.mubr.msk.f32.gmra.mrb[22].mxu0 %vm89_vm1, %v14235_v25  ;;  %v12744_v34 = vld [vmem:[%s14075_s0 + $0x180] sm:$0xff]  ;;  %v8636_v25 = vld [vmem:[%s14075_s0 + $0x91] sm:$0xff] }
 0x132   :  { %9796 = vmatprep.mubr.msk.f32.mxu1 %vm89_vm1, %v12244_v36  ;;  %10188 = vmatprep.mubr.msk.f32.mxu0 %vm89_vm1, %v14236_v27  ;;  %v14239_v36 = vld [vmem:[#allocation33_spill] sm:$0xff] }
 0x133   :  { %v8117_v27 = vld [vmem:[%s14075_s0 + $0x80] sm:$0xff] }
 0x135   :  { %9797 = vmatmul.mubr.msk.f32.gmra.mrb[24].mxu1 %vm89_vm1, %v12257_v38  ;;  %10189 = vmatmul.mubr.msk.f32.gmra.mrb[24].mxu0 %vm89_vm1, %v14237_v30  ;;  %v12757_v38 = vld [vmem:[%s14075_s0 + $0x188] sm:$0xff]  ;;  %v8637_v30 = vld [vmem:[%s14075_s0 + $0x99] sm:$0xff] }
 0x136   :  { %9799 = vmatprep.mubr.msk.f32.mxu1 %vm89_vm1, %v12262_v40  ;;  %10191 = vmatprep.mubr.msk.f32.mxu0 %vm89_vm1, %v14238_v32  ;;  %v8528_v40 = vld [vmem:[%s14075_s0 + $0x198] sm:$0xff]  ;;  %v8118_v32 = vld [vmem:[%s14075_s0 + $0x90] sm:$0xff] }
 0x139   :  { %9800 = vmatmul.mubr.msk.f32.gmra.mrb[26].mxu1 %vm89_vm1, %v12275_v42  ;;  %10192 = vmatmul.mubr.msk.f32.gmra.mrb[26].mxu0 %vm89_vm1, %v14239_v36  ;;  %v8529_v42 = vld [vmem:[%s14075_s0 + $0x1a0] sm:$0xff]  ;;  %v8638_v36 = vld [vmem:[%s14075_s0 + $0xa9] sm:$0xff] }
 0x13a   :  { %9802 = vmatprep.mubr.msk.f32.mxu1 %vm89_vm1, %v12280_v44  ;;  %10194 = vmatprep.mubr.msk.f32.mxu0 %vm89_vm1, %v12744_v34  ;;  %v1605_v44 = vld [vmem:[%s14075_s0 + $0x1b2] sm:$0xff] }
 0x13d   :  { %9803 = vmatmul.mubr.msk.f32.gmra.mrb[28].mxu1 %vm89_vm1, %v12293_v46  ;;  %10195 = vmatmul.mubr.msk.f32.gmra.mrb[28].mxu0 %vm89_vm1, %v12757_v38  ;;  %v14240_v46 = vld [vmem:[#allocation34_spill] sm:$0xff] }
 0x13e   :  { %9805 = vmatprep.mubr.msk.f32.mxu1 %vm89_vm1, %v12298_v48  ;;  %10197 = vmatprep.mubr.msk.f32.mxu0 %vm89_vm1, %v8528_v40  ;;  %v1606_v48 = vld [vmem:[%s14075_s0 + $0x1ba] sm:$0xff] }
 0x13f   :  { %v8119_v40 = vld [vmem:[%s14075_s0 + $0x98] sm:$0xff] }
 0x141   :  { %9806 = vmatmul.mubr.msk.f32.gmra.mrb[30].mxu1 %vm89_vm1, %v12311_v51  ;;  %10198 = vmatmul.mubr.msk.f32.gmra.mrb[30].mxu0 %vm89_vm1, %v8529_v42  ;;  %v14241_v51 = vld [vmem:[#allocation35_spill] sm:$0xff] }
 0x142   :  { %9808 = vmatprep.mubr.msk.f32.mxu1 %vm89_vm1, %v1605_v44  ;;  %10200 = vmatprep.mubr.msk.f32.mxu0 %vm89_vm1, %v14240_v46  ;;  %v8639_v42 = vld [vmem:[%s14075_s0 + $0xb1] sm:$0xff]  ;;  %v8120_v44 = vld [vmem:[%s14075_s0 + $0xa8] sm:$0xff] }
 0x143   :  { %v8640_v46 = vld [vmem:[%s14075_s0 + $0xc1] sm:$0xff] }
 0x145   :  { %9809 = vmatmul.mubr.msk.f32.gmra.mrb[32].mxu1 %vm89_vm1, %v1606_v48  ;;  %10201 = vmatmul.mubr.msk.f32.gmra.mrb[32].mxu0 %vm89_vm1, %v14241_v51  ;;  %v8121_v48 = vld [vmem:[%s14075_s0 + $0xb0] sm:$0xff]  ;;  %v8122_v51 = vld [vmem:[%s14075_s0 + $0xc0] sm:$0xff] }
 0x146   :  { %9811 = vmatprep.mubr.msk.f32.mxu1 %vm89_vm1, %v12332_v59  ;;  %10203 = vmatprep.mubr.msk.f32.mxu0 %vm89_vm1, %v14242_v18  ;;  %v14246_v59 = vld [vmem:[#allocation40_spill] sm:$0xff] }
 0x147   :  { %v8642_v18 = vld [vmem:[%s14075_s0 + $0xd9] sm:$0xff] }
 0x149   :  { %9812 = vmatmul.mubr.msk.f32.gmra.mrb[34].mxu1 %vm89_vm1, %v12346_v1  ;;  %10204 = vmatmul.mubr.msk.f32.gmra.mrb[34].mxu0 %vm89_vm1, %v14243_v26  ;;  %v14247_v1 = vld [vmem:[#allocation41_spill] sm:$0xff]  ;;  %v8123_v26 = vld [vmem:[%s14075_s0 + $0xc8] sm:$0xff] }
 0x14a   :  { %9814 = vmatprep.mubr.msk.f32.mxu1 %vm89_vm1, %v12356_v20  ;;  %10206 = vmatprep.mubr.msk.f32.mxu0 %vm89_vm1, %v14244_v22  ;;  %v14248_v20 = vld [vmem:[#allocation42_spill] sm:$0xff] }
 0x14b   :  { %v8643_v22 = vld [vmem:[%s14075_s0 + $0xe1] sm:$0xff] }
 0x14d   :  { %9815 = vmatmul.mubr.msk.f32.gmra.mrb[36].mxu1 %vm89_vm1, %v12370_v53  ;;  %10207 = vmatmul.mubr.msk.f32.gmra.mrb[36].mxu0 %vm89_vm1, %v14245_v37  ;;  %v14249_v53 = vld [vmem:[#allocation43_spill] sm:$0xff]  ;;  %v8124_v37 = vld [vmem:[%s14075_s0 + $0xd8] sm:$0xff] }
 0x14e   :  { %9817 = vmatprep.mubr.msk.f32.mxu1 %vm89_vm1, %v12375_v55  ;;  %10209 = vmatprep.mubr.msk.f32.mxu0 %vm89_vm1, %v14246_v59  ;;  %v14250_v55 = vld [vmem:[#allocation44_spill] sm:$0xff] }
 0x14f   :  { %v8644_v59 = vld [vmem:[%s14075_s0 + $0xf1] sm:$0xff] }
 0x151   :  { %9818 = vmatmul.mubr.msk.f32.gmra.mrb[38].mxu1 %vm89_vm1, %v12388_v8  ;;  %10210 = vmatmul.mubr.msk.f32.gmra.mrb[38].mxu0 %vm89_vm1, %v14247_v1  ;;  %v14251_v8 = vld [vmem:[#allocation45_spill] sm:$0xff] }
 0x152   :  { %9820 = vmatprep.mubr.msk.f32.mxu1 %vm89_vm1, %v12393_v57  ;;  %10212 = vmatprep.mubr.msk.f32.mxu0 %vm89_vm1, %v14248_v20  ;;  %v14252_v57 = vld [vmem:[#allocation46_spill] sm:$0xff]  ;;  %v8645_v20 = vld [vmem:[%s14075_s0 + $0xf9] sm:$0xff] }
 0x153   :  { %v8125_v1 = vld [vmem:[%s14075_s0 + $0xe0] sm:$0xff] }
 0x155   :  { %9821 = vmatmul.mubr.msk.f32.gmra.mrb[40].mxu1 %vm89_vm1, %v12406_v49  ;;  %10213 = vmatmul.mubr.msk.f32.gmra.mrb[40].mxu0 %vm89_vm1, %v14249_v53  ;;  %v14253_v49 = vld [vmem:[#allocation47_spill] sm:$0xff] }
 0x156   :  { %9823 = vmatprep.mubr.msk.f32.mxu1 %vm89_vm1, %v12411_v6  ;;  %10215 = vmatprep.mubr.msk.f32.mxu0 %vm89_vm1, %v14250_v55  ;;  %v14254_v6 = vld [vmem:[#allocation48_spill] sm:$0xff]  ;;  %v8646_v55 = vld [vmem:[%s14075_s0 + $0x109] sm:$0xff] }
 0x157   :  { %v8126_v53 = vld [vmem:[%s14075_s0 + $0xf0] sm:$0xff] }
 0x159   :  { %9824 = vmatmul.mubr.msk.f32.gmra.mrb[42].mxu1 %vm89_vm1, %v12424_v0  ;;  %10216 = vmatmul.mubr.msk.f32.gmra.mrb[42].mxu0 %vm89_vm1, %v14251_v8  ;;  %v14255_v0 = vld [vmem:[#allocation49_spill] sm:$0xff] }
 0x15a   :  { %9826 = vmatprep.mubr.msk.f32.mxu1 %vm89_vm1, %v12429_v4  ;;  %10218 = vmatprep.mubr.msk.f32.mxu0 %vm89_vm1, %v14252_v57  ;;  %v14256_v4 = vld [vmem:[#allocation50_spill] sm:$0xff]  ;;  %v8127_v8 = vld [vmem:[%s14075_s0 + $0xf8] sm:$0xff] }
 0x15b   :  { %v8647_v57 = vld [vmem:[%s14075_s0 + $0x111] sm:$0xff] }
 0x15d   :  { %9827 = vmatmul.mubr.msk.f32.gmra.mrb[44].mxu1 %vm89_vm1, %v12442_v60  ;;  %10219 = vmatmul.mubr.msk.f32.gmra.mrb[44].mxu0 %vm89_vm1, %v14253_v49  ;;  %v14257_v60 = vld [vmem:[#allocation51_spill] sm:$0xff] }
 0x15e   :  { %9829 = vmatprep.mubr.msk.f32.mxu1 %vm89_vm1, %v12447_v28  ;;  %10221 = vmatprep.mubr.msk.f32.mxu0 %vm89_vm1, %v14254_v6  ;;  %v14258_v28 = vld [vmem:[#allocation52_spill] sm:$0xff]  ;;  %v8128_v49 = vld [vmem:[%s14075_s0 + $0x108] sm:$0xff] }
 0x15f   :  { %v8648_v6 = vld [vmem:[%s14075_s0 + $0x121] sm:$0xff] }
 0x161   :  { %9830 = vmatmul.mubr.msk.f32.gmra.mrb[46].mxu1 %vm89_vm1, %v12460_v56  ;;  %10222 = vmatmul.mubr.msk.f32.gmra.mrb[46].mxu0 %vm89_vm1, %v14255_v0  ;;  %v14259_v56 = vld [vmem:[#allocation53_spill] sm:$0xff]  ;;  %v8129_v0 = vld [vmem:[%s14075_s0 + $0x110] sm:$0xff] }
 0x162   :  { %9832 = vmatprep.mubr.msk.f32.mxu1 %vm89_vm1, %v12465_v2  ;;  %10224 = vmatprep.mubr.msk.f32.mxu0 %vm89_vm1, %v14256_v4  ;;  %v14260_v2 = vld [vmem:[#allocation54_spill] sm:$0xff] }
 0x163   :  { %v8649_v4 = vld [vmem:[%s14075_s0 + $0x129] sm:$0xff] }
 0x165   :  { %9833 = vmatmul.mubr.msk.f32.gmra.mrb[48].mxu1 %vm89_vm1, %v12478_v52  ;;  %10225 = vmatmul.mubr.msk.f32.gmra.mrb[48].mxu0 %vm89_vm1, %v14257_v60  ;;  %v14261_v52 = vld [vmem:[#allocation55_spill] sm:$0xff]  ;;  %v8130_v60 = vld [vmem:[%s14075_s0 + $0x120] sm:$0xff] }
 0x166   :  { %9835 = vmatprep.mubr.msk.f32.mxu1 %vm89_vm1, %v12483_v62  ;;  %10227 = vmatprep.mubr.msk.f32.mxu0 %vm89_vm1, %v14258_v28  ;;  %v14262_v62 = vld [vmem:[#allocation56_spill] sm:$0xff] }
 0x167   :  { %v8650_v28 = vld [vmem:[%s14075_s0 + $0x139] sm:$0xff] }
 0x169   :  { %9836 = vmatmul.mubr.msk.f32.gmra.mrb[50].mxu1 %vm89_vm1, %v12496_v47  ;;  %10228 = vmatmul.mubr.msk.f32.gmra.mrb[50].mxu0 %vm89_vm1, %v14259_v56  ;;  %v14263_v47 = vld [vmem:[#allocation58_spill] sm:$0xff] }
 0x16a   :  { %9838 = vmatprep.mubr.msk.f32.mxu1 %vm89_vm1, %v12501_v58  ;;  %10230 = vmatprep.mubr.msk.f32.mxu0 %vm89_vm1, %v14260_v2  ;;  %v14264_v58 = vld [vmem:[#allocation60_spill] sm:$0xff]  ;;  %v8131_v56 = vld [vmem:[%s14075_s0 + $0x128] sm:$0xff] }
 0x16b   :  { %v8651_v2 = vld [vmem:[%s14075_s0 + $0x141] sm:$0xff] }
 0x16d   :  { %9839 = vmatmul.mubr.msk.f32.gmra.mrb[52].mxu1 %vm89_vm1, %v12514_v43  ;;  %10231 = vmatmul.mubr.msk.f32.gmra.mrb[52].mxu0 %vm89_vm1, %v14261_v52  ;;  %v14265_v43 = vld [vmem:[#allocation62_spill] sm:$0xff]  ;;  %v8132_v52 = vld [vmem:[%s14075_s0 + $0x138] sm:$0xff] }
 0x16e   :  { %9841 = vmatprep.mubr.msk.f32.mxu1 %vm89_vm1, %v12519_v54  ;;  %10233 = vmatprep.mubr.msk.f32.mxu0 %vm89_vm1, %v14262_v62  ;;  %v14266_v54 = vld [vmem:[#allocation64_spill] sm:$0xff] }
 0x16f   :  { %v8652_v62 = vld [vmem:[%s14075_s0 + $0x151] sm:$0xff] }
 0x171   :  { %9842 = vmatmul.mubr.msk.f32.gmra.mrb[54].mxu1 %vm89_vm1, %v12532_v39  ;;  %10234 = vmatmul.mubr.msk.f32.gmra.mrb[54].mxu0 %vm89_vm1, %v14263_v47  ;;  %v12897_v39 = vld [vmem:[%s14075_s0 + $0x330] sm:$0xff]  ;;  %v8133_v47 = vld [vmem:[%s14075_s0 + $0x140] sm:$0xff] }
 0x172   :  { %9844 = vmatprep.mubr.msk.f32.mxu1 %vm89_vm1, %v12537_v50  ;;  %10236 = vmatprep.mubr.msk.f32.mxu0 %vm89_vm1, %v14264_v58  ;;  %v14267_v50 = vld [vmem:[#allocation65_spill] sm:$0xff] }
 0x173   :  { %v8653_v58 = vld [vmem:[%s14075_s0 + $0x159] sm:$0xff] }
 0x175   :  { %9845 = vmatmul.mubr.msk.f32.gmra.mrb[56].mxu1 %vm89_vm1, %v12550_v35  ;;  %10237 = vmatmul.mubr.msk.f32.gmra.mrb[56].mxu0 %vm89_vm1, %v14265_v43  ;;  %v14268_v35 = vld [vmem:[#allocation66_spill] sm:$0xff]  ;;  %v8134_v43 = vld [vmem:[%s14075_s0 + $0x150] sm:$0xff] }
 0x176   :  { %9847 = vmatprep.mubr.msk.f32.mxu1 %vm89_vm1, %v12555_v45  ;;  %10239 = vmatprep.mubr.msk.f32.mxu0 %vm89_vm1, %v14266_v54  ;;  %v12910_v45 = vld [vmem:[%s14075_s0 + $0x338] sm:$0xff]  ;;  %v8654_v54 = vld [vmem:[%s14075_s0 + $0x169] sm:$0xff] }
 0x179   :  { %9848 = vmatmul.mubr.msk.f32.gmra.mrb[58].mxu1 %vm89_vm1, %v12568_v31  ;;  %10240 = vmatmul.mubr.msk.f32.gmra.mrb[58].mxu0 %vm89_vm1, %v14267_v50  ;;  %v14270_v31 = vld [vmem:[#allocation68_spill] sm:$0xff] }
 0x17a   :  { %9850 = vmatprep.mubr.msk.f32.mxu1 %vm89_vm1, %v14268_v35  ;;  %10242 = vmatprep.mubr.msk.f32.mxu0 %vm89_vm1, %v12897_v39  ;;  %v8135_v50 = vld [vmem:[%s14075_s0 + $0x158] sm:$0xff] }
 0x17b   :  { %v8655_v35 = vld [vmem:[%s14075_s0 + $0x171] sm:$0xff] }
 0x17d   :  { %9851 = vmatmul.mubr.msk.f32.gmra.mrb[60].mxu1 %vm89_vm1, %v14269_v10  ;;  %10243 = vmatmul.mubr.msk.f32.gmra.mrb[60].mxu0 %vm89_vm1, %v12910_v45  ;;  %v8656_v10 = vld [vmem:[%s14075_s0 + $0x181] sm:$0xff] }
 0x17e   :  { %9853 = vmatprep.mubr.msk.f32.mxu1 %vm89_vm1, %v14270_v31  ;;  %10245 = vmatprep.mubr.msk.f32.mxu0 %vm89_vm1, %v8560_v61  ;;  %v8136_v61 = vld [vmem:[%s14075_s0 + $0x168] sm:$0xff]  ;;  %v8137_v31 = vld [vmem:[%s14075_s0 + $0x170] sm:$0xff] }
 0x181   :  { %9854 = vmatmul.mubr.msk.f32.gmra.mrb[62].mxu1 %vm89_vm1, %v12604_v33  ;;  %10246 = vmatmul.mubr.msk.f32.gmra.mrb[62].mxu0 %vm89_vm1, %v8561_v63  ;;  %v8630_v33 = vld [vmem:[%s14075_s0 + $0x49] sm:$0xff] }
 0x182   :  { %9858 = vmatprep.mubr.msk.f32.mxu1 %vm89_vm1, %v8108_v29  ;;  %10250 = vmatprep.mubr.msk.f32.mxu0 %vm89_vm1, %v8628_v14  ;;  %v8657_v63 = vld [vmem:[%s14075_s0 + $0x189] sm:$0xff]  ;;  %v8658_v29 = vld [vmem:[%s14075_s0 + $0x199] sm:$0xff]  ;;  %v8659_v14 = vld [vmem:[%s14075_s0 + $0x1a1] sm:$0xff] }
 0x185   :  { %9859 = vmatmul.mubr.msk.f32.vlgmr.msra.gmra.mrb[0].mxu1 %vm89_vm1, %v8109_v12  ;;  %10251 = vmatmul.mubr.msk.f32.vlgmr.msra.gmra.mrb[0].mxu0 %vm89_vm1, %v8629_v24  ;;  %v8140_v12 = vld [vmem:[%s14075_s0 + $0x1c8] sm:$0xff] }
 0x186   :  { %9861 = vmatprep.mubr.msk.f32.mxu1 %vm89_vm1, %v8110_v3  ;;  %10253 = vmatprep.mubr.msk.f32.mxu0 %vm89_vm1, %v8630_v33  ;;  %v8660_v24 = vld [vmem:[%s14075_s0 + $0x1e1] sm:$0xff]  ;;  %v8661_v3 = vld [vmem:[%s14075_s0 + $0x1e9] sm:$0xff] }
 0x187   :  { %10347 = vmatpush3.msk.msra.mxu0 %vm282_vm0, %v12787_v41  ;;  %v8641_v41 = vld [vmem:[%s14075_s0 + $0xc9] sm:$0xff]  ;;  %v8142_v33 = vld [vmem:[%s14075_s0 + $0x1e0] sm:$0xff] }
 0x189   :  { %9862 = vmatmul.mubr.msk.f32.gmra.mrb[2].mxu1 %vm89_vm1, %v8111_v16  ;;  %10254 = vmatmul.mubr.msk.f32.gmra.mrb[2].mxu0 %vm89_vm1, %v8631_v5  ;;  %v8143_v16 = vld [vmem:[%s14075_s0 + $0x1e8] sm:$0xff] }
 0x18a   :  { %9864 = vmatprep.mubr.msk.f32.mxu1 %vm89_vm1, %v8112_v7  ;;  %10256 = vmatprep.mubr.msk.f32.mxu0 %vm89_vm1, %v8632_v9  ;;  %v8663_v5 = vld [vmem:[%s14075_s0 + $0x201] sm:$0xff]  ;;  %v8144_v7 = vld [vmem:[%s14075_s0 + $0x1f8] sm:$0xff] }
 0x18b   :  { %v8664_v9 = vld [vmem:[%s14075_s0 + $0x211] sm:$0xff] }
 0x18d   :  { %9865 = vmatmul.mubr.msk.f32.gmra.mrb[4].mxu1 %vm89_vm1, %v8113_v11  ;;  %10257 = vmatmul.mubr.msk.f32.gmra.mrb[4].mxu0 %vm89_vm1, %v8633_v13  ;;  %v8145_v11 = vld [vmem:[%s14075_s0 + $0x200] sm:$0xff] }
 0x18e   :  { %9867 = vmatprep.mubr.msk.f32.mxu1 %vm89_vm1, %v8114_v15  ;;  %10259 = vmatprep.mubr.msk.f32.mxu0 %vm89_vm1, %v8634_v17  ;;  %v8665_v13 = vld [vmem:[%s14075_s0 + $0x219] sm:$0xff]  ;;  %v8146_v15 = vld [vmem:[%s14075_s0 + $0x210] sm:$0xff] }
 0x18f   :  { %v8666_v17 = vld [vmem:[%s14075_s0 + $0x229] sm:$0xff] }
 0x191   :  { %9868 = vmatmul.mubr.msk.f32.gmra.mrb[6].mxu1 %vm89_vm1, %v8115_v19  ;;  %10260 = vmatmul.mubr.msk.f32.gmra.mrb[6].mxu0 %vm89_vm1, %v8635_v21  ;;  %v8147_v19 = vld [vmem:[%s14075_s0 + $0x218] sm:$0xff] }
 0x192   :  { %9870 = vmatprep.mubr.msk.f32.mxu1 %vm89_vm1, %v8116_v23  ;;  %10262 = vmatprep.mubr.msk.f32.mxu0 %vm89_vm1, %v8636_v25  ;;  %v8667_v21 = vld [vmem:[%s14075_s0 + $0x231] sm:$0xff]  ;;  %v8148_v23 = vld [vmem:[%s14075_s0 + $0x228] sm:$0xff] }
 0x193   :  { %v8668_v25 = vld [vmem:[%s14075_s0 + $0x241] sm:$0xff] }
 0x195   :  { %9871 = vmatmul.mubr.msk.f32.gmra.mrb[8].mxu1 %vm89_vm1, %v8117_v27  ;;  %10263 = vmatmul.mubr.msk.f32.gmra.mrb[8].mxu0 %vm89_vm1, %v8637_v30  ;;  %v8149_v27 = vld [vmem:[%s14075_s0 + $0x230] sm:$0xff] }
 0x196   :  { %9873 = vmatprep.mubr.msk.f32.mxu1 %vm89_vm1, %v8118_v32  ;;  %10265 = vmatprep.mubr.msk.f32.mxu0 %vm89_vm1, %v8638_v36  ;;  %v8669_v30 = vld [vmem:[%s14075_s0 + $0x249] sm:$0xff]  ;;  %v8150_v32 = vld [vmem:[%s14075_s0 + $0x240] sm:$0xff] }
 0x197   :  { %v8670_v36 = vld [vmem:[%s14075_s0 + $0x259] sm:$0xff] }
 0x199   :  { %9874 = vmatmul.mubr.msk.f32.gmra.mrb[10].mxu1 %vm89_vm1, %v8119_v40  ;;  %10266 = vmatmul.mubr.msk.f32.gmra.mrb[10].mxu0 %vm89_vm1, %v8639_v42  ;;  %v8151_v40 = vld [vmem:[%s14075_s0 + $0x248] sm:$0xff] }
 0x19a   :  { %9876 = vmatprep.mubr.msk.f32.mxu1 %vm89_vm1, %v8120_v44  ;;  %10268 = vmatprep.mubr.msk.f32.mxu0 %vm89_vm1, %v8640_v46  ;;  %v8671_v42 = vld [vmem:[%s14075_s0 + $0x261] sm:$0xff]  ;;  %v8152_v44 = vld [vmem:[%s14075_s0 + $0x258] sm:$0xff] }
 0x19b   :  { %v8672_v46 = vld [vmem:[%s14075_s0 + $0x271] sm:$0xff] }
 0x19d   :  { %9877 = vmatmul.mubr.msk.f32.gmra.mrb[12].mxu1 %vm89_vm1, %v8121_v48  ;;  %10269 = vmatmul.mubr.msk.f32.gmra.mrb[12].mxu0 %vm89_vm1, %v8641_v41  ;;  %v8153_v48 = vld [vmem:[%s14075_s0 + $0x260] sm:$0xff] }
 0x19e   :  { %9879 = vmatprep.mubr.msk.f32.mxu1 %vm89_vm1, %v8122_v51  ;;  %10271 = vmatprep.mubr.msk.f32.mxu0 %vm89_vm1, %v8642_v18  ;;  %v8673_v41 = vld [vmem:[%s14075_s0 + $0x279] sm:$0xff]  ;;  %v8154_v51 = vld [vmem:[%s14075_s0 + $0x270] sm:$0xff] }
 0x19f   :  { %v8674_v18 = vld [vmem:[%s14075_s0 + $0x289] sm:$0xff] }
 0x1a1   :  { %9880 = vmatmul.mubr.msk.f32.gmra.mrb[14].mxu1 %vm89_vm1, %v8123_v26  ;;  %10272 = vmatmul.mubr.msk.f32.gmra.mrb[14].mxu0 %vm89_vm1, %v8643_v22  ;;  %v8155_v26 = vld [vmem:[%s14075_s0 + $0x278] sm:$0xff] }
 0x1a2   :  { %9882 = vmatprep.mubr.msk.f32.mxu1 %vm89_vm1, %v8124_v37  ;;  %10274 = vmatprep.mubr.msk.f32.mxu0 %vm89_vm1, %v8644_v59  ;;  %v8675_v22 = vld [vmem:[%s14075_s0 + $0x291] sm:$0xff]  ;;  %v8156_v37 = vld [vmem:[%s14075_s0 + $0x288] sm:$0xff] }
 0x1a3   :  { %v8676_v59 = vld [vmem:[%s14075_s0 + $0x2a1] sm:$0xff] }
 0x1a5   :  { %9883 = vmatmul.mubr.msk.f32.gmra.mrb[16].mxu1 %vm89_vm1, %v8125_v1  ;;  %10275 = vmatmul.mubr.msk.f32.gmra.mrb[16].mxu0 %vm89_vm1, %v8645_v20  ;;  %v8157_v1 = vld [vmem:[%s14075_s0 + $0x290] sm:$0xff] }
 0x1a6   :  { %9885 = vmatprep.mubr.msk.f32.mxu1 %vm89_vm1, %v8126_v53  ;;  %10277 = vmatprep.mubr.msk.f32.mxu0 %vm89_vm1, %v8646_v55  ;;  %v8677_v20 = vld [vmem:[%s14075_s0 + $0x2a9] sm:$0xff]  ;;  %v8158_v53 = vld [vmem:[%s14075_s0 + $0x2a0] sm:$0xff] }
 0x1a7   :  { %v8678_v55 = vld [vmem:[%s14075_s0 + $0x2b9] sm:$0xff] }
 0x1a9   :  { %9886 = vmatmul.mubr.msk.f32.gmra.mrb[18].mxu1 %vm89_vm1, %v8127_v8  ;;  %10278 = vmatmul.mubr.msk.f32.gmra.mrb[18].mxu0 %vm89_vm1, %v8647_v57  ;;  %v8159_v8 = vld [vmem:[%s14075_s0 + $0x2a8] sm:$0xff] }
 0x1aa   :  { %9888 = vmatprep.mubr.msk.f32.mxu1 %vm89_vm1, %v8128_v49  ;;  %10280 = vmatprep.mubr.msk.f32.mxu0 %vm89_vm1, %v8648_v6  ;;  %v8679_v57 = vld [vmem:[%s14075_s0 + $0x2c1] sm:$0xff]  ;;  %v8160_v49 = vld [vmem:[%s14075_s0 + $0x2b8] sm:$0xff] }
 0x1ab   :  { %v8680_v6 = vld [vmem:[%s14075_s0 + $0x2d1] sm:$0xff] }
 0x1ad   :  { %9889 = vmatmul.mubr.msk.f32.gmra.mrb[20].mxu1 %vm89_vm1, %v8129_v0  ;;  %10281 = vmatmul.mubr.msk.f32.gmra.mrb[20].mxu0 %vm89_vm1, %v8649_v4  ;;  %v8161_v0 = vld [vmem:[%s14075_s0 + $0x2c0] sm:$0xff] }
 0x1ae   :  { %9891 = vmatprep.mubr.msk.f32.mxu1 %vm89_vm1, %v8130_v60  ;;  %10283 = vmatprep.mubr.msk.f32.mxu0 %vm89_vm1, %v8650_v28  ;;  %v8681_v4 = vld [vmem:[%s14075_s0 + $0x2d9] sm:$0xff]  ;;  %v8162_v60 = vld [vmem:[%s14075_s0 + $0x2d0] sm:$0xff] }
 0x1af   :  { %v8682_v28 = vld [vmem:[%s14075_s0 + $0x2e9] sm:$0xff] }
 0x1b1   :  { %9892 = vmatmul.mubr.msk.f32.gmra.mrb[22].mxu1 %vm89_vm1, %v8131_v56  ;;  %10284 = vmatmul.mubr.msk.f32.gmra.mrb[22].mxu0 %vm89_vm1, %v8651_v2  ;;  %v8163_v56 = vld [vmem:[%s14075_s0 + $0x2d8] sm:$0xff] }
 0x1b2   :  { %9894 = vmatprep.mubr.msk.f32.mxu1 %vm89_vm1, %v8132_v52  ;;  %10286 = vmatprep.mubr.msk.f32.mxu0 %vm89_vm1, %v8652_v62  ;;  %v8683_v2 = vld [vmem:[%s14075_s0 + $0x2f1] sm:$0xff]  ;;  %v8164_v52 = vld [vmem:[%s14075_s0 + $0x2e8] sm:$0xff] }
 0x1b3   :  { %v8684_v62 = vld [vmem:[%s14075_s0 + $0x301] sm:$0xff] }
 0x1b5   :  { %9895 = vmatmul.mubr.msk.f32.gmra.mrb[24].mxu1 %vm89_vm1, %v8133_v47  ;;  %10287 = vmatmul.mubr.msk.f32.gmra.mrb[24].mxu0 %vm89_vm1, %v8653_v58  ;;  %v8165_v47 = vld [vmem:[%s14075_s0 + $0x2f0] sm:$0xff] }
 0x1b6   :  { %9897 = vmatprep.mubr.msk.f32.mxu1 %vm89_vm1, %v8134_v43  ;;  %10289 = vmatprep.mubr.msk.f32.mxu0 %vm89_vm1, %v8654_v54  ;;  %v8685_v58 = vld [vmem:[%s14075_s0 + $0x309] sm:$0xff]  ;;  %v8166_v43 = vld [vmem:[%s14075_s0 + $0x300] sm:$0xff] }
 0x1b7   :  { %v8686_v54 = vld [vmem:[%s14075_s0 + $0x319] sm:$0xff] }
 0x1b9   :  { %9898 = vmatmul.mubr.msk.f32.gmra.mrb[26].mxu1 %vm89_vm1, %v8135_v50  ;;  %10290 = vmatmul.mubr.msk.f32.gmra.mrb[26].mxu0 %vm89_vm1, %v8655_v35  ;;  %v8167_v50 = vld [vmem:[%s14075_s0 + $0x308] sm:$0xff] }
 0x1ba   :  { %9900 = vmatprep.mubr.msk.f32.mxu1 %vm89_vm1, %v8136_v61  ;;  %10292 = vmatprep.mubr.msk.f32.mxu0 %vm89_vm1, %v8656_v10  ;;  %v8687_v35 = vld [vmem:[%s14075_s0 + $0x321] sm:$0xff]  ;;  %v8168_v61 = vld [vmem:[%s14075_s0 + $0x318] sm:$0xff] }
 0x1bb   :  { %v8688_v10 = vld [vmem:[%s14075_s0 + $0x331] sm:$0xff] }
 0x1bd   :  { %9901 = vmatmul.mubr.msk.f32.gmra.mrb[28].mxu1 %vm89_vm1, %v8137_v31  ;;  %10293 = vmatmul.mubr.msk.f32.gmra.mrb[28].mxu0 %vm89_vm1, %v8657_v63  ;;  %v8169_v31 = vld [vmem:[%s14075_s0 + $0x320] sm:$0xff] }
 0x1be   :  { %9903 = vmatprep.mubr.msk.f32.mxu1 %vm89_vm1, %v12744_v34  ;;  %10295 = vmatprep.mubr.msk.f32.mxu0 %vm89_vm1, %v8658_v29  ;;  %v8141_v34 = vld [vmem:[%s14075_s0 + $0x1d0] sm:$0xff]  ;;  %v8689_v63 = vld [vmem:[%s14075_s0 + $0x339] sm:$0xff] }
 0x1bf   :  { %v8690_v29 = vld [vmem:[%s14075_s0 + $0x349] sm:$0xff] }
 0x1c1   :  { %9904 = vmatmul.mubr.msk.f32.gmra.mrb[30].mxu1 %vm89_vm1, %v12757_v38  ;;  %10296 = vmatmul.mubr.msk.f32.gmra.mrb[30].mxu0 %vm89_vm1, %v8659_v14  ;;  %v8662_v38 = vld [vmem:[%s14075_s0 + $0x1f9] sm:$0xff]  ;;  %v8691_v14 = vld [vmem:[%s14075_s0 + $0x351] sm:$0xff] }
 0x1c2   :  { %9906 = vmatprep.mubr.msk.f32.mxu1 %vm89_vm1, %v8140_v12  ;;  %10298 = vmatprep.mubr.msk.f32.mxu0 %vm89_vm1, %v8660_v24  ;;  %v8758_v12 = vld [vmem:[%s14075_s0 + $0x32] sm:$0xff]  ;;  %v8760_v24 = vld [vmem:[%s14075_s0 + $0x4a] sm:$0xff] }
 0x1c5   :  { %9907 = vmatmul.mubr.msk.f32.gmra.mrb[32].mxu1 %vm89_vm1, %v8141_v34  ;;  %10299 = vmatmul.mubr.msk.f32.gmra.mrb[32].mxu0 %vm89_vm1, %v8661_v3  ;;  %v8762_v34 = vld [vmem:[%s14075_s0 + $0x62] sm:$0xff]  ;;  %v8763_v3 = vld [vmem:[%s14075_s0 + $0x6a] sm:$0xff] }
 0x1c6   :  { %9909 = vmatprep.mubr.msk.f32.mxu1 %vm89_vm1, %v8142_v33  ;;  %10301 = vmatprep.mubr.msk.f32.mxu0 %vm89_vm1, %v8662_v38  ;;  %v8764_v33 = vld [vmem:[%s14075_s0 + $0x7a] sm:$0xff]  ;;  %v8765_v38 = vld [vmem:[%s14075_s0 + $0x82] sm:$0xff] }
 0x1c9   :  { %9910 = vmatmul.mubr.msk.f32.gmra.mrb[34].mxu1 %vm89_vm1, %v8143_v16  ;;  %10302 = vmatmul.mubr.msk.f32.gmra.mrb[34].mxu0 %vm89_vm1, %v8663_v5  ;;  %v8766_v16 = vld [vmem:[%s14075_s0 + $0x92] sm:$0xff]  ;;  %v8767_v5 = vld [vmem:[%s14075_s0 + $0x9a] sm:$0xff] }
 0x1ca   :  { %9912 = vmatprep.mubr.msk.f32.mxu1 %vm89_vm1, %v8144_v7  ;;  %10304 = vmatprep.mubr.msk.f32.mxu0 %vm89_vm1, %v8664_v9  ;;  %v8768_v7 = vld [vmem:[%s14075_s0 + $0xaa] sm:$0xff]  ;;  %v8769_v9 = vld [vmem:[%s14075_s0 + $0xb2] sm:$0xff] }
 0x1cd   :  { %9913 = vmatmul.mubr.msk.f32.gmra.mrb[36].mxu1 %vm89_vm1, %v8145_v11  ;;  %10305 = vmatmul.mubr.msk.f32.gmra.mrb[36].mxu0 %vm89_vm1, %v8665_v13  ;;  %v8770_v11 = vld [vmem:[%s14075_s0 + $0xc2] sm:$0xff]  ;;  %v8771_v13 = vld [vmem:[%s14075_s0 + $0xca] sm:$0xff] }
 0x1ce   :  { %9915 = vmatprep.mubr.msk.f32.mxu1 %vm89_vm1, %v8146_v15  ;;  %10307 = vmatprep.mubr.msk.f32.mxu0 %vm89_vm1, %v8666_v17  ;;  %v8772_v15 = vld [vmem:[%s14075_s0 + $0xda] sm:$0xff]  ;;  %v8773_v17 = vld [vmem:[%s14075_s0 + $0xe2] sm:$0xff] }
 0x1d1   :  { %9916 = vmatmul.mubr.msk.f32.gmra.mrb[38].mxu1 %vm89_vm1, %v8147_v19  ;;  %10308 = vmatmul.mubr.msk.f32.gmra.mrb[38].mxu0 %vm89_vm1, %v8667_v21  ;;  %v8774_v19 = vld [vmem:[%s14075_s0 + $0xf2] sm:$0xff]  ;;  %v8775_v21 = vld [vmem:[%s14075_s0 + $0xfa] sm:$0xff] }
 0x1d2   :  { %9918 = vmatprep.mubr.msk.f32.mxu1 %vm89_vm1, %v8148_v23  ;;  %10310 = vmatprep.mubr.msk.f32.mxu0 %vm89_vm1, %v8668_v25  ;;  %v8776_v23 = vld [vmem:[%s14075_s0 + $0x10a] sm:$0xff]  ;;  %v8777_v25 = vld [vmem:[%s14075_s0 + $0x112] sm:$0xff] }
 0x1d5   :  { %9919 = vmatmul.mubr.msk.f32.gmra.mrb[40].mxu1 %vm89_vm1, %v8149_v27  ;;  %10311 = vmatmul.mubr.msk.f32.gmra.mrb[40].mxu0 %vm89_vm1, %v8669_v30  ;;  %v8778_v27 = vld [vmem:[%s14075_s0 + $0x122] sm:$0xff]  ;;  %v8779_v30 = vld [vmem:[%s14075_s0 + $0x12a] sm:$0xff] }
 0x1d6   :  { %9921 = vmatprep.mubr.msk.f32.mxu1 %vm89_vm1, %v8150_v32  ;;  %10313 = vmatprep.mubr.msk.f32.mxu0 %vm89_vm1, %v8670_v36  ;;  %v8780_v32 = vld [vmem:[%s14075_s0 + $0x13a] sm:$0xff]  ;;  %v8781_v36 = vld [vmem:[%s14075_s0 + $0x142] sm:$0xff] }
 0x1d9   :  { %9922 = vmatmul.mubr.msk.f32.gmra.mrb[42].mxu1 %vm89_vm1, %v8151_v40  ;;  %10314 = vmatmul.mubr.msk.f32.gmra.mrb[42].mxu0 %vm89_vm1, %v8671_v42  ;;  %v8782_v40 = vld [vmem:[%s14075_s0 + $0x152] sm:$0xff]  ;;  %v8783_v42 = vld [vmem:[%s14075_s0 + $0x15a] sm:$0xff] }
 0x1da   :  { %9924 = vmatprep.mubr.msk.f32.mxu1 %vm89_vm1, %v8152_v44  ;;  %10316 = vmatprep.mubr.msk.f32.mxu0 %vm89_vm1, %v8672_v46  ;;  %v8784_v44 = vld [vmem:[%s14075_s0 + $0x16a] sm:$0xff]  ;;  %v8785_v46 = vld [vmem:[%s14075_s0 + $0x172] sm:$0xff] }
 0x1dd   :  { %9925 = vmatmul.mubr.msk.f32.gmra.mrb[44].mxu1 %vm89_vm1, %v8153_v48  ;;  %10317 = vmatmul.mubr.msk.f32.gmra.mrb[44].mxu0 %vm89_vm1, %v8673_v41  ;;  %v8786_v48 = vld [vmem:[%s14075_s0 + $0x182] sm:$0xff]  ;;  %v8787_v41 = vld [vmem:[%s14075_s0 + $0x18a] sm:$0xff] }
 0x1de   :  { %9927 = vmatprep.mubr.msk.f32.mxu1 %vm89_vm1, %v8154_v51  ;;  %10319 = vmatprep.mubr.msk.f32.mxu0 %vm89_vm1, %v8674_v18  ;;  %v8788_v51 = vld [vmem:[%s14075_s0 + $0x19a] sm:$0xff]  ;;  %v8789_v18 = vld [vmem:[%s14075_s0 + $0x1a2] sm:$0xff] }
 0x1e1   :  { %9928 = vmatmul.mubr.msk.f32.gmra.mrb[46].mxu1 %vm89_vm1, %v8155_v26  ;;  %10320 = vmatmul.mubr.msk.f32.gmra.mrb[46].mxu0 %vm89_vm1, %v8675_v22  ;;  %v8790_v26 = vld [vmem:[%s14075_s0 + $0x1e2] sm:$0xff]  ;;  %v8791_v22 = vld [vmem:[%s14075_s0 + $0x1ea] sm:$0xff] }
 0x1e2   :  { %9930 = vmatprep.mubr.msk.f32.mxu1 %vm89_vm1, %v8156_v37  ;;  %10322 = vmatprep.mubr.msk.f32.mxu0 %vm89_vm1, %v8676_v59  ;;  %v8792_v37 = vld [vmem:[%s14075_s0 + $0x1fa] sm:$0xff]  ;;  %v8793_v59 = vld [vmem:[%s14075_s0 + $0x202] sm:$0xff] }
 0x1e5   :  { %9931 = vmatmul.mubr.msk.f32.gmra.mrb[48].mxu1 %vm89_vm1, %v8157_v1  ;;  %10323 = vmatmul.mubr.msk.f32.gmra.mrb[48].mxu0 %vm89_vm1, %v8677_v20  ;;  %v8794_v1 = vld [vmem:[%s14075_s0 + $0x212] sm:$0xff]  ;;  %v8795_v20 = vld [vmem:[%s14075_s0 + $0x21a] sm:$0xff] }
 0x1e6   :  { %9933 = vmatprep.mubr.msk.f32.mxu1 %vm89_vm1, %v8158_v53  ;;  %10325 = vmatprep.mubr.msk.f32.mxu0 %vm89_vm1, %v8678_v55  ;;  %v8796_v53 = vld [vmem:[%s14075_s0 + $0x22a] sm:$0xff]  ;;  %v8797_v55 = vld [vmem:[%s14075_s0 + $0x232] sm:$0xff] }
 0x1e9   :  { %9934 = vmatmul.mubr.msk.f32.gmra.mrb[50].mxu1 %vm89_vm1, %v8159_v8  ;;  %10326 = vmatmul.mubr.msk.f32.gmra.mrb[50].mxu0 %vm89_vm1, %v8679_v57  ;;  %v8798_v8 = vld [vmem:[%s14075_s0 + $0x242] sm:$0xff]  ;;  %v8799_v57 = vld [vmem:[%s14075_s0 + $0x24a] sm:$0xff] }
 0x1ea   :  { %9936 = vmatprep.mubr.msk.f32.mxu1 %vm89_vm1, %v8160_v49  ;;  %10328 = vmatprep.mubr.msk.f32.mxu0 %vm89_vm1, %v8680_v6  ;;  %v8800_v49 = vld [vmem:[%s14075_s0 + $0x25a] sm:$0xff]  ;;  %v8801_v6 = vld [vmem:[%s14075_s0 + $0x262] sm:$0xff] }
 0x1ed   :  { %9937 = vmatmul.mubr.msk.f32.gmra.mrb[52].mxu1 %vm89_vm1, %v8161_v0  ;;  %10329 = vmatmul.mubr.msk.f32.gmra.mrb[52].mxu0 %vm89_vm1, %v8681_v4  ;;  %v8802_v0 = vld [vmem:[%s14075_s0 + $0x272] sm:$0xff] }
 0x1ee   :  { %9939 = vmatprep.mubr.msk.f32.mxu1 %vm89_vm1, %v8162_v60  ;;  %10331 = vmatprep.mubr.msk.f32.mxu0 %vm89_vm1, %v8682_v28  ;;  %v8803_v28 = vld [vmem:[%s14075_s0 + $0x27a] sm:$0xff] }
 0x1f1   :  { %9940 = vmatmul.mubr.msk.f32.gmra.mrb[54].mxu1 %vm89_vm1, %v8163_v56  ;;  %10332 = vmatmul.mubr.msk.f32.gmra.mrb[54].mxu0 %vm89_vm1, %v8683_v2  ;;  %v8804_v56 = vld [vmem:[%s14075_s0 + $0x28a] sm:$0xff] }
 0x1f2   :  { %9942 = vmatprep.mubr.msk.f32.mxu1 %vm89_vm1, %v8164_v52  ;;  %10334 = vmatprep.mubr.msk.f32.mxu0 %vm89_vm1, %v8684_v62  ;;  %v8805_v62 = vld [vmem:[%s14075_s0 + $0x292] sm:$0xff] }
 0x1f5   :  { %9943 = vmatmul.mubr.msk.f32.gmra.mrb[56].mxu1 %vm89_vm1, %v8165_v47  ;;  %10335 = vmatmul.mubr.msk.f32.gmra.mrb[56].mxu0 %vm89_vm1, %v8685_v58  ;;  %v8806_v47 = vld [vmem:[%s14075_s0 + $0x2a2] sm:$0xff] }
 0x1f6   :  { %9945 = vmatprep.mubr.msk.f32.mxu1 %vm89_vm1, %v8166_v43  ;;  %10337 = vmatprep.mubr.msk.f32.mxu0 %vm89_vm1, %v8686_v54  ;;  %v8807_v54 = vld [vmem:[%s14075_s0 + $0x2aa] sm:$0xff] }
 0x1f9   :  { %9946 = vmatmul.mubr.msk.f32.gmra.mrb[58].mxu1 %vm89_vm1, %v8167_v50  ;;  %10338 = vmatmul.mubr.msk.f32.gmra.mrb[58].mxu0 %vm89_vm1, %v8687_v35  ;;  %v8808_v50 = vld [vmem:[%s14075_s0 + $0x2ba] sm:$0xff] }
 0x1fa   :  { %9948 = vmatprep.mubr.msk.f32.mxu1 %vm89_vm1, %v8168_v61  ;;  %10340 = vmatprep.mubr.msk.f32.mxu0 %vm89_vm1, %v8688_v10  ;;  %v8809_v10 = vld [vmem:[%s14075_s0 + $0x2c2] sm:$0xff] }
 0x1fd   :  { %9949 = vmatmul.mubr.msk.f32.gmra.mrb[60].mxu1 %vm89_vm1, %v8169_v31  ;;  %10341 = vmatmul.mubr.msk.f32.gmra.mrb[60].mxu0 %vm89_vm1, %v8689_v63  ;;  %v8810_v31 = vld [vmem:[%s14075_s0 + $0x2d2] sm:$0xff] }
 0x1fe   :  { %9951 = vmatprep.mubr.msk.f32.mxu1 %vm89_vm1, %v12897_v39  ;;  %10343 = vmatprep.mubr.msk.f32.mxu0 %vm89_vm1, %v8690_v29  ;;  %v8759_v39 = vld [vmem:[%s14075_s0 + $0x3a] sm:$0xff] }
 0x201   :  { %9952 = vmatmul.mubr.msk.f32.gmra.mrb[62].mxu1 %vm89_vm1, %v12910_v45  ;;  %10344 = vmatmul.mubr.msk.f32.gmra.mrb[62].mxu0 %vm89_vm1, %v8691_v14  ;;  %v8761_v45 = vld [vmem:[%s14075_s0 + $0x52] sm:$0xff]  ;;  %v8811_v14 = vld [vmem:[%s14075_s0 + $0x2da] sm:$0xff] }
 0x202   :  { %10348 = vmatprep.mubr.msk.f32.mxu0 %vm89_vm1, %v8758_v12  ;;  %v8812_v12 = vld [vmem:[%s14075_s0 + $0x2ea] sm:$0xff] }
 0x205   :  { %10349 = vmatmul.mubr.msk.f32.vlgmr.msra.gmra.mrb[0].mxu0 %vm89_vm1, %v8759_v39 }
 0x206   :  { %10351 = vmatprep.mubr.msk.f32.mxu0 %vm89_vm1, %v8760_v24 }
 0x209   :  { %10352 = vmatmul.mubr.msk.f32.gmra.mrb[2].mxu0 %vm89_vm1, %v8761_v45  ;;  %v8813_v45 = vld [vmem:[%s14075_s0 + $0x2f2] sm:$0xff] }
 0x20a   :  { %10354 = vmatprep.mubr.msk.f32.mxu0 %vm89_vm1, %v8762_v34  ;;  %v8814_v34 = vld [vmem:[%s14075_s0 + $0x302] sm:$0xff] }
 0x20d   :  { %10355 = vmatmul.mubr.msk.f32.gmra.mrb[4].mxu0 %vm89_vm1, %v8763_v3 }
 0x20e   :  { %10357 = vmatprep.mubr.msk.f32.mxu0 %vm89_vm1, %v8764_v33 }
 0x211   :  { %10358 = vmatmul.mubr.msk.f32.gmra.mrb[6].mxu0 %vm89_vm1, %v8765_v38  ;;  %v8815_v38 = vld [vmem:[%s14075_s0 + $0x30a] sm:$0xff] }
 0x212   :  { %10360 = vmatprep.mubr.msk.f32.mxu0 %vm89_vm1, %v8766_v16  ;;  %v8816_v16 = vld [vmem:[%s14075_s0 + $0x31a] sm:$0xff] }
 0x215   :  { %10361 = vmatmul.mubr.msk.f32.gmra.mrb[8].mxu0 %vm89_vm1, %v8767_v5 }
 0x216   :  { %10363 = vmatprep.mubr.msk.f32.mxu0 %vm89_vm1, %v8768_v7 }
 0x219   :  { %10364 = vmatmul.mubr.msk.f32.gmra.mrb[10].mxu0 %vm89_vm1, %v8769_v9  ;;  %v8817_v9 = vld [vmem:[%s14075_s0 + $0x322] sm:$0xff] }
 0x21a   :  { %10366 = vmatprep.mubr.msk.f32.mxu0 %vm89_vm1, %v8770_v11  ;;  %v8818_v11 = vld [vmem:[%s14075_s0 + $0x332] sm:$0xff] }
 0x21d   :  { %10367 = vmatmul.mubr.msk.f32.gmra.mrb[12].mxu0 %vm89_vm1, %v8771_v13 }
 0x21e   :  { %10369 = vmatprep.mubr.msk.f32.mxu0 %vm89_vm1, %v8772_v15 }
 0x221   :  { %10370 = vmatmul.mubr.msk.f32.gmra.mrb[14].mxu0 %vm89_vm1, %v8773_v17  ;;  %v8819_v17 = vld [vmem:[%s14075_s0 + $0x33a] sm:$0xff] }
 0x222   :  { %10372 = vmatprep.mubr.msk.f32.mxu0 %vm89_vm1, %v8774_v19  ;;  %v8820_v19 = vld [vmem:[%s14075_s0 + $0x34a] sm:$0xff] }
 0x225   :  { %10373 = vmatmul.mubr.msk.f32.gmra.mrb[16].mxu0 %vm89_vm1, %v8775_v21 }
 0x226   :  { %10375 = vmatprep.mubr.msk.f32.mxu0 %vm89_vm1, %v8776_v23 }
 0x229   :  { %10376 = vmatmul.mubr.msk.f32.gmra.mrb[18].mxu0 %vm89_vm1, %v8777_v25  ;;  %v8821_v25 = vld [vmem:[%s14075_s0 + $0x352] sm:$0xff] }
 0x22a   :  { %10378 = vmatprep.mubr.msk.f32.mxu0 %vm89_vm1, %v8778_v27 }
 0x22d   :  { %10379 = vmatmul.mubr.msk.f32.gmra.mrb[20].mxu0 %vm89_vm1, %v8779_v30 }
 0x22e   :  { %10381 = vmatprep.mubr.msk.f32.mxu0 %vm89_vm1, %v8780_v32 }
 0x231   :  { %10382 = vmatmul.mubr.msk.f32.gmra.mrb[22].mxu0 %vm89_vm1, %v8781_v36 }
 0x232   :  { %10384 = vmatprep.mubr.msk.f32.mxu0 %vm89_vm1, %v8782_v40 }
 0x235   :  { %10385 = vmatmul.mubr.msk.f32.gmra.mrb[24].mxu0 %vm89_vm1, %v8783_v42 }
 0x236   :  { %10387 = vmatprep.mubr.msk.f32.mxu0 %vm89_vm1, %v8784_v44 }
 0x239   :  { %10388 = vmatmul.mubr.msk.f32.gmra.mrb[26].mxu0 %vm89_vm1, %v8785_v46 }
 0x23a   :  { %10390 = vmatprep.mubr.msk.f32.mxu0 %vm89_vm1, %v8786_v48 }
 0x23d   :  { %10391 = vmatmul.mubr.msk.f32.gmra.mrb[28].mxu0 %vm89_vm1, %v8787_v41 }
 0x23e   :  { %10393 = vmatprep.mubr.msk.f32.mxu0 %vm89_vm1, %v8788_v51 }
 0x241   :  { %10394 = vmatmul.mubr.msk.f32.gmra.mrb[30].mxu0 %vm89_vm1, %v8789_v18 }
 0x242   :  { %10396 = vmatprep.mubr.msk.f32.mxu0 %vm89_vm1, %v8790_v26 }
 0x245   :  { %10397 = vmatmul.mubr.msk.f32.gmra.mrb[32].mxu0 %vm89_vm1, %v8791_v22 }
 0x246   :  { %10399 = vmatprep.mubr.msk.f32.mxu0 %vm89_vm1, %v8792_v37 }
 0x249   :  { %10400 = vmatmul.mubr.msk.f32.gmra.mrb[34].mxu0 %vm89_vm1, %v8793_v59 }
 0x24a   :  { %10402 = vmatprep.mubr.msk.f32.mxu0 %vm89_vm1, %v8794_v1 }
 0x24d   :  { %10403 = vmatmul.mubr.msk.f32.gmra.mrb[36].mxu0 %vm89_vm1, %v8795_v20 }
 0x24e   :  { %10405 = vmatprep.mubr.msk.f32.mxu0 %vm89_vm1, %v8796_v53 }
 0x251   :  { %10406 = vmatmul.mubr.msk.f32.gmra.mrb[38].mxu0 %vm89_vm1, %v8797_v55 }
 0x252   :  { %10408 = vmatprep.mubr.msk.f32.mxu0 %vm89_vm1, %v8798_v8 }
 0x255   :  { %10409 = vmatmul.mubr.msk.f32.gmra.mrb[40].mxu0 %vm89_vm1, %v8799_v57 }
 0x256   :  { %10411 = vmatprep.mubr.msk.f32.mxu0 %vm89_vm1, %v8800_v49 }
 0x258   :  { %v13612_v4 = vpop.f32.mrb[0].mxu1 }
 0x259   :  { %v13614_v60 = vpop.f32.mrb[1].mxu1  ;;  %10412 = vmatmul.mubr.msk.f32.gmra.mrb[42].mxu0 %vm89_vm1, %v8801_v6 }
 0x25a   :  { %10414 = vmatprep.mubr.msk.f32.mxu0 %vm89_vm1, %v8802_v0 }
 0x25c   :  { %v13624_v2 = vpop.f32.mrb[2].mxu1 }
 0x25d   :  { %v13626_v52 = vpop.f32.mrb[3].mxu1  ;;  %10415 = vmatmul.mubr.msk.f32.gmra.mrb[44].mxu0 %vm89_vm1, %v8803_v28 }
 0x25e   :  { %10417 = vmatprep.mubr.msk.f32.mxu0 %vm89_vm1, %v8804_v56 }
 0x260   :  { %v13636_v58 = vpop.f32.mrb[4].mxu1 }
 0x261   :  { %v13638_v43 = vpop.f32.mrb[5].mxu1  ;;  %10418 = vmatmul.mubr.msk.f32.gmra.mrb[46].mxu0 %vm89_vm1, %v8805_v62 }
 0x262   :  { %10420 = vmatprep.mubr.msk.f32.mxu0 %vm89_vm1, %v8806_v47  ;;  %v11109_v47 = vmov 1983009808  }
 0x264   :  { %v13648_v35 = vpop.f32.mrb[6].mxu1 }
 0x265   :  { %v13650_v61 = vpop.f32.mrb[7].mxu1  ;;  %10421 = vmatmul.mubr.msk.f32.gmra.mrb[48].mxu0 %vm89_vm1, %v8807_v54  ;;  %v7644_v54 = vunpack.c.l.s4 %v11109_v47 }
 0x266   :  { %10423 = vmatprep.mubr.msk.f32.mxu0 %vm89_vm1, %v8808_v50  ;;  %v7646_v50 = vlaneseq }
 0x268   :  { %v13660_v63 = vpop.f32.mrb[8].mxu1 }
 0x269   :  { %v13662_v29 = vpop.f32.mrb[9].mxu1  ;;  %10424 = vmatmul.mubr.msk.f32.gmra.mrb[50].mxu0 %vm89_vm1, %v8809_v10 }
 0x26a   :  { %10426 = vmatprep.mubr.msk.f32.mxu0 %vm89_vm1, %v8810_v31 }
 0x26c   :  { %v13672_v39 = vpop.f32.mrb[10].mxu1 }
 0x26d   :  { %v13674_v24 = vpop.f32.mrb[11].mxu1  ;;  %10427 = vmatmul.mubr.msk.f32.gmra.mrb[52].mxu0 %vm89_vm1, %v8811_v14  ;;  %v7645_v14 = vunpack.c.0.s8 %v7644_v54 }
 0x26e   :  { %10429 = vmatprep.mubr.msk.f32.mxu0 %vm89_vm1, %v8812_v12  ;;  %v7647_v12 = vshrl.u32 %v7646_v50, 7 }
 0x270   :  { %v13684_v3 = vpop.f32.mrb[12].mxu1 }
 0x271   :  { %v13686_v33 = vpop.f32.mrb[13].mxu1  ;;  %10430 = vmatmul.mubr.msk.f32.gmra.mrb[54].mxu0 %vm89_vm1, %v8813_v45  ;;  %v7648_v45 = vsub.s32 %v7645_v14, %v7647_v12 }
 0x272   :  { %10432 = vmatprep.mubr.msk.f32.mxu0 %vm89_vm1, %v8814_v34 }
 0x274   :  { %v13696_v5 = vpop.f32.mrb[14].mxu1 }
 0x275   :  { %v13698_v7 = vpop.f32.mrb[15].mxu1  ;;  %10433 = vmatmul.mubr.msk.f32.gmra.mrb[56].mxu0 %vm89_vm1, %v8815_v38  ;;  %v7640_v38 = vld [vmem:[%s14078_s3] sm:$0xff] }
 0x276   :  { %10435 = vmatprep.mubr.msk.f32.mxu0 %vm89_vm1, %v8816_v16 }
 0x278   :  { %v13708_v13 = vpop.f32.mrb[16].mxu1 }
 0x279   :  { %v13710_v15 = vpop.f32.mrb[17].mxu1  ;;  %10436 = vmatmul.mubr.msk.f32.gmra.mrb[58].mxu0 %vm89_vm1, %v8817_v9  ;;  %v13797_v9 = vrot.slane %v7640_v38, %v7648_v45 }
 0x27a   :  { %10438 = vmatprep.mubr.msk.f32.mxu0 %vm89_vm1, %v8818_v11 }
 0x27b   :  { %v7657_v11 = vcombine.high %v13797_v9, %v13797_v9 }
 0x27c   :  { %v13720_v21 = vpop.f32.mrb[18].mxu1 }
 0x27d   :  { %v13722_v23 = vpop.f32.mrb[19].mxu1  ;;  %10439 = vmatmul.mubr.msk.f32.gmra.mrb[60].mxu0 %vm89_vm1, %v8819_v17  ;;  %7727 = vmatprep.mubr.f32.mxu1 %v7657_v11 }
 0x27e   :  { %10441 = vmatprep.mubr.msk.f32.mxu0 %vm89_vm1, %v8820_v19 }
 0x280   :  { %v13729_v27 = vpop.f32.mrb[20].mxu1 }
 0x281   :  { %v13731_v30 = vpop.f32.mrb[21].mxu1  ;;  %10442 = vmatmul.mubr.msk.f32.gmra.mrb[62].mxu0 %vm89_vm1, %v8821_v25 }
 0x284   :  { %v13734_v32 = vpop.f32.mrb[22].mxu1 }
 0x285   :  { %v13736_v36 = vpop.f32.mrb[23].mxu1 }
 0x288   :  { %v13738_v40 = vpop.f32.mrb[24].mxu1 }
 0x289   :  { %v13740_v42 = vpop.f32.mrb[25].mxu1 }
 0x28c   :  { %v13742_v44 = vpop.f32.mrb[26].mxu1 }
 0x28d   :  { %v13744_v46 = vpop.f32.mrb[27].mxu1 }
 0x290   :  { %v13746_v48 = vpop.f32.mrb[28].mxu1 }
 0x291   :  { %v13748_v41 = vpop.f32.mrb[29].mxu1 }
 0x294   :  { %v13750_v51 = vpop.f32.mrb[30].mxu1 }
 0x295   :  { %v13752_v18 = vpop.f32.mrb[31].mxu1 }
 0x298   :  { %v13754_v26 = vpop.f32.mrb[32].mxu1 }
 0x299   :  { %v13756_v22 = vpop.f32.mrb[33].mxu1 }
 0x29c   :  { %v13758_v37 = vpop.f32.mrb[34].mxu1 }
 0x29d   :  { %v13760_v59 = vpop.f32.mrb[35].mxu1 }
 0x2a0   :  { %v13762_v1 = vpop.f32.mrb[36].mxu1 }
 0x2a1   :  { %v13764_v20 = vpop.f32.mrb[37].mxu1 }
 0x2a4   :  { %v13766_v53 = vpop.f32.mrb[38].mxu1 }
 0x2a5   :  { %v13768_v55 = vpop.f32.mrb[39].mxu1 }
 0x2a8   :  { %v13770_v8 = vpop.f32.mrb[40].mxu1 }
 0x2a9   :  { %v13772_v57 = vpop.f32.mrb[41].mxu1 }
 0x2ac   :  { %v13774_v49 = vpop.f32.mrb[42].mxu1 }
 0x2ad   :  { %v13776_v6 = vpop.f32.mrb[43].mxu1 }
 0x2b0   :  { %v13778_v0 = vpop.f32.mrb[44].mxu1 }
 0x2b1   :  { %v13780_v28 = vpop.f32.mrb[45].mxu1 }
 0x2b4   :  { %v13782_v56 = vpop.f32.mrb[46].mxu1 }
 0x2b5   :  { %14271 = vst [vmem:[#allocation57_spill] sm:$0xff] %v13782_v56  ;;  %v13784_v62 = vpop.f32.mrb[47].mxu1 }
 0x2b6   :  { %14272 = vst [vmem:[#allocation59_spill] sm:$0xff] %v13784_v62 }
 0x2b8   :  { %v13786_v10 = vpop.f32.mrb[48].mxu1 }
 0x2b9   :  { %14273 = vst [vmem:[#allocation61_spill] sm:$0xff] %v13786_v10  ;;  %v13788_v31 = vpop.f32.mrb[49].mxu1 }
 0x2ba   :  { %14274 = vst [vmem:[#allocation63_spill] sm:$0xff] %v13788_v31 }
 0x2bc   :  { %v13790_v34 = vpop.f32.mrb[50].mxu1 }
 0x2bd   :  { %14275 = vst [vmem:[#allocation6_spill] sm:$0xff] %v13790_v34  ;;  %v13795_v16 = vpop.f32.mrb[51].mxu1 }
 0x2be   :  { %14276 = vst [vmem:[#allocation7_spill] sm:$0xff] %v13795_v16 }
 0x2c0   :  { %v13801_v17 = vpop.f32.mrb[52].mxu1 }
 0x2c1   :  { %14277 = vst [vmem:[#allocation8_spill] sm:$0xff] %v13801_v17  ;;  %v13803_v19 = vpop.f32.mrb[53].mxu1 }
 0x2c2   :  { %14278 = vst [vmem:[#allocation9_spill] sm:$0xff] %v13803_v19 }
 0x2c4   :  { %v13805_v25 = vpop.f32.mrb[54].mxu1 }
 0x2c5   :  { %14279 = vst [vmem:[#allocation10_spill] sm:$0xff] %v13805_v25  ;;  %v13807_v47 = vpop.f32.mrb[55].mxu1 }
 0x2c6   :  { %14280 = vst [vmem:[#allocation11_spill] sm:$0xff] %v13807_v47  ;;  %v13828_v47 = vld [vmem:[%s14077_s2] ss:$0 sm:$0xff] }
 0x2c8   :  { %v13809_v54 = vpop.f32.mrb[56].mxu1 }
 0x2c9   :  { %14281 = vst [vmem:[#allocation12_spill] sm:$0xff] %v13809_v54  ;;  %v13811_v50 = vpop.f32.mrb[57].mxu1 }
 0x2ca   :  { %14282 = vst [vmem:[#allocation13_spill] sm:$0xff] %v13811_v50 }
 0x2cc   :  { %v13813_v14 = vpop.f32.mrb[58].mxu1 }
 0x2cd   :  { %14283 = vst [vmem:[#allocation14_spill] sm:$0xff] %v13813_v14  ;;  %v13815_v12 = vpop.f32.mrb[59].mxu1 }
 0x2ce   :  { %14284 = vst [vmem:[#allocation15_spill] sm:$0xff] %v13815_v12 }
 0x2d0   :  { %v13817_v16 = vpop.f32.mrb[60].mxu1 }
 0x2d1   :  { %14285 = vst [vmem:[#allocation16_spill] sm:$0xff] %v13817_v16  ;;  %v13819_v34 = vpop.f32.mrb[61].mxu1  ;;  %v7642_v16 = vcombine.high %v7640_v38, %v7640_v38 }
 0x2d2   :  { %14286 = vst [vmem:[#allocation17_spill] sm:$0xff] %v13819_v34 }
 0x2d3   :  { %v13835_v10 = vrot.slane %v7642_v16, %v7648_v45 }
 0x2d4   :  { %v13821_v17 = vpop.f32.mrb[62].mxu1 }
 0x2d5   :  { %14287 = vst [vmem:[#allocation18_spill] sm:$0xff] %v13821_v17  ;;  %v13823_v19 = vpop.f32.mrb[63].mxu1 }
 0x2d6   :  { %14288 = vst [vmem:[#allocation19_spill] sm:$0xff] %v13823_v19 }
 0x2d8   :  { %v10350_v11 = vpop.f32.mrb[0].mxu0 }
 0x2d9   :  { %v10567_v50 = vadd.f32 %v10350_v11, %v13612_v4  ;;  %v6930_v54 = vpop.f32.mrb[1].mxu0 }
 0x2da   :  { %v10568_v14 = vadd.f32 %v6930_v54, %v13614_v60 }
 0x2db   :  { %v7513_v12 = vadd.f32 %v10567_v50, %v13828_v47 }
 0x2dc   :  { %v7512_v34 = vadd.f32 %v10568_v14, %v13828_v47  ;;  %v10353_v25 = vpop.f32.mrb[2].mxu0 }
 0x2dd   :  { %v7577_v17 = vmax.f32 %v7513_v12, 0.0  ;;  %v10569_v19 = vadd.f32 %v10353_v25, %v13624_v2  ;;  %v6940_v31 = vpop.f32.mrb[3].mxu0 }
 0x2de   :  { %v7576_v62 = vmax.f32 %v7512_v34, 0.0  ;;  %v10570_v56 = vadd.f32 %v6940_v31, %v13626_v52 }
 0x2df   :  { %v7515_v4 = vadd.f32 %v10569_v19, %v13828_v47 }
 0x2e0   :  { %v13839_v11 = vpack.c.bf16 %v7577_v17, %v7576_v62  ;;  %v7514_v60 = vadd.f32 %v10570_v56, %v13828_v47  ;;  %v10356_v54 = vpop.f32.mrb[4].mxu0 }
 0x2e1   :  { %v7579_v38 = vmax.f32 %v7515_v4, 0.0  ;;  %v10571_v50 = vadd.f32 %v10356_v54, %v13636_v58  ;;  %v6950_v14 = vpop.f32.mrb[5].mxu0 }
 0x2e2   :  { %v7578_v12 = vmax.f32 %v7514_v60, 0.0  ;;  %v10572_v2 = vadd.f32 %v6950_v14, %v13638_v43 }
 0x2e3   :  { %v7517_v45 = vadd.f32 %v10571_v50, %v13828_v47 }
 0x2e4   :  { %v13845_v16 = vpack.c.bf16 %v7579_v38, %v7578_v12  ;;  %v7516_v52 = vadd.f32 %v10572_v2, %v13828_v47  ;;  %v10359_v31 = vpop.f32.mrb[6].mxu0 }
 0x2e5   :  { %v7581_v34 = vmax.f32 %v7517_v45, 0.0  ;;  %v10573_v62 = vadd.f32 %v10359_v31, %v13648_v35  ;;  %v6960_v17 = vpop.f32.mrb[7].mxu0 }
 0x2e6   :  { %v7580_v56 = vmax.f32 %v7516_v52, 0.0  ;;  %v10574_v19 = vadd.f32 %v6960_v17, %v13650_v61 }
 0x2e7   :  { %v7519_v58 = vadd.f32 %v10573_v62, %v13828_v47 }
 0x2e8   :  { %v13851_v25 = vpack.c.bf16 %v7581_v34, %v7580_v56  ;;  %v7518_v43 = vadd.f32 %v10574_v19, %v13828_v47  ;;  %v10362_v4 = vpop.f32.mrb[8].mxu0 }
 0x2e9   :  { %v7583_v60 = vmax.f32 %v7519_v58, 0.0  ;;  %v10575_v54 = vadd.f32 %v10362_v4, %v13660_v63  ;;  %v6970_v38 = vpop.f32.mrb[9].mxu0 }
 0x2ea   :  { %v7582_v50 = vmax.f32 %v7518_v43, 0.0  ;;  %v10576_v14 = vadd.f32 %v6970_v38, %v13662_v29 }
 0x2eb   :  { %v7521_v35 = vadd.f32 %v10575_v54, %v13828_v47 }
 0x2ec   :  { %v13857_v12 = vpack.c.bf16 %v7583_v60, %v7582_v50  ;;  %v7520_v61 = vadd.f32 %v10576_v14, %v13828_v47  ;;  %v10365_v2 = vpop.f32.mrb[10].mxu0 }
 0x2ed   :  { %v7585_v45 = vmax.f32 %v7521_v35, 0.0  ;;  %v10577_v52 = vadd.f32 %v10365_v2, %v13672_v39  ;;  %v6980_v31 = vpop.f32.mrb[11].mxu0 }
 0x2ee   :  { %v7584_v34 = vmax.f32 %v7520_v61, 0.0  ;;  %v10578_v62 = vadd.f32 %v6980_v31, %v13674_v24 }
 0x2ef   :  { %v7523_v63 = vadd.f32 %v10577_v52, %v13828_v47 }
 0x2f0   :  { %v13863_v17 = vpack.c.bf16 %v7585_v45, %v7584_v34  ;;  %v7522_v29 = vadd.f32 %v10578_v62, %v13828_v47  ;;  %v10368_v56 = vpop.f32.mrb[12].mxu0 }
 0x2f1   :  { %v7587_v19 = vmax.f32 %v7523_v63, 0.0  ;;  %v10579_v58 = vadd.f32 %v10368_v56, %v13684_v3  ;;  %v6990_v43 = vpop.f32.mrb[13].mxu0 }
 0x2f2   :  { %v7586_v4 = vmax.f32 %v7522_v29, 0.0  ;;  %v10580_v60 = vadd.f32 %v6990_v43, %v13686_v33 }
 0x2f3   :  { %v7525_v39 = vadd.f32 %v10579_v58, %v13828_v47 }
 0x2f4   :  { %v13869_v54 = vpack.c.bf16 %v7587_v19, %v7586_v4  ;;  %v7524_v24 = vadd.f32 %v10580_v60, %v13828_v47  ;;  %v10371_v38 = vpop.f32.mrb[14].mxu0 }
 0x2f5   :  { %v7589_v50 = vmax.f32 %v7525_v39, 0.0  ;;  %v10581_v14 = vadd.f32 %v10371_v38, %v13696_v5  ;;  %v7000_v35 = vpop.f32.mrb[15].mxu0 }
 0x2f6   :  { %v7588_v61 = vmax.f32 %v7524_v24, 0.0  ;;  %v10582_v2 = vadd.f32 %v7000_v35, %v13698_v7 }
 0x2f7   :  { %v7527_v3 = vadd.f32 %v10581_v14, %v13828_v47 }
 0x2f8   :  { %v13875_v45 = vpack.c.bf16 %v7589_v50, %v7588_v61  ;;  %v7526_v33 = vadd.f32 %v10582_v2, %v13828_v47  ;;  %v10374_v52 = vpop.f32.mrb[16].mxu0 }
 0x2f9   :  { %v7591_v31 = vmax.f32 %v7527_v3, 0.0  ;;  %v10583_v34 = vadd.f32 %v10374_v52, %v13708_v13  ;;  %v7010_v62 = vpop.f32.mrb[17].mxu0 }
 0x2fa   :  { %v7590_v63 = vmax.f32 %v7526_v33, 0.0  ;;  %v10584_v29 = vadd.f32 %v7010_v62, %v13710_v15 }
 0x2fb   :  { %v7529_v5 = vadd.f32 %v10583_v34, %v13828_v47 }
 0x2fc   :  { %v13881_v56 = vpack.c.bf16 %v7591_v31, %v7590_v63  ;;  %v7528_v7 = vadd.f32 %v10584_v29, %v13828_v47  ;;  %v10377_v19 = vpop.f32.mrb[18].mxu0 }
 0x2fd   :  { %v7593_v58 = vmax.f32 %v7529_v5, 0.0  ;;  %v10585_v43 = vadd.f32 %v10377_v19, %v13720_v21  ;;  %v7020_v4 = vpop.f32.mrb[19].mxu0 }
 0x2fe   :  { %v7592_v60 = vmax.f32 %v7528_v7, 0.0  ;;  %v10586_v39 = vadd.f32 %v7020_v4, %v13722_v23 }
 0x2ff   :  { %v7531_v13 = vadd.f32 %v10585_v43, %v13828_v47 }
 0x300   :  { %v7530_v24 = vadd.f32 %v10586_v39, %v13828_v47  ;;  %v10380_v38 = vpop.f32.mrb[20].mxu0  ;;  %v10479_v15 = vpack.c.bf16 %v7593_v58, %v7592_v60 }
 0x301   :  { %v7595_v50 = vmax.f32 %v7531_v13, 0.0  ;;  %v10587_v14 = vadd.f32 %v10380_v38, %v13729_v27  ;;  %v7030_v35 = vpop.f32.mrb[21].mxu0 }
 0x302   :  { %v7594_v61 = vmax.f32 %v7530_v24, 0.0  ;;  %v10588_v2 = vadd.f32 %v7030_v35, %v13731_v30  ;;  %10480 = vmatprep.subr.bf16.mxu1 %v10479_v15 }
 0x303   :  { %v7533_v21 = vadd.f32 %v10587_v14, %v13828_v47  ;;  %10482 = vmatpush3.bf16.msra.mxu1 %v13839_v11 }
 0x304   :  { %v7532_v23 = vadd.f32 %v10588_v2, %v13828_v47  ;;  %v10383_v3 = vpop.f32.mrb[22].mxu0  ;;  %v10483_v33 = vpack.c.bf16 %v7595_v50, %v7594_v61 }
 0x305   :  { %v7597_v52 = vmax.f32 %v7533_v21, 0.0  ;;  %v10589_v31 = vadd.f32 %v10383_v3, %v13734_v32  ;;  %v7040_v34 = vpop.f32.mrb[23].mxu0 }
 0x306   :  { %v7596_v62 = vmax.f32 %v7532_v23, 0.0  ;;  %v10590_v27 = vadd.f32 %v7040_v34, %v13736_v36  ;;  %10484 = vmatprep.subr.bf16.mxu1 %v10483_v33 }
 0x307   :  { %v7535_v63 = vadd.f32 %v10589_v31, %v13828_v47  ;;  %10486 = vmatpush3.bf16.msra.mxu1 %v13845_v16 }
 0x308   :  { %v7534_v30 = vadd.f32 %v10590_v27, %v13828_v47  ;;  %v10386_v29 = vpop.f32.mrb[24].mxu0  ;;  %v10487_v11 = vpack.c.bf16 %v7597_v52, %v7596_v62 }
 0x309   :  { %v7599_v5 = vmax.f32 %v7535_v63, 0.0  ;;  %v10591_v7 = vadd.f32 %v10386_v29, %v13738_v40  ;;  %v7050_v19 = vpop.f32.mrb[25].mxu0 }
 0x30a   :  { %v7598_v58 = vmax.f32 %v7534_v30, 0.0  ;;  %v10592_v32 = vadd.f32 %v7050_v19, %v13740_v42  ;;  %10488 = vmatprep.subr.bf16.mxu1 %v10487_v11 }
 0x30b   :  { %v7537_v43 = vadd.f32 %v10591_v7, %v13828_v47  ;;  %10490 = vmatpush3.bf16.msra.mxu1 %v13851_v25 }
 0x30c   :  { %v7536_v36 = vadd.f32 %v10592_v32, %v13828_v47  ;;  %v10389_v4 = vpop.f32.mrb[26].mxu0  ;;  %v10491_v16 = vpack.c.bf16 %v7599_v5, %v7598_v58 }
 0x30d   :  { %v7601_v60 = vmax.f32 %v7537_v43, 0.0  ;;  %v10593_v39 = vadd.f32 %v10389_v4, %v13742_v44  ;;  %v7060_v13 = vpop.f32.mrb[27].mxu0 }
 0x30e   :  { %v7600_v24 = vmax.f32 %v7536_v36, 0.0  ;;  %v10594_v40 = vadd.f32 %v7060_v13, %v13744_v46  ;;  %10492 = vmatprep.subr.bf16.mxu1 %v10491_v16 }
 0x30f   :  { %v7539_v38 = vadd.f32 %v10593_v39, %v13828_v47  ;;  %10494 = vmatpush3.bf16.msra.mxu1 %v13857_v12 }
 0x310   :  { %v7538_v42 = vadd.f32 %v10594_v40, %v13828_v47  ;;  %v10392_v15 = vpop.f32.mrb[28].mxu0  ;;  %v10495_v25 = vpack.c.bf16 %v7601_v60, %v7600_v24 }
 0x311   :  { %v7603_v50 = vmax.f32 %v7539_v38, 0.0  ;;  %v10595_v14 = vadd.f32 %v10392_v15, %v13746_v48  ;;  %v7070_v35 = vpop.f32.mrb[29].mxu0 }
 0x312   :  { %v7602_v61 = vmax.f32 %v7538_v42, 0.0  ;;  %v10596_v44 = vadd.f32 %v7070_v35, %v13748_v41  ;;  %10496 = vmatprep.subr.bf16.mxu1 %v10495_v25 }
 0x313   :  { %v7541_v2 = vadd.f32 %v10595_v14, %v13828_v47  ;;  %10498 = vmatpush3.bf16.msra.mxu1 %v13863_v17 }
 0x314   :  { %v7540_v46 = vadd.f32 %v10596_v44, %v13828_v47  ;;  %v10395_v21 = vpop.f32.mrb[30].mxu0  ;;  %v10499_v12 = vpack.c.bf16 %v7603_v50, %v7602_v61 }
 0x315   :  { %v7605_v23 = vmax.f32 %v7541_v2, 0.0  ;;  %v10597_v3 = vadd.f32 %v10395_v21, %v13750_v51  ;;  %v7080_v33 = vpop.f32.mrb[31].mxu0 }
 0x316   :  { %v7604_v52 = vmax.f32 %v7540_v46, 0.0  ;;  %v10598_v48 = vadd.f32 %v7080_v33, %v13752_v18  ;;  %10500 = vmatprep.subr.bf16.mxu1 %v10499_v12 }
 0x317   :  { %v7543_v31 = vadd.f32 %v10597_v3, %v13828_v47  ;;  %10502 = vmatpush3.bf16.msra.mxu1 %v13869_v54 }
 0x318   :  { %v7542_v41 = vadd.f32 %v10598_v48, %v13828_v47  ;;  %v10398_v34 = vpop.f32.mrb[32].mxu0  ;;  %v10503_v17 = vpack.c.bf16 %v7605_v23, %v7604_v52 }
 0x319   :  { %v7607_v62 = vmax.f32 %v7543_v31, 0.0  ;;  %v10599_v27 = vadd.f32 %v10398_v34, %v13754_v26  ;;  %v7090_v63 = vpop.f32.mrb[33].mxu0 }
 0x31a   :  { %v7606_v30 = vmax.f32 %v7542_v41, 0.0  ;;  %v10600_v51 = vadd.f32 %v7090_v63, %v13756_v22  ;;  %10504 = vmatprep.subr.bf16.mxu1 %v10503_v17  ;;  %v7658_v22 = vcombine.high %v13835_v10, %v13835_v10 }
 0x31b   :  { %v7545_v29 = vadd.f32 %v10599_v27, %v13828_v47  ;;  %10506 = vmatpush3.bf16.msra.mxu1 %v13875_v45 }
 0x31c   :  { %v7544_v18 = vadd.f32 %v10600_v51, %v13828_v47  ;;  %v10401_v11 = vpop.f32.mrb[34].mxu0  ;;  %v10507_v54 = vpack.c.bf16 %v7607_v62, %v7606_v30 }
 0x31d   :  { %v7609_v5 = vmax.f32 %v7545_v29, 0.0  ;;  %v10601_v7 = vadd.f32 %v10401_v11, %v13758_v37  ;;  %v7100_v19 = vpop.f32.mrb[35].mxu0  ;;  %v14289_v29 = vld [vmem:[#allocation57_spill] sm:$0xff] }
 0x31e   :  { %v7608_v58 = vmax.f32 %v7544_v18, 0.0  ;;  %v10602_v26 = vadd.f32 %v7100_v19, %v13760_v59  ;;  %10508 = vmatprep.subr.bf16.mxu1 %v10507_v54 }
 0x31f   :  { %v7547_v32 = vadd.f32 %v10601_v7, %v13828_v47  ;;  %10510 = vmatpush3.bf16.msra.mxu1 %v13881_v56 }
 0x320   :  { %v13929_v45 = vpack.c.bf16 %v7609_v5, %v7608_v58  ;;  %v7546_v43 = vadd.f32 %v10602_v26, %v13828_v47  ;;  %v10404_v36 = vpop.f32.mrb[36].mxu0  ;;  %v14290_v5 = vld [vmem:[#allocation59_spill] sm:$0xff] }
 0x321   :  { %v7611_v4 = vmax.f32 %v7547_v32, 0.0  ;;  %v10603_v37 = vadd.f32 %v10404_v36, %v13762_v1  ;;  %v7110_v16 = vpop.f32.mrb[37].mxu0  ;;  %v14291_v32 = vld [vmem:[#allocation61_spill] sm:$0xff] }
 0x322   :  { %v7610_v60 = vmax.f32 %v7546_v43, 0.0  ;;  %v10604_v59 = vadd.f32 %v7110_v16, %v13764_v20  ;;  %7728 = vmatmul.mubr.f32.vlgmr.msra.gmra.mrb[64].mxu1 %v13797_v9 }
 0x323   :  { %v7549_v39 = vadd.f32 %v10603_v37, %v13828_v47  ;;  %7797 = vmatprep.mubr.f32.mxu1 %v7658_v22 }
 0x324   :  { %v13936_v56 = vpack.c.bf16 %v7611_v4, %v7610_v60  ;;  %v7548_v13 = vadd.f32 %v10604_v59, %v13828_v47  ;;  %v10407_v24 = vpop.f32.mrb[38].mxu0  ;;  %v14292_v4 = vld [vmem:[#allocation63_spill] sm:$0xff] }
 0x325   :  { %v7613_v40 = vmax.f32 %v7549_v39, 0.0  ;;  %v10605_v38 = vadd.f32 %v10407_v24, %v13766_v53  ;;  %v7120_v42 = vpop.f32.mrb[39].mxu0  ;;  %v14293_v24 = vld [vmem:[#allocation6_spill] sm:$0xff] }
 0x326   :  { %v7612_v15 = vmax.f32 %v7548_v13, 0.0  ;;  %v10606_v1 = vadd.f32 %v7120_v42, %v13768_v55 }
 0x327   :  { %v7551_v25 = vadd.f32 %v10605_v38, %v13828_v47 }
 0x328   :  { %v13942_v20 = vpack.c.bf16 %v7613_v40, %v7612_v15  ;;  %v7550_v9 = vadd.f32 %v10606_v1, %v13828_v47  ;;  %v10410_v50 = vpop.f32.mrb[40].mxu0  ;;  %v14294_v15 = vld [vmem:[#allocation7_spill] sm:$0xff] }
 0x329   :  { %v7615_v14 = vmax.f32 %v7551_v25, 0.0  ;;  %v10607_v35 = vadd.f32 %v10410_v50, %v13770_v8  ;;  %v7130_v61 = vpop.f32.mrb[41].mxu0 }
 0x32a   :  { %v7614_v44 = vmax.f32 %v7550_v9, 0.0  ;;  %v10608_v2 = vadd.f32 %v7130_v61, %v13772_v57  ;;  %v14295_v61 = vld [vmem:[#allocation8_spill] sm:$0xff] }
 0x32b   :  { %v7553_v53 = vadd.f32 %v10607_v35, %v13828_v47 }
 0x32c   :  { %v13948_v46 = vpack.c.bf16 %v7615_v14, %v7614_v44  ;;  %v7552_v55 = vadd.f32 %v10608_v2, %v13828_v47  ;;  %v10413_v21 = vpop.f32.mrb[42].mxu0 }
 0x32d   :  { %v7617_v12 = vmax.f32 %v7553_v53, 0.0  ;;  %v10609_v23 = vadd.f32 %v10413_v21, %v13774_v49  ;;  %v7140_v3 = vpop.f32.mrb[43].mxu0 }
 0x32e   :  { %v7616_v33 = vmax.f32 %v7552_v55, 0.0  ;;  %v10610_v52 = vadd.f32 %v7140_v3, %v13776_v6  ;;  %v14296_v55 = vld [vmem:[#allocation9_spill] sm:$0xff] }
 0x32f   :  { %v7555_v8 = vadd.f32 %v10609_v23, %v13828_v47 }
 0x330   :  { %v13954_v48 = vpack.c.bf16 %v7617_v12, %v7616_v33  ;;  %v7554_v57 = vadd.f32 %v10610_v52, %v13828_v47  ;;  %v10416_v31 = vpop.f32.mrb[44].mxu0 }
 0x331   :  { %v7619_v41 = vmax.f32 %v7555_v8, 0.0  ;;  %v10611_v34 = vadd.f32 %v10416_v31, %v13778_v0  ;;  %v7150_v17 = vpop.f32.mrb[45].mxu0  ;;  %v14297_v8 = vld [vmem:[#allocation10_spill] sm:$0xff] }
 0x332   :  { %v7618_v62 = vmax.f32 %v7554_v57, 0.0  ;;  %v10612_v27 = vadd.f32 %v7150_v17, %v13780_v28 }
 0x333   :  { %v7557_v49 = vadd.f32 %v10611_v34, %v13828_v47  ;;  %v14298_v34 = vld [vmem:[#allocation11_spill] sm:$0xff] }
 0x334   :  { %v13960_v63 = vpack.c.bf16 %v7619_v41, %v7618_v62  ;;  %v7556_v6 = vadd.f32 %v10612_v27, %v13828_v47  ;;  %v10419_v30 = vpop.f32.mrb[46].mxu0 }
 0x335   :  { %v7621_v51 = vmax.f32 %v7557_v49, 0.0  ;;  %v10613_v18 = vadd.f32 %v10419_v30, %v14289_v29  ;;  %v7160_v11 = vpop.f32.mrb[47].mxu0  ;;  %v14299_v30 = vld [vmem:[#allocation12_spill] sm:$0xff] }
 0x336   :  { %v7620_v54 = vmax.f32 %v7556_v6, 0.0  ;;  %v10614_v7 = vadd.f32 %v7160_v11, %v14290_v5  ;;  %v14300_v11 = vld [vmem:[#allocation13_spill] sm:$0xff] }
 0x337   :  { %v7559_v0 = vadd.f32 %v10613_v18, %v13828_v47 }
 0x338   :  { %v13966_v19 = vpack.c.bf16 %v7621_v51, %v7620_v54  ;;  %v7558_v28 = vadd.f32 %v10614_v7, %v13828_v47  ;;  %v10422_v58 = vpop.f32.mrb[48].mxu0 }
 0x339   :  { %v7623_v26 = vmax.f32 %v7559_v0, 0.0  ;;  %v10615_v22 = vadd.f32 %v10422_v58, %v14291_v32  ;;  %v7170_v43 = vpop.f32.mrb[49].mxu0  ;;  %v14301_v58 = vld [vmem:[#allocation14_spill] sm:$0xff] }
 0x33a   :  { %v7622_v36 = vmax.f32 %v7558_v28, 0.0  ;;  %v10616_v37 = vadd.f32 %v7170_v43, %v14292_v4  ;;  %v14302_v43 = vld [vmem:[#allocation15_spill] sm:$0xff] }
 0x33b   :  { %v7561_v16 = vadd.f32 %v10615_v22, %v13828_v47 }
 0x33c   :  { %v13972_v60 = vpack.c.bf16 %v7623_v26, %v7622_v36  ;;  %v7560_v59 = vadd.f32 %v10616_v37, %v13828_v47  ;;  %v10425_v39 = vpop.f32.mrb[50].mxu0 }
 0x33d   :  { %v7625_v13 = vmax.f32 %v7561_v16, 0.0  ;;  %v10617_v40 = vadd.f32 %v10425_v39, %v14293_v24  ;;  %v7180_v38 = vpop.f32.mrb[51].mxu0  ;;  %v14303_v39 = vld [vmem:[#allocation16_spill] sm:$0xff] }
 0x33e   :  { %v7624_v42 = vmax.f32 %v7560_v59, 0.0  ;;  %v10618_v1 = vadd.f32 %v7180_v38, %v14294_v15  ;;  %v14304_v38 = vld [vmem:[#allocation17_spill] sm:$0xff] }
 0x33f   :  { %v7563_v25 = vadd.f32 %v10617_v40, %v13828_v47 }
 0x340   :  { %v7562_v9 = vadd.f32 %v10618_v1, %v13828_v47  ;;  %v10428_v50 = vpop.f32.mrb[52].mxu0  ;;  %v10511_v14 = vpack.c.bf16 %v7625_v13, %v7624_v42 }
 0x341   :  { %v7627_v35 = vmax.f32 %v7563_v25, 0.0  ;;  %v10619_v44 = vadd.f32 %v10428_v50, %v14295_v61  ;;  %v7190_v2 = vpop.f32.mrb[53].mxu0  ;;  %v14305_v50 = vld [vmem:[#allocation18_spill] sm:$0xff] }
 0x342   :  { %v7626_v53 = vmax.f32 %v7562_v9, 0.0  ;;  %v10620_v21 = vadd.f32 %v7190_v2, %v14296_v55  ;;  %10512 = vmatprep.subr.bf16.mxu1 %v10511_v14 }
 0x343   :  { %v7565_v12 = vadd.f32 %v10619_v44, %v13828_v47  ;;  %10514 = vmatpush3.bf16.msra.mxu1 %v13929_v45  ;;  %v14306_v44 = vld [vmem:[#allocation19_spill] sm:$0xff] }
 0x344   :  { %v7564_v23 = vadd.f32 %v10620_v21, %v13828_v47  ;;  %v10431_v3 = vpop.f32.mrb[54].mxu0  ;;  %v10515_v33 = vpack.c.bf16 %v7627_v35, %v7626_v53 }
 0x345   :  { %v7629_v52 = vmax.f32 %v7565_v12, 0.0  ;;  %v10621_v57 = vadd.f32 %v10431_v3, %v14297_v8  ;;  %v7200_v31 = vpop.f32.mrb[55].mxu0  ;;  %v7803_v3 = vld [vmem:[%s14079_s4] sm:$0xff] }
 0x346   :  { %v7628_v41 = vmax.f32 %v7564_v23, 0.0  ;;  %v10622_v17 = vadd.f32 %v7200_v31, %v14298_v34  ;;  %10516 = vmatprep.subr.bf16.mxu1 %v10515_v33  ;;  %v7804_v33 = vld [vmem:[%s14079_s4 + $0x8] sm:$0xff] }
 0x347   :  { %v7567_v62 = vadd.f32 %v10621_v57, %v13828_v47  ;;  %10518 = vmatpush3.bf16.msra.mxu1 %v13936_v56  ;;  %v7808_v57 = vld [vmem:[%s14079_s4 + $0x28] sm:$0xff] }
 0x348   :  { %v7566_v27 = vadd.f32 %v10622_v17, %v13828_v47  ;;  %v10434_v49 = vpop.f32.mrb[56].mxu0  ;;  %v10519_v45 = vpack.c.bf16 %v7629_v52, %v7628_v41  ;;  %v7805_v52 = vld [vmem:[%s14079_s4 + $0x10] sm:$0xff]  ;;  %v7811_v17 = vld [vmem:[%s14079_s4 + $0x40] sm:$0xff] }
 0x349   :  { %v7631_v6 = vmax.f32 %v7567_v62, 0.0  ;;  %v10623_v51 = vadd.f32 %v10434_v49, %v14299_v30  ;;  %v7210_v29 = vpop.f32.mrb[57].mxu0  ;;  %v7809_v41 = vld [vmem:[%s14079_s4 + $0x30] sm:$0xff]  ;;  %v7812_v62 = vld [vmem:[%s14079_s4 + $0x48] sm:$0xff]  ;;  %v7815_v30 = vld [vmem:[%s14079_s4 + $0x60] sm:$0xff] }
 0x34a   :  { %v7630_v18 = vmax.f32 %v7566_v27, 0.0  ;;  %v10624_v54 = vadd.f32 %v7210_v29, %v14300_v11  ;;  %10520 = vmatprep.subr.bf16.mxu1 %v10519_v45  ;;  %v10556_v27 = vpack.c.bf16 %v7812_v62, %v7811_v17  ;;  %v7813_v49 = vld [vmem:[%s14079_s4 + $0x50] sm:$0xff]  ;;  %v7814_v45 = vld [vmem:[%s14079_s4 + $0x58] sm:$0xff] }
 0x34b   :  { %v7569_v5 = vadd.f32 %v10623_v51, %v13828_v47  ;;  %10522 = vmatpush3.bf16.msra.mxu1 %v13942_v20  ;;  %v7816_v51 = vld [vmem:[%s14079_s4 + $0x68] sm:$0xff]  ;;  %v7818_v11 = vld [vmem:[%s14079_s4 + $0x78] sm:$0xff] }
 0x34c   :  { %v7568_v7 = vadd.f32 %v10624_v54, %v13828_v47  ;;  %v10437_v0 = vpop.f32.mrb[58].mxu0  ;;  %v10523_v56 = vpack.c.bf16 %v7631_v6, %v7630_v18  ;;  %v10559_v6 = vpack.c.bf16 %v7814_v45, %v7813_v49  ;;  %v10562_v29 = vpack.c.bf16 %v7816_v51, %v7815_v30  ;;  %v7817_v18 = vld [vmem:[%s14079_s4 + $0x70] sm:$0xff] }
 0x34d   :  { %v7633_v28 = vmax.f32 %v7569_v5, 0.0  ;;  %v10625_v26 = vadd.f32 %v10437_v0, %v14301_v58  ;;  %v7220_v32 = vpop.f32.mrb[59].mxu0  ;;  %v10565_v54 = vpack.c.bf16 %v7818_v11, %v7817_v18  ;;  %v11112_v5 = vmov 0.0  }
 0x34e   :  { %v7632_v22 = vmax.f32 %v7568_v7, 0.0  ;;  %v10626_v36 = vadd.f32 %v7220_v32, %v14302_v43  ;;  %10524 = vmatprep.subr.bf16.mxu1 %v10523_v56 }
 0x34f   :  { %v7571_v4 = vadd.f32 %v10625_v26, %v13828_v47  ;;  %10526 = vmatpush3.bf16.msra.mxu1 %v13948_v46 }
 0x350   :  { %v7570_v37 = vadd.f32 %v10626_v36, %v13828_v47  ;;  %v10440_v16 = vpop.f32.mrb[60].mxu0  ;;  %v10527_v20 = vpack.c.bf16 %v7633_v28, %v7632_v22  ;;  %v8889_v22 = vld [vmem:[%s14080_s5] ss:$0 sm:$0xff] }
 0x351   :  { %v7635_v59 = vmax.f32 %v7571_v4, 0.0  ;;  %v10627_v13 = vadd.f32 %v10440_v16, %v14303_v39  ;;  %v7230_v24 = vpop.f32.mrb[61].mxu0 }
 0x352   :  { %v7634_v40 = vmax.f32 %v7570_v37, 0.0  ;;  %v10628_v42 = vadd.f32 %v7230_v24, %v14304_v38  ;;  %10528 = vmatprep.subr.bf16.mxu1 %v10527_v20 }
 0x353   :  { %v7573_v15 = vadd.f32 %v10627_v13, %v13828_v47  ;;  %10530 = vmatpush3.bf16.msra.mxu1 %v13954_v48 }
 0x354   :  { %v7572_v1 = vadd.f32 %v10628_v42, %v13828_v47  ;;  %v10443_v25 = vpop.f32.mrb[62].mxu0  ;;  %v10531_v46 = vpack.c.bf16 %v7635_v59, %v7634_v40 }
 0x355   :  { %v7637_v9 = vmax.f32 %v7573_v15, 0.0  ;;  %v10629_v14 = vadd.f32 %v10443_v25, %v14305_v50  ;;  %v7240_v35 = vpop.f32.mrb[63].mxu0 }
 0x356   :  { %v7636_v61 = vmax.f32 %v7572_v1, 0.0  ;;  %v10630_v2 = vadd.f32 %v7240_v35, %v14306_v44  ;;  %10532 = vmatprep.subr.bf16.mxu1 %v10531_v46 }
 0x357   :  { %v7575_v53 = vadd.f32 %v10629_v14, %v13828_v47  ;;  %10534 = vmatpush3.bf16.msra.mxu1 %v13960_v63  ;;  %v10544_v63 = vpack.c.bf16 %v7804_v33, %v7803_v3 }
 0x358   :  { %v7574_v55 = vadd.f32 %v10630_v2, %v13828_v47  ;;  %v10535_v21 = vpack.c.bf16 %v7637_v9, %v7636_v61  ;;  %v11110_v47 = vmov 0.0|0.0  }
 0x359   :  { %v7639_v48 = vmax.f32 %v7575_v53, 0.0 }
 0x35a   :  { %v7638_v12 = vmax.f32 %v7574_v55, 0.0  ;;  %10536 = vmatprep.subr.bf16.mxu1 %v10535_v21 }
 0x35b   :  { %10538 = vmatpush3.bf16.msra.mxu1 %v13966_v19  ;;  %v7806_v19 = vld [vmem:[%s14079_s4 + $0x18] sm:$0xff] }
 0x35c   :  { %v10539_v23 = vpack.c.bf16 %v7639_v48, %v7638_v12  ;;  %v10547_v8 = vpack.c.bf16 %v7806_v19, %v7805_v52 }
 0x35e   :  { %10540 = vmatprep.subr.bf16.mxu1 %v10539_v23 }
 0x35f   :  { %10542 = vmatpush3.bf16.msra.mxu1 %v13972_v60  ;;  %v7807_v60 = vld [vmem:[%s14079_s4 + $0x20] sm:$0xff] }
 0x360   :  { %10543 = vmatprep.subr.bf16.mxu1 %v11110_v47  ;;  %v10550_v31 = vpack.c.bf16 %v7808_v57, %v7807_v60 }
 0x362   :  { %7798 = vmatmul.mubr.f32.vlgmr.msra.gmra.mrb[66].mxu1 %v13835_v10  ;;  %v7810_v10 = vld [vmem:[%s14079_s4 + $0x38] sm:$0xff]  ;;  %s11085_s4 = scalar_lea.vmem %s7904_s7, 32 }
 0x363   :  { %10545 = vmatpush3.bf16.msra.mxu1 %v10544_v63  ;;  %v10553_v34 = vpack.c.bf16 %v7810_v10, %v7809_v41  ;;  %10476 = vmatprep.mubr.msk.f32.mxu1 %vm11111_vm2, %v11112_v5  ;;  %p11086_p0 = scmp.ne.s32.totalorder %s7904_s7, %s11085_s4  ;;  %p11091_p2 = scmp.lt.s32.totalorder %s11085_s4, %s11085_s4 }
 0x364   :  { %10546 = vmatprep.subr.bf16.mxu1 %v11110_v47 }
 0x365   :  { %p11092_p3 = por %p11091_p2, %p11090_p1 }
 0x367   :  { %10548 = vmatpush3.bf16.msra.mxu1 %v10547_v8  ;;  %p11093_p4 = pnand %p11092_p3, %p11086_p0 }
 0x368   :  { %10549 = vmatprep.subr.bf16.mxu1 %v11110_v47 }
 0x36b   :  { %10551 = vmatpush3.bf16.msra.mxu1 %v10550_v31 }
 0x36c   :  { %10552 = vmatprep.subr.bf16.mxu1 %v11110_v47 }
 0x36f   :  { %10554 = vmatpush3.bf16.msra.mxu1 %v10553_v34 }
 0x370   :  { %10555 = vmatprep.subr.bf16.mxu1 %v11110_v47 }
 0x373   :  { %10557 = vmatpush3.bf16.msra.mxu1 %v10556_v27 }
 0x374   :  { %10558 = vmatprep.subr.bf16.mxu1 %v11110_v47 }
 0x377   :  { %10560 = vmatpush3.bf16.msra.mxu1 %v10559_v6 }
 0x378   :  { %10561 = vmatprep.subr.bf16.mxu1 %v11110_v47 }
 0x37b   :  { %10563 = vmatpush3.bf16.msra.mxu1 %v10562_v29 }
 0x37c   :  { %10564 = vmatprep.subr.bf16.mxu1 %v11110_v47 }
 0x37f   :  { %10566 = vmatpush3.bf16.msra.mxu1 %v10565_v54 }
 0x3f5   :  { %v9507_v7 = vpop.f32.mrb[64].mxu1 }
 0x3f6   :  { %v9508_v0 = vpop.f32.mrb[65].mxu1 }
 0x3f7   :  { %v9509_v56 = vadd.f32 %v9508_v0, %v9507_v7 }
 0x435   :  { %v9542_v28 = vpop.f32.mrb[66].mxu1 }
 0x436   :  { %v9543_v58 = vpop.f32.mrb[67].mxu1 }
 0x437   :  { %v9544_v26 = vadd.f32 %v9543_v58, %v9542_v28 }
 0x439   :  { %v7800_v32 = vadd.f32 %v9544_v26, %v9509_v56 }
 0x43b   :  { %10477 = vmatmul.mubr.f32.vlgmr.msra.gmra.mrb[68].mxu1 %v7800_v32 }
 0x50e   :  { %v7892_v43 = vpop.f32.mrb[68].mxu1 }
 0x50f   :  { %v7893_v36 = vadd.f32 %v8889_v22, %v7892_v43  ;;  %v10478_v4 = vpop.f32.mrb[69].mxu1 }
 0x511   :  { %7896 = vst [vmem:[#allocation3] sm:$0x3] %v7893_v36 }
 0x512   :  { %11096 = shalt.err (!%p11093_p4)
}
 0x513   :  { %s11097_s10 = scalar_lea.hbm %s14081_s6, 32 }
 0x514   :  { %p11098_p5 = scmp.ne.s32.totalorder %s14081_s6, %s11097_s10  ;;  %p11101_p6 = scmp.lt.u32.totalorder %s11097_s10, %s14081_s6 }
 0x516   :  { %p11103_p7 = pnand %p11101_p6, %p11098_p5 }
 0x518   :  { %11106 = shalt.err (!%p11103_p7)
}
 0x519   :  { %7906 = dma.vmem_to_hbm [thread:$0]  %s7904_s7, 32, %s14081_s6, [#allocation4]  }
 0x51a   :  { %11107 = dma.done.wait [#allocation4], 32  }
 0x51b   :  { %11108 = vsyncadd [#allocation4], 4294967264 }
 0x51c   :  { %7910 = vsyncpa [#allocation4], 1 }

// kernel: tpu_custom_call.1
= control target key start
LH: loop header
LB: loop body
LE: loop exit
PB: predicated region body
PF: predicated region fallthrough
CT: control target
= control target key end

     0   :  { %11 = vsyncpa [#allocation3], 0  ;;  %s1670_s0 = inlined_call_operand.hbm [shape: f32[2,256,128], index: 0, kind: input, shape index: {}]   ;;  %s1671_s1 = inlined_call_operand.hbm [shape: f32[128,128], index: 1, kind: input, shape index: {}]   ;;  %s1672_s2 = inlined_call_operand.vmem [shape: f32[1,128], index: 2, kind: input, shape index: {}]   ;;  %s1673_s3 = inlined_call_operand.vmem [shape: f32[2,512], index: 3, kind: input, shape index: {}]   ;;  %s1674_s4 = inlined_call_operand.hbm [shape: f32[128,128], index: 4, kind: input, shape index: {}]   ;;  %s1675_s5 = inlined_call_operand.vmem [shape: f32[1,128], index: 5, kind: input, shape index: {}]   ;;  %s1676_s6 = inlined_call_operand.hbm [shape: f32[1,2,128], index: 6, kind: output, shape index: {}]  }
   0x1   :  { %12 = vsyncpa [#allocation6], 0 }
   0x2   :  { %13 = vsyncpa [#allocation4], 0  ;;  %s1431_s21 = smov [#allocation5]   ;;  %s1432_s23 = smov [#allocation2]  }
   0x3   :  { %s31_s22 = sshll.u32 %s1431_s21, 4  ;;  %s19_s24 = sshll.u32 %s1432_s23, 4  ;;  %s32_s22 = int_to_ptr.vmem [resolvable:$true] %s31_s22  ;;  %s1476_s24 = int_to_ptr.vmem [resolvable:$true] %s19_s24 }
   0x4   :  { %s1337_s27 = scalar_lea.hbm %s1671_s1, 2048 }
   0x5   :  { %p1338_p0 = scmp.ne.s32.totalorder %s1671_s1, %s1337_s27  ;;  %p1341_p1 = scmp.lt.u32.totalorder %s1337_s27, %s1671_s1 }
   0x7   :  { %p1343_p2 = pnand %p1341_p1, %p1338_p0 }
   0x9   :  { %1346 = shalt.err (!%p1343_p2)
}
   0xa   :  { %s1347_s8 = scalar_lea.vmem %s32_s22, 2048  ;;  %p1352_p4 = scmp.lt.s32.totalorder %s32_s22, %s32_s22 }
   0xb   :  { %p1348_p3 = scmp.ne.s32.totalorder %s32_s22, %s1347_s8  ;;  %p1353_p5 = scmp.lt.s32.totalorder %s1347_s8, %s1347_s8 }
   0xd   :  { %p1354_p6 = por %p1353_p5, %p1352_p4 }
   0xf   :  { %p1355_p7 = pnand %p1354_p6, %p1348_p3 }
  0x11   :  { %1358 = shalt.err (!%p1355_p7)
}
  0x12   :  { %s1433_s9 = smov 128   ;;  %s1434_s10 = smov 8  }
  0x13   :  { %37 = dma.hbm_to_vmem [thread:$0]  %s1671_s1, 2048, %s32_s22, [#allocation6], %s1433_s9, %s1433_s9, %s1434_s10  }
  0x14   :  { %s1359_s15 = scalar_lea.hbm %s1670_s0, 8192 }
  0x15   :  { %p1360_p8 = scmp.ne.s32.totalorder %s1670_s0, %s1359_s15  ;;  %p1363_p9 = scmp.lt.u32.totalorder %s1359_s15, %s1670_s0 }
  0x17   :  { %p1365_p10 = pnand %p1363_p9, %p1360_p8 }
  0x19   :  { %1368 = shalt.err (!%p1365_p10)
}
  0x1a   :  { %s1369_s20 = scalar_lea.vmem %s1476_s24, 8192  ;;  %p1374_p12 = scmp.lt.s32.totalorder %s1476_s24, %s1476_s24 }
  0x1b   :  { %p1370_p11 = scmp.ne.s32.totalorder %s1476_s24, %s1369_s20  ;;  %p1375_p13 = scmp.lt.s32.totalorder %s1369_s20, %s1369_s20 }
  0x1d   :  { %p1376_p0 = por %p1375_p13, %p1374_p12 }
  0x1f   :  { %p1377_p1 = pnand %p1376_p0, %p1370_p11 }
  0x21   :  { %1380 = shalt.err (!%p1377_p1)
}
  0x22   :  { %25 = dma.hbm_to_vmem [thread:$0]  %s1670_s0, 8192, %s1476_s24, [#allocation3], %s1433_s9, %s1433_s9, %s1434_s10  }
  0x23   :  { %s1435_s22 = smov [#allocation7]   ;;  %s1381_s27 = scalar_lea.hbm %s1674_s4, 2048 }
  0x24   :  { %s47_s23 = sshll.u32 %s1435_s22, 4  ;;  %p1382_p2 = scmp.ne.s32.totalorder %s1674_s4, %s1381_s27  ;;  %s48_s23 = int_to_ptr.vmem [resolvable:$true] %s47_s23 }
  0x25   :  { %p1385_p3 = scmp.lt.u32.totalorder %s1381_s27, %s1674_s4 }
  0x27   :  { %p1387_p4 = pnand %p1385_p3, %p1382_p2 }
  0x29   :  { %1390 = shalt.err (!%p1387_p4)
}
  0x2a   :  { %s1391_s8 = scalar_lea.vmem %s48_s23, 2048  ;;  %p1396_p6 = scmp.lt.s32.totalorder %s48_s23, %s48_s23 }
  0x2b   :  { %p1392_p5 = scmp.ne.s32.totalorder %s48_s23, %s1391_s8  ;;  %p1397_p7 = scmp.lt.s32.totalorder %s1391_s8, %s1391_s8 }
  0x2d   :  { %p1398_p8 = por %p1397_p7, %p1396_p6 }
  0x2f   :  { %p1399_p9 = pnand %p1398_p8, %p1392_p5 }
  0x31   :  { %1402 = shalt.err (!%p1399_p9)
}
  0x32   :  { %53 = dma.hbm_to_vmem [thread:$0]  %s1674_s4, 2048, %s48_s23, [#allocation6], %s1433_s9, %s1433_s9, %s1434_s10  }
  0x33   :  { %1425 = dma.done.wait [#allocation3], 8192  }
  0x34   :  { %1426 = vsyncadd [#allocation3], 4294959104 }
  0x35   :  { %1427 = dma.done.wait [#allocation6], 4096  }
  0x36   :  { %1428 = vsyncadd [#allocation6], 4294963200  ;;  %v129_v0 = vld [vmem:[#allocation5] sm:$0xff]  ;;  %v130_v1 = vld [vmem:[#allocation5 + $0x8] sm:$0xff]  ;;  %vm1438_vm0 = vmmov 0   ;;  %s1440_s12 = smov [#allocation8]  }
  0x37   :  { %v131_v2 = vld [vmem:[#allocation5 + $0x10] sm:$0xff]  ;;  %v1206_v3 = vpack.c.bf16 %v130_v1, %v129_v0  ;;  %v132_v4 = vld [vmem:[#allocation5 + $0x18] sm:$0xff]  ;;  %v133_v6 = vld [vmem:[#allocation5 + $0x20] sm:$0xff]  ;;  %s864_s13 = sshll.u32 %s1440_s12, 4  ;;  %s865_s13 = int_to_ptr.vmem [resolvable:$true] %s864_s13 }
  0x38   :  { %v1210_v5 = vpack.c.bf16 %v132_v4, %v131_v2  ;;  %v134_v7 = vld [vmem:[#allocation5 + $0x28] sm:$0xff]  ;;  %v65_v9 = vld [vmem:[#allocation2] sm:$0xff]  ;;  %v135_v10 = vld [vmem:[#allocation5 + $0x30] sm:$0xff]  ;;  %s1403_s14 = scalar_lea.vmem %s865_s13, 32  ;;  %p1408_p11 = scmp.lt.s32.totalorder %s865_s13, %s865_s13 }
  0x39   :  { %1207 = vmatprep.subr.bf16.mxu0 %v1206_v3  ;;  %v1214_v8 = vpack.c.bf16 %v134_v7, %v133_v6  ;;  %v136_v11 = vld [vmem:[#allocation5 + $0x38] sm:$0xff]  ;;  %1075 = vmatprep.mubr.f32.mxu0 %v65_v9  ;;  %v137_v13 = vld [vmem:[#allocation5 + $0x40] sm:$0xff]  ;;  %v138_v14 = vld [vmem:[#allocation5 + $0x48] sm:$0xff]  ;;  %p1404_p10 = scmp.ne.s32.totalorder %s865_s13, %s1403_s14  ;;  %p1409_p12 = scmp.lt.s32.totalorder %s1403_s14, %s1403_s14 }
  0x3a   :  { %1209 = vmatpush3.bf16.msra.mxu0 %v1206_v3  ;;  %v1218_v12 = vpack.c.bf16 %v136_v11, %v135_v10  ;;  %v1222_v15 = vpack.c.bf16 %v138_v14, %v137_v13  ;;  %v139_v16 = vld [vmem:[#allocation5 + $0x50] sm:$0xff]  ;;  %v140_v17 = vld [vmem:[#allocation5 + $0x58] sm:$0xff]  ;;  %v141_v19 = vld [vmem:[#allocation5 + $0x60] sm:$0xff] }
  0x3b   :  { %1211 = vmatprep.subr.bf16.mxu0 %v1210_v5  ;;  %v1226_v18 = vpack.c.bf16 %v140_v17, %v139_v16  ;;  %v142_v20 = vld [vmem:[#allocation5 + $0x68] sm:$0xff]  ;;  %v143_v22 = vld [vmem:[#allocation5 + $0x70] sm:$0xff]  ;;  %v144_v23 = vld [vmem:[#allocation5 + $0x78] sm:$0xff]  ;;  %p1410_p13 = por %p1409_p12, %p1408_p11 }
  0x3c   :  { %v1230_v21 = vpack.c.bf16 %v142_v20, %v141_v19  ;;  %v1234_v24 = vpack.c.bf16 %v144_v23, %v143_v22  ;;  %v66_v25 = vld [vmem:[#allocation2 + $0x8] sm:$0xff]  ;;  %v67_v26 = vld [vmem:[#allocation2 + $0x10] sm:$0xff]  ;;  %v68_v27 = vld [vmem:[#allocation2 + $0x18] sm:$0xff] }
  0x3d   :  { %v69_v28 = vld [vmem:[#allocation2 + $0x20] sm:$0xff]  ;;  %v70_v29 = vld [vmem:[#allocation2 + $0x28] sm:$0xff]  ;;  %v71_v30 = vld [vmem:[#allocation2 + $0x30] sm:$0xff]  ;;  %p1411_p0 = pnand %p1410_p13, %p1404_p10 }
  0x3e   :  { %1213 = vmatpush3.bf16.msra.mxu0 %v1210_v5  ;;  %v72_v31 = vld [vmem:[#allocation2 + $0x38] sm:$0xff]  ;;  %v73_v32 = vld [vmem:[#allocation2 + $0x40] sm:$0xff]  ;;  %v74_v33 = vld [vmem:[#allocation2 + $0x48] sm:$0xff] }
  0x3f   :  { %1215 = vmatprep.subr.bf16.mxu0 %v1214_v8  ;;  %v75_v34 = vld [vmem:[#allocation2 + $0x50] sm:$0xff]  ;;  %v76_v35 = vld [vmem:[#allocation2 + $0x58] sm:$0xff]  ;;  %v77_v36 = vld [vmem:[#allocation2 + $0x60] sm:$0xff] }
  0x40   :  { %v78_v37 = vld [vmem:[#allocation2 + $0x68] sm:$0xff]  ;;  %v79_v38 = vld [vmem:[#allocation2 + $0x70] sm:$0xff]  ;;  %v80_v39 = vld [vmem:[#allocation2 + $0x78] sm:$0xff] }
  0x41   :  { %v81_v40 = vld [vmem:[#allocation2 + $0x80] sm:$0xff]  ;;  %v82_v41 = vld [vmem:[#allocation2 + $0x88] sm:$0xff]  ;;  %v83_v42 = vld [vmem:[#allocation2 + $0x90] sm:$0xff] }
  0x42   :  { %1217 = vmatpush3.bf16.msra.mxu0 %v1214_v8  ;;  %v84_v43 = vld [vmem:[#allocation2 + $0x98] sm:$0xff]  ;;  %v85_v44 = vld [vmem:[#allocation2 + $0xa0] sm:$0xff]  ;;  %v86_v45 = vld [vmem:[#allocation2 + $0xa8] sm:$0xff] }
  0x43   :  { %1219 = vmatprep.subr.bf16.mxu0 %v1218_v12  ;;  %v87_v46 = vld [vmem:[#allocation2 + $0xb0] sm:$0xff]  ;;  %v88_v47 = vld [vmem:[#allocation2 + $0xb8] sm:$0xff]  ;;  %v89_v48 = vld [vmem:[#allocation2 + $0xc0] sm:$0xff] }
  0x44   :  { %v90_v49 = vld [vmem:[#allocation2 + $0xc8] sm:$0xff]  ;;  %v91_v50 = vld [vmem:[#allocation2 + $0xd0] sm:$0xff]  ;;  %v92_v51 = vld [vmem:[#allocation2 + $0xd8] sm:$0xff] }
  0x45   :  { %v93_v52 = vld [vmem:[#allocation2 + $0xe0] sm:$0xff]  ;;  %v94_v53 = vld [vmem:[#allocation2 + $0xe8] sm:$0xff]  ;;  %v95_v54 = vld [vmem:[#allocation2 + $0xf0] sm:$0xff] }
  0x46   :  { %1221 = vmatpush3.bf16.msra.mxu0 %v1218_v12  ;;  %v96_v55 = vld [vmem:[#allocation2 + $0xf8] sm:$0xff]  ;;  %v97_v56 = vld [vmem:[#allocation2 + $0x100] sm:$0xff]  ;;  %v98_v57 = vld [vmem:[#allocation2 + $0x108] sm:$0xff] }
  0x47   :  { %1223 = vmatprep.subr.bf16.mxu0 %v1222_v15  ;;  %v99_v58 = vld [vmem:[#allocation2 + $0x110] sm:$0xff]  ;;  %v100_v59 = vld [vmem:[#allocation2 + $0x118] sm:$0xff]  ;;  %v101_v60 = vld [vmem:[#allocation2 + $0x120] sm:$0xff] }
  0x48   :  { %v102_v61 = vld [vmem:[#allocation2 + $0x128] sm:$0xff]  ;;  %v103_v62 = vld [vmem:[#allocation2 + $0x130] sm:$0xff]  ;;  %v104_v63 = vld [vmem:[#allocation2 + $0x138] sm:$0xff] }
  0x49   :  { %v105_v0 = vld [vmem:[#allocation2 + $0x140] sm:$0xff]  ;;  %v106_v1 = vld [vmem:[#allocation2 + $0x148] sm:$0xff]  ;;  %v107_v2 = vld [vmem:[#allocation2 + $0x150] sm:$0xff] }
  0x4a   :  { %1225 = vmatpush3.bf16.msra.mxu0 %v1222_v15  ;;  %v108_v3 = vld [vmem:[#allocation2 + $0x158] sm:$0xff]  ;;  %v109_v4 = vld [vmem:[#allocation2 + $0x160] sm:$0xff]  ;;  %v110_v5 = vld [vmem:[#allocation2 + $0x168] sm:$0xff] }
  0x4b   :  { %1227 = vmatprep.subr.bf16.mxu0 %v1226_v18  ;;  %v111_v6 = vld [vmem:[#allocation2 + $0x170] sm:$0xff]  ;;  %v112_v7 = vld [vmem:[#allocation2 + $0x178] sm:$0xff]  ;;  %v113_v8 = vld [vmem:[#allocation2 + $0x180] sm:$0xff] }
  0x4c   :  { %v114_v9 = vld [vmem:[#allocation2 + $0x188] sm:$0xff]  ;;  %v115_v10 = vld [vmem:[#allocation2 + $0x190] sm:$0xff]  ;;  %v116_v11 = vld [vmem:[#allocation2 + $0x198] sm:$0xff] }
  0x4d   :  { %v117_v12 = vld [vmem:[#allocation2 + $0x1a0] sm:$0xff]  ;;  %v118_v13 = vld [vmem:[#allocation2 + $0x1a8] sm:$0xff]  ;;  %v119_v14 = vld [vmem:[#allocation2 + $0x1b0] sm:$0xff] }
  0x4e   :  { %1229 = vmatpush3.bf16.msra.mxu0 %v1226_v18  ;;  %v120_v15 = vld [vmem:[#allocation2 + $0x1b8] sm:$0xff]  ;;  %v121_v16 = vld [vmem:[#allocation2 + $0x1c0] sm:$0xff]  ;;  %v122_v17 = vld [vmem:[#allocation2 + $0x1c8] sm:$0xff] }
  0x4f   :  { %1231 = vmatprep.subr.bf16.mxu0 %v1230_v21  ;;  %v123_v18 = vld [vmem:[#allocation2 + $0x1d0] sm:$0xff]  ;;  %v124_v19 = vld [vmem:[#allocation2 + $0x1d8] sm:$0xff]  ;;  %v125_v20 = vld [vmem:[#allocation2 + $0x1e0] sm:$0xff] }
  0x50   :  { %v127_v22 = vld [vmem:[#allocation2 + $0x1f0] sm:$0xff]  ;;  %v128_v23 = vld [vmem:[#allocation2 + $0x1f8] sm:$0xff] }
  0x52   :  { %1233 = vmatpush3.bf16.msra.mxu0 %v1230_v21  ;;  %v126_v21 = vld [vmem:[#allocation2 + $0x1e8] sm:$0xff] }
  0x53   :  { %1235 = vmatprep.subr.bf16.mxu0 %v1234_v24 }
  0x56   :  { %1237 = vmatpush3.bf16.msra.mxu0 %v1234_v24  ;;  %v1436_v24 = vmov 1983009808  }
  0x59   :  { %1076 = vmatmul.mubr.f32.vlgmr.msra.gmra.mrb[0].mxu0 %v66_v25  ;;  %v605_v25 = vunpack.c.l.s4 %v1436_v24 }
  0x5a   :  { %1078 = vmatprep.mubr.f32.mxu0 %v67_v26  ;;  %v607_v26 = vlaneseq }
  0x5d   :  { %1079 = vmatmul.mubr.f32.gmra.mrb[2].mxu0 %v68_v27  ;;  %v606_v27 = vunpack.c.0.s8 %v605_v25 }
  0x5e   :  { %1081 = vmatprep.mubr.f32.mxu0 %v69_v28  ;;  %v608_v28 = vshrl.u32 %v607_v26, 7 }
  0x61   :  { %1082 = vmatmul.mubr.f32.gmra.mrb[4].mxu0 %v70_v29  ;;  %v609_v29 = vsub.s32 %v606_v27, %v608_v28 }
  0x62   :  { %1084 = vmatprep.mubr.f32.mxu0 %v71_v30  ;;  %v601_v30 = vld [vmem:[%s1673_s3] sm:$0xff] }
  0x65   :  { %1085 = vmatmul.mubr.f32.gmra.mrb[6].mxu0 %v72_v31  ;;  %v1531_v31 = vrot.slane %v601_v30, %v609_v29 }
  0x66   :  { %1087 = vmatprep.mubr.f32.mxu0 %v73_v32 }
  0x67   :  { %v618_v32 = vcombine.high %v1531_v31, %v1531_v31 }
  0x69   :  { %1088 = vmatmul.mubr.f32.gmra.mrb[8].mxu0 %v74_v33  ;;  %688 = vmatprep.mubr.f32.mxu1 %v618_v32  ;;  %v1538_v33 = vld [vmem:[%s1672_s2] ss:$0 sm:$0xff] }
  0x6a   :  { %1090 = vmatprep.mubr.f32.mxu0 %v75_v34  ;;  %v603_v34 = vcombine.high %v601_v30, %v601_v30 }
  0x6d   :  { %1091 = vmatmul.mubr.f32.gmra.mrb[10].mxu0 %v76_v35 }
  0x6e   :  { %1093 = vmatprep.mubr.f32.mxu0 %v77_v36 }
  0x71   :  { %1094 = vmatmul.mubr.f32.gmra.mrb[12].mxu0 %v78_v37 }
  0x72   :  { %1096 = vmatprep.mubr.f32.mxu0 %v79_v38 }
  0x75   :  { %1097 = vmatmul.mubr.f32.gmra.mrb[14].mxu0 %v80_v39 }
  0x76   :  { %1099 = vmatprep.mubr.f32.mxu0 %v81_v40  ;;  %v1542_v40 = vrot.slane %v603_v34, %v609_v29 }
  0x79   :  { %1100 = vmatmul.mubr.f32.gmra.mrb[16].mxu0 %v82_v41 }
  0x7a   :  { %1102 = vmatprep.mubr.f32.mxu0 %v83_v42 }
  0x7d   :  { %1103 = vmatmul.mubr.f32.gmra.mrb[18].mxu0 %v84_v43 }
  0x7e   :  { %1105 = vmatprep.mubr.f32.mxu0 %v85_v44 }
  0x81   :  { %1106 = vmatmul.mubr.f32.gmra.mrb[20].mxu0 %v86_v45 }
  0x82   :  { %1108 = vmatprep.mubr.f32.mxu0 %v87_v46 }
  0x85   :  { %1109 = vmatmul.mubr.f32.gmra.mrb[22].mxu0 %v88_v47 }
  0x86   :  { %1111 = vmatprep.mubr.f32.mxu0 %v89_v48 }
  0x89   :  { %1112 = vmatmul.mubr.f32.gmra.mrb[24].mxu0 %v90_v49 }
  0x8a   :  { %1114 = vmatprep.mubr.f32.mxu0 %v91_v50 }
  0x8d   :  { %1115 = vmatmul.mubr.f32.gmra.mrb[26].mxu0 %v92_v51 }
  0x8e   :  { %1117 = vmatprep.mubr.f32.mxu0 %v93_v52 }
  0x91   :  { %1118 = vmatmul.mubr.f32.gmra.mrb[28].mxu0 %v94_v53 }
  0x92   :  { %1120 = vmatprep.mubr.f32.mxu0 %v95_v54 }
  0x95   :  { %1121 = vmatmul.mubr.f32.gmra.mrb[30].mxu0 %v96_v55 }
  0x96   :  { %1123 = vmatprep.mubr.f32.mxu0 %v97_v56 }
  0x99   :  { %1124 = vmatmul.mubr.f32.gmra.mrb[32].mxu0 %v98_v57 }
  0x9a   :  { %1126 = vmatprep.mubr.f32.mxu0 %v99_v58 }
  0x9d   :  { %1127 = vmatmul.mubr.f32.gmra.mrb[34].mxu0 %v100_v59 }
  0x9e   :  { %1129 = vmatprep.mubr.f32.mxu0 %v101_v60 }
  0xa1   :  { %1130 = vmatmul.mubr.f32.gmra.mrb[36].mxu0 %v102_v61 }
  0xa2   :  { %1132 = vmatprep.mubr.f32.mxu0 %v103_v62 }
  0xa5   :  { %1133 = vmatmul.mubr.f32.gmra.mrb[38].mxu0 %v104_v63 }
  0xa6   :  { %1135 = vmatprep.mubr.f32.mxu0 %v105_v0 }
  0xa9   :  { %1136 = vmatmul.mubr.f32.gmra.mrb[40].mxu0 %v106_v1 }
  0xaa   :  { %1138 = vmatprep.mubr.f32.mxu0 %v107_v2 }
  0xad   :  { %1139 = vmatmul.mubr.f32.gmra.mrb[42].mxu0 %v108_v3 }
  0xae   :  { %1141 = vmatprep.mubr.f32.mxu0 %v109_v4 }
  0xb1   :  { %1142 = vmatmul.mubr.f32.gmra.mrb[44].mxu0 %v110_v5 }
  0xb2   :  { %1144 = vmatprep.mubr.f32.mxu0 %v111_v6 }
  0xb5   :  { %1145 = vmatmul.mubr.f32.gmra.mrb[46].mxu0 %v112_v7 }
  0xb6   :  { %1147 = vmatprep.mubr.f32.mxu0 %v113_v8 }
  0xb9   :  { %1148 = vmatmul.mubr.f32.gmra.mrb[48].mxu0 %v114_v9 }
  0xba   :  { %1150 = vmatprep.mubr.f32.mxu0 %v115_v10 }
  0xbd   :  { %1151 = vmatmul.mubr.f32.gmra.mrb[50].mxu0 %v116_v11 }
  0xbe   :  { %1153 = vmatprep.mubr.f32.mxu0 %v117_v12 }
  0xc1   :  { %1154 = vmatmul.mubr.f32.gmra.mrb[52].mxu0 %v118_v13 }
  0xc2   :  { %1156 = vmatprep.mubr.f32.mxu0 %v119_v14 }
  0xc5   :  { %1157 = vmatmul.mubr.f32.gmra.mrb[54].mxu0 %v120_v15 }
  0xc6   :  { %1159 = vmatprep.mubr.f32.mxu0 %v121_v16 }
  0xc9   :  { %1160 = vmatmul.mubr.f32.gmra.mrb[56].mxu0 %v122_v17 }
  0xca   :  { %1162 = vmatprep.mubr.f32.mxu0 %v123_v18 }
  0xcd   :  { %1163 = vmatmul.mubr.f32.gmra.mrb[58].mxu0 %v124_v19 }
  0xce   :  { %1165 = vmatprep.mubr.f32.mxu0 %v125_v20 }
  0xd1   :  { %1166 = vmatmul.mubr.f32.gmra.mrb[60].mxu0 %v126_v21 }
  0xd2   :  { %1168 = vmatprep.mubr.f32.mxu0 %v127_v22 }
  0xd5   :  { %1169 = vmatmul.mubr.f32.gmra.mrb[62].mxu0 %v128_v23 }
 0x12c   :  { %v1077_v35 = vpop.f32.mrb[0].mxu0 }
 0x12d   :  { %v224_v36 = vadd.f32 %v1077_v35, %v1538_v33  ;;  %v218_v37 = vpop.f32.mrb[1].mxu0 }
 0x12e   :  { %v219_v38 = vadd.f32 %v1538_v33, %v218_v37 }
 0x12f   :  { %v538_v39 = vmax.f32 %v224_v36, 0.0 }
 0x130   :  { %v537_v41 = vmax.f32 %v219_v38, 0.0  ;;  %v1080_v42 = vpop.f32.mrb[2].mxu0 }
 0x131   :  { %v234_v43 = vadd.f32 %v1080_v42, %v1538_v33  ;;  %v228_v44 = vpop.f32.mrb[3].mxu0 }
 0x132   :  { %v229_v45 = vadd.f32 %v1538_v33, %v228_v44  ;;  %v1240_v46 = vpack.c.bf16 %v538_v39, %v537_v41 }
 0x133   :  { %v540_v47 = vmax.f32 %v234_v43, 0.0 }
 0x134   :  { %v539_v48 = vmax.f32 %v229_v45, 0.0  ;;  %v1083_v49 = vpop.f32.mrb[4].mxu0 }
 0x135   :  { %v244_v50 = vadd.f32 %v1083_v49, %v1538_v33  ;;  %v238_v51 = vpop.f32.mrb[5].mxu0 }
 0x136   :  { %v1547_v52 = vpack.c.bf16 %v540_v47, %v539_v48  ;;  %v239_v53 = vadd.f32 %v1538_v33, %v238_v51 }
 0x137   :  { %v542_v54 = vmax.f32 %v244_v50, 0.0 }
 0x138   :  { %v541_v55 = vmax.f32 %v239_v53, 0.0  ;;  %v1086_v56 = vpop.f32.mrb[6].mxu0 }
 0x139   :  { %v254_v57 = vadd.f32 %v1086_v56, %v1538_v33  ;;  %v248_v58 = vpop.f32.mrb[7].mxu0 }
 0x13a   :  { %v1551_v59 = vpack.c.bf16 %v542_v54, %v541_v55  ;;  %v249_v60 = vadd.f32 %v1538_v33, %v248_v58 }
 0x13b   :  { %v544_v61 = vmax.f32 %v254_v57, 0.0 }
 0x13c   :  { %v543_v62 = vmax.f32 %v249_v60, 0.0  ;;  %v1089_v63 = vpop.f32.mrb[8].mxu0 }
 0x13d   :  { %v264_v0 = vadd.f32 %v1089_v63, %v1538_v33  ;;  %v258_v1 = vpop.f32.mrb[9].mxu0 }
 0x13e   :  { %v1555_v2 = vpack.c.bf16 %v544_v61, %v543_v62  ;;  %v259_v3 = vadd.f32 %v1538_v33, %v258_v1 }
 0x13f   :  { %v546_v4 = vmax.f32 %v264_v0, 0.0 }
 0x140   :  { %v545_v5 = vmax.f32 %v259_v3, 0.0  ;;  %v1092_v6 = vpop.f32.mrb[10].mxu0 }
 0x141   :  { %v274_v7 = vadd.f32 %v1092_v6, %v1538_v33  ;;  %v268_v8 = vpop.f32.mrb[11].mxu0 }
 0x142   :  { %v1559_v9 = vpack.c.bf16 %v546_v4, %v545_v5  ;;  %v269_v10 = vadd.f32 %v1538_v33, %v268_v8 }
 0x143   :  { %v548_v11 = vmax.f32 %v274_v7, 0.0 }
 0x144   :  { %v547_v12 = vmax.f32 %v269_v10, 0.0  ;;  %v1095_v13 = vpop.f32.mrb[12].mxu0 }
 0x145   :  { %v284_v14 = vadd.f32 %v1095_v13, %v1538_v33  ;;  %v278_v15 = vpop.f32.mrb[13].mxu0 }
 0x146   :  { %v1563_v16 = vpack.c.bf16 %v548_v11, %v547_v12  ;;  %v279_v17 = vadd.f32 %v1538_v33, %v278_v15 }
 0x147   :  { %v550_v18 = vmax.f32 %v284_v14, 0.0 }
 0x148   :  { %v549_v19 = vmax.f32 %v279_v17, 0.0  ;;  %v1098_v20 = vpop.f32.mrb[14].mxu0 }
 0x149   :  { %v294_v21 = vadd.f32 %v1098_v20, %v1538_v33  ;;  %v288_v22 = vpop.f32.mrb[15].mxu0 }
 0x14a   :  { %v1567_v23 = vpack.c.bf16 %v550_v18, %v549_v19  ;;  %v289_v24 = vadd.f32 %v1538_v33, %v288_v22 }
 0x14b   :  { %v552_v25 = vmax.f32 %v294_v21, 0.0 }
 0x14c   :  { %v551_v26 = vmax.f32 %v289_v24, 0.0  ;;  %v1101_v27 = vpop.f32.mrb[16].mxu0 }
 0x14d   :  { %v304_v28 = vadd.f32 %v1101_v27, %v1538_v33  ;;  %v298_v29 = vpop.f32.mrb[17].mxu0 }
 0x14e   :  { %v1571_v30 = vpack.c.bf16 %v552_v25, %v551_v26  ;;  %v299_v32 = vadd.f32 %v1538_v33, %v298_v29 }
 0x14f   :  { %v554_v34 = vmax.f32 %v304_v28, 0.0 }
 0x150   :  { %v553_v35 = vmax.f32 %v299_v32, 0.0  ;;  %v1104_v36 = vpop.f32.mrb[18].mxu0 }
 0x151   :  { %v314_v37 = vadd.f32 %v1104_v36, %v1538_v33  ;;  %v308_v38 = vpop.f32.mrb[19].mxu0  ;;  %v619_v36 = vcombine.high %v1542_v40, %v1542_v40 }
 0x152   :  { %v309_v39 = vadd.f32 %v1538_v33, %v308_v38  ;;  %v1238_v41 = vpack.c.bf16 %v554_v34, %v553_v35 }
 0x153   :  { %v556_v42 = vmax.f32 %v314_v37, 0.0 }
 0x154   :  { %v555_v43 = vmax.f32 %v309_v39, 0.0  ;;  %v1107_v44 = vpop.f32.mrb[20].mxu0  ;;  %1239 = vmatprep.subr.bf16.mxu1 %v1238_v41 }
 0x155   :  { %v324_v45 = vadd.f32 %v1107_v44, %v1538_v33  ;;  %v318_v47 = vpop.f32.mrb[21].mxu0  ;;  %1241 = vmatpush3.bf16.msra.mxu1 %v1240_v46 }
 0x156   :  { %v1242_v48 = vpack.c.bf16 %v556_v42, %v555_v43  ;;  %v319_v49 = vadd.f32 %v1538_v33, %v318_v47 }
 0x157   :  { %v558_v50 = vmax.f32 %v324_v45, 0.0 }
 0x158   :  { %v557_v51 = vmax.f32 %v319_v49, 0.0  ;;  %v1110_v53 = vpop.f32.mrb[22].mxu0  ;;  %1243 = vmatprep.subr.bf16.mxu1 %v1242_v48 }
 0x159   :  { %v334_v54 = vadd.f32 %v1110_v53, %v1538_v33  ;;  %v328_v55 = vpop.f32.mrb[23].mxu0  ;;  %1245 = vmatpush3.bf16.msra.mxu1 %v1547_v52 }
 0x15a   :  { %v1246_v56 = vpack.c.bf16 %v558_v50, %v557_v51  ;;  %v329_v57 = vadd.f32 %v1538_v33, %v328_v55 }
 0x15b   :  { %v560_v58 = vmax.f32 %v334_v54, 0.0 }
 0x15c   :  { %v559_v60 = vmax.f32 %v329_v57, 0.0  ;;  %v1113_v61 = vpop.f32.mrb[24].mxu0  ;;  %1247 = vmatprep.subr.bf16.mxu1 %v1246_v56 }
 0x15d   :  { %v344_v46 = vadd.f32 %v1113_v61, %v1538_v33  ;;  %v338_v62 = vpop.f32.mrb[25].mxu0  ;;  %1249 = vmatpush3.bf16.msra.mxu1 %v1551_v59 }
 0x15e   :  { %v1250_v63 = vpack.c.bf16 %v560_v58, %v559_v60  ;;  %v339_v0 = vadd.f32 %v1538_v33, %v338_v62 }
 0x15f   :  { %v562_v1 = vmax.f32 %v344_v46, 0.0 }
 0x160   :  { %v561_v3 = vmax.f32 %v339_v0, 0.0  ;;  %v1116_v4 = vpop.f32.mrb[26].mxu0  ;;  %1251 = vmatprep.subr.bf16.mxu1 %v1250_v63 }
 0x161   :  { %v354_v52 = vadd.f32 %v1116_v4, %v1538_v33  ;;  %v348_v5 = vpop.f32.mrb[27].mxu0  ;;  %1253 = vmatpush3.bf16.msra.mxu1 %v1555_v2 }
 0x162   :  { %v1254_v6 = vpack.c.bf16 %v562_v1, %v561_v3  ;;  %v349_v7 = vadd.f32 %v1538_v33, %v348_v5 }
 0x163   :  { %v564_v8 = vmax.f32 %v354_v52, 0.0 }
 0x164   :  { %v563_v10 = vmax.f32 %v349_v7, 0.0  ;;  %v1119_v11 = vpop.f32.mrb[28].mxu0  ;;  %1255 = vmatprep.subr.bf16.mxu1 %v1254_v6 }
 0x165   :  { %v364_v59 = vadd.f32 %v1119_v11, %v1538_v33  ;;  %v358_v12 = vpop.f32.mrb[29].mxu0  ;;  %1257 = vmatpush3.bf16.msra.mxu1 %v1559_v9 }
 0x166   :  { %v1258_v13 = vpack.c.bf16 %v564_v8, %v563_v10  ;;  %v359_v14 = vadd.f32 %v1538_v33, %v358_v12 }
 0x167   :  { %v566_v15 = vmax.f32 %v364_v59, 0.0 }
 0x168   :  { %v565_v17 = vmax.f32 %v359_v14, 0.0  ;;  %v1122_v18 = vpop.f32.mrb[30].mxu0  ;;  %1259 = vmatprep.subr.bf16.mxu1 %v1258_v13 }
 0x169   :  { %v374_v2 = vadd.f32 %v1122_v18, %v1538_v33  ;;  %v368_v19 = vpop.f32.mrb[31].mxu0  ;;  %1261 = vmatpush3.bf16.msra.mxu1 %v1563_v16 }
 0x16a   :  { %v1262_v20 = vpack.c.bf16 %v566_v15, %v565_v17  ;;  %v369_v21 = vadd.f32 %v1538_v33, %v368_v19 }
 0x16b   :  { %v568_v22 = vmax.f32 %v374_v2, 0.0 }
 0x16c   :  { %v567_v24 = vmax.f32 %v369_v21, 0.0  ;;  %v1125_v25 = vpop.f32.mrb[32].mxu0  ;;  %1263 = vmatprep.subr.bf16.mxu1 %v1262_v20 }
 0x16d   :  { %v384_v9 = vadd.f32 %v1125_v25, %v1538_v33  ;;  %v378_v26 = vpop.f32.mrb[33].mxu0  ;;  %1265 = vmatpush3.bf16.msra.mxu1 %v1567_v23 }
 0x16e   :  { %v1266_v27 = vpack.c.bf16 %v568_v22, %v567_v24  ;;  %v379_v28 = vadd.f32 %v1538_v33, %v378_v26 }
 0x16f   :  { %v570_v29 = vmax.f32 %v384_v9, 0.0 }
 0x170   :  { %v569_v32 = vmax.f32 %v379_v28, 0.0  ;;  %v1128_v34 = vpop.f32.mrb[34].mxu0  ;;  %1267 = vmatprep.subr.bf16.mxu1 %v1266_v27 }
 0x171   :  { %v394_v16 = vadd.f32 %v1128_v34, %v1538_v33  ;;  %v388_v35 = vpop.f32.mrb[35].mxu0  ;;  %1269 = vmatpush3.bf16.msra.mxu1 %v1571_v30 }
 0x172   :  { %v1600_v37 = vpack.c.bf16 %v570_v29, %v569_v32  ;;  %v389_v38 = vadd.f32 %v1538_v33, %v388_v35 }
 0x173   :  { %v572_v23 = vmax.f32 %v394_v16, 0.0 }
 0x174   :  { %v571_v39 = vmax.f32 %v389_v38, 0.0  ;;  %v1131_v41 = vpop.f32.mrb[36].mxu0  ;;  %689 = vmatmul.mubr.f32.vlgmr.msra.gmra.mrb[0].mxu1 %v1531_v31 }
 0x175   :  { %v404_v42 = vadd.f32 %v1131_v41, %v1538_v33  ;;  %v398_v43 = vpop.f32.mrb[37].mxu0  ;;  %758 = vmatprep.mubr.f32.mxu1 %v619_v36 }
 0x176   :  { %v1605_v44 = vpack.c.bf16 %v572_v23, %v571_v39  ;;  %v399_v30 = vadd.f32 %v1538_v33, %v398_v43 }
 0x177   :  { %v574_v45 = vmax.f32 %v404_v42, 0.0 }
 0x178   :  { %v573_v47 = vmax.f32 %v399_v30, 0.0  ;;  %v1134_v48 = vpop.f32.mrb[38].mxu0 }
 0x179   :  { %v414_v49 = vadd.f32 %v1134_v48, %v1538_v33  ;;  %v408_v50 = vpop.f32.mrb[39].mxu0 }
 0x17a   :  { %v1609_v51 = vpack.c.bf16 %v574_v45, %v573_v47  ;;  %v409_v53 = vadd.f32 %v1538_v33, %v408_v50 }
 0x17b   :  { %v576_v54 = vmax.f32 %v414_v49, 0.0 }
 0x17c   :  { %v575_v31 = vmax.f32 %v409_v53, 0.0  ;;  %v1137_v55 = vpop.f32.mrb[40].mxu0 }
 0x17d   :  { %v424_v56 = vadd.f32 %v1137_v55, %v1538_v33  ;;  %v418_v57 = vpop.f32.mrb[41].mxu0 }
 0x17e   :  { %v1613_v58 = vpack.c.bf16 %v576_v54, %v575_v31  ;;  %v419_v60 = vadd.f32 %v1538_v33, %v418_v57 }
 0x17f   :  { %v578_v61 = vmax.f32 %v424_v56, 0.0 }
 0x180   :  { %v577_v46 = vmax.f32 %v419_v60, 0.0  ;;  %v1140_v62 = vpop.f32.mrb[42].mxu0 }
 0x181   :  { %v434_v63 = vadd.f32 %v1140_v62, %v1538_v33  ;;  %v428_v0 = vpop.f32.mrb[43].mxu0 }
 0x182   :  { %v1617_v1 = vpack.c.bf16 %v578_v61, %v577_v46  ;;  %v429_v3 = vadd.f32 %v1538_v33, %v428_v0 }
 0x183   :  { %v580_v4 = vmax.f32 %v434_v63, 0.0 }
 0x184   :  { %v579_v52 = vmax.f32 %v429_v3, 0.0  ;;  %v1143_v5 = vpop.f32.mrb[44].mxu0 }
 0x185   :  { %v444_v6 = vadd.f32 %v1143_v5, %v1538_v33  ;;  %v438_v7 = vpop.f32.mrb[45].mxu0 }
 0x186   :  { %v1621_v8 = vpack.c.bf16 %v580_v4, %v579_v52  ;;  %v439_v10 = vadd.f32 %v1538_v33, %v438_v7 }
 0x187   :  { %v582_v11 = vmax.f32 %v444_v6, 0.0 }
 0x188   :  { %v581_v59 = vmax.f32 %v439_v10, 0.0  ;;  %v1146_v12 = vpop.f32.mrb[46].mxu0 }
 0x189   :  { %v454_v13 = vadd.f32 %v1146_v12, %v1538_v33  ;;  %v448_v14 = vpop.f32.mrb[47].mxu0 }
 0x18a   :  { %v1625_v15 = vpack.c.bf16 %v582_v11, %v581_v59  ;;  %v449_v17 = vadd.f32 %v1538_v33, %v448_v14 }
 0x18b   :  { %v584_v18 = vmax.f32 %v454_v13, 0.0 }
 0x18c   :  { %v583_v2 = vmax.f32 %v449_v17, 0.0  ;;  %v1149_v19 = vpop.f32.mrb[48].mxu0  ;;  %v764_v17 = vld [vmem:[#allocation7] sm:$0xff] }
 0x18d   :  { %v464_v20 = vadd.f32 %v1149_v19, %v1538_v33  ;;  %v458_v21 = vpop.f32.mrb[49].mxu0  ;;  %v1437_v19 = vmov 0.0|0.0  }
 0x18e   :  { %v1629_v22 = vpack.c.bf16 %v584_v18, %v583_v2  ;;  %v459_v24 = vadd.f32 %v1538_v33, %v458_v21  ;;  %v765_v18 = vld [vmem:[#allocation7 + $0x8] sm:$0xff]  ;;  %v766_v2 = vld [vmem:[#allocation7 + $0x10] sm:$0xff]  ;;  %v768_v21 = vld [vmem:[#allocation7 + $0x20] sm:$0xff] }
 0x18f   :  { %v586_v25 = vmax.f32 %v464_v20, 0.0  ;;  %v767_v20 = vld [vmem:[#allocation7 + $0x18] sm:$0xff] }
 0x190   :  { %v585_v9 = vmax.f32 %v459_v24, 0.0  ;;  %v1152_v26 = vpop.f32.mrb[50].mxu0  ;;  %v769_v24 = vld [vmem:[#allocation7 + $0x28] sm:$0xff] }
 0x191   :  { %v474_v27 = vadd.f32 %v1152_v26, %v1538_v33  ;;  %v468_v28 = vpop.f32.mrb[51].mxu0  ;;  %v773_v26 = vld [vmem:[#allocation7 + $0x48] sm:$0xff] }
 0x192   :  { %v1270_v29 = vpack.c.bf16 %v586_v25, %v585_v9  ;;  %v469_v32 = vadd.f32 %v1538_v33, %v468_v28  ;;  %v770_v25 = vld [vmem:[#allocation7 + $0x30] sm:$0xff]  ;;  %v771_v9 = vld [vmem:[#allocation7 + $0x38] sm:$0xff] }
 0x193   :  { %v588_v34 = vmax.f32 %v474_v27, 0.0  ;;  %v774_v28 = vld [vmem:[#allocation7 + $0x50] sm:$0xff] }
 0x194   :  { %v587_v16 = vmax.f32 %v469_v32, 0.0  ;;  %v1155_v35 = vpop.f32.mrb[52].mxu0  ;;  %1271 = vmatprep.subr.bf16.mxu1 %v1270_v29  ;;  %v775_v29 = vld [vmem:[#allocation7 + $0x58] sm:$0xff] }
 0x195   :  { %v484_v36 = vadd.f32 %v1155_v35, %v1538_v33  ;;  %v478_v38 = vpop.f32.mrb[53].mxu0  ;;  %1273 = vmatpush3.bf16.msra.mxu1 %v1600_v37  ;;  %v1318_v32 = vpack.c.bf16 %v775_v29, %v774_v28 }
 0x196   :  { %v1274_v23 = vpack.c.bf16 %v588_v34, %v587_v16  ;;  %v479_v39 = vadd.f32 %v1538_v33, %v478_v38  ;;  %v776_v34 = vld [vmem:[#allocation7 + $0x60] sm:$0xff]  ;;  %v777_v16 = vld [vmem:[#allocation7 + $0x68] sm:$0xff]  ;;  %v779_v38 = vld [vmem:[#allocation7 + $0x78] sm:$0xff] }
 0x197   :  { %v590_v41 = vmax.f32 %v484_v36, 0.0  ;;  %v1321_v35 = vpack.c.bf16 %v777_v16, %v776_v34  ;;  %v778_v36 = vld [vmem:[#allocation7 + $0x70] sm:$0xff] }
 0x198   :  { %v589_v42 = vmax.f32 %v479_v39, 0.0  ;;  %v1158_v43 = vpop.f32.mrb[54].mxu0  ;;  %1275 = vmatprep.subr.bf16.mxu1 %v1274_v23  ;;  %v1324_v23 = vpack.c.bf16 %v779_v38, %v778_v36  ;;  %v1439_v39 = vmov 0.0  }
 0x199   :  { %v494_v30 = vadd.f32 %v1158_v43, %v1538_v33  ;;  %v488_v45 = vpop.f32.mrb[55].mxu0  ;;  %1277 = vmatpush3.bf16.msra.mxu1 %v1605_v44 }
 0x19a   :  { %v1278_v47 = vpack.c.bf16 %v590_v41, %v589_v42  ;;  %v489_v48 = vadd.f32 %v1538_v33, %v488_v45 }
 0x19b   :  { %v592_v49 = vmax.f32 %v494_v30, 0.0 }
 0x19c   :  { %v591_v50 = vmax.f32 %v489_v48, 0.0  ;;  %v1161_v53 = vpop.f32.mrb[56].mxu0  ;;  %1279 = vmatprep.subr.bf16.mxu1 %v1278_v47 }
 0x19d   :  { %v504_v37 = vadd.f32 %v1161_v53, %v1538_v33  ;;  %v498_v54 = vpop.f32.mrb[57].mxu0  ;;  %1281 = vmatpush3.bf16.msra.mxu1 %v1609_v51 }
 0x19e   :  { %v1282_v31 = vpack.c.bf16 %v592_v49, %v591_v50  ;;  %v499_v55 = vadd.f32 %v1538_v33, %v498_v54  ;;  %v875_v49 = vld [vmem:[%s1675_s5] ss:$0 sm:$0xff] }
 0x19f   :  { %v594_v56 = vmax.f32 %v504_v37, 0.0 }
 0x1a0   :  { %v593_v57 = vmax.f32 %v499_v55, 0.0  ;;  %v1164_v60 = vpop.f32.mrb[58].mxu0  ;;  %1283 = vmatprep.subr.bf16.mxu1 %v1282_v31 }
 0x1a1   :  { %v514_v44 = vadd.f32 %v1164_v60, %v1538_v33  ;;  %v508_v61 = vpop.f32.mrb[59].mxu0  ;;  %1285 = vmatpush3.bf16.msra.mxu1 %v1613_v58 }
 0x1a2   :  { %v1286_v46 = vpack.c.bf16 %v594_v56, %v593_v57  ;;  %v509_v62 = vadd.f32 %v1538_v33, %v508_v61 }
 0x1a3   :  { %v596_v63 = vmax.f32 %v514_v44, 0.0 }
 0x1a4   :  { %v595_v0 = vmax.f32 %v509_v62, 0.0  ;;  %v1167_v3 = vpop.f32.mrb[60].mxu0  ;;  %1287 = vmatprep.subr.bf16.mxu1 %v1286_v46 }
 0x1a5   :  { %v524_v51 = vadd.f32 %v1167_v3, %v1538_v33  ;;  %v518_v4 = vpop.f32.mrb[61].mxu0  ;;  %1289 = vmatpush3.bf16.msra.mxu1 %v1617_v1 }
 0x1a6   :  { %v1290_v52 = vpack.c.bf16 %v596_v63, %v595_v0  ;;  %v519_v5 = vadd.f32 %v1538_v33, %v518_v4 }
 0x1a7   :  { %v598_v6 = vmax.f32 %v524_v51, 0.0 }
 0x1a8   :  { %v597_v7 = vmax.f32 %v519_v5, 0.0  ;;  %v1170_v10 = vpop.f32.mrb[62].mxu0  ;;  %1291 = vmatprep.subr.bf16.mxu1 %v1290_v52 }
 0x1a9   :  { %v534_v58 = vadd.f32 %v1170_v10, %v1538_v33  ;;  %v528_v11 = vpop.f32.mrb[63].mxu0  ;;  %1293 = vmatpush3.bf16.msra.mxu1 %v1621_v8  ;;  %v1303_v8 = vpack.c.bf16 %v765_v18, %v764_v17 }
 0x1aa   :  { %v1294_v59 = vpack.c.bf16 %v598_v6, %v597_v7  ;;  %v529_v12 = vadd.f32 %v1538_v33, %v528_v11  ;;  %v1306_v33 = vpack.c.bf16 %v767_v20, %v766_v2 }
 0x1ab   :  { %v600_v13 = vmax.f32 %v534_v58, 0.0 }
 0x1ac   :  { %v599_v14 = vmax.f32 %v529_v12, 0.0  ;;  %1295 = vmatprep.subr.bf16.mxu1 %v1294_v59 }
 0x1ad   :  { %1297 = vmatpush3.bf16.msra.mxu1 %v1625_v15  ;;  %v1309_v15 = vpack.c.bf16 %v769_v24, %v768_v21 }
 0x1ae   :  { %v1298_v1 = vpack.c.bf16 %v600_v13, %v599_v14 }
 0x1b0   :  { %1299 = vmatprep.subr.bf16.mxu1 %v1298_v1 }
 0x1b1   :  { %1301 = vmatpush3.bf16.msra.mxu1 %v1629_v22  ;;  %v1312_v22 = vpack.c.bf16 %v771_v9, %v770_v25 }
 0x1b2   :  { %1302 = vmatprep.subr.bf16.mxu1 %v1437_v19 }
 0x1b4   :  { %759 = vmatmul.mubr.f32.vlgmr.msra.gmra.mrb[2].mxu1 %v1542_v40  ;;  %v772_v40 = vld [vmem:[#allocation7 + $0x40] sm:$0xff] }
 0x1b5   :  { %1304 = vmatpush3.bf16.msra.mxu1 %v1303_v8  ;;  %v1315_v27 = vpack.c.bf16 %v773_v26, %v772_v40  ;;  %1203 = vmatprep.mubr.msk.f32.mxu1 %vm1438_vm0, %v1439_v39 }
 0x1b6   :  { %1305 = vmatprep.subr.bf16.mxu1 %v1437_v19 }
 0x1b9   :  { %1307 = vmatpush3.bf16.msra.mxu1 %v1306_v33 }
 0x1ba   :  { %1308 = vmatprep.subr.bf16.mxu1 %v1437_v19 }
 0x1bd   :  { %1310 = vmatpush3.bf16.msra.mxu1 %v1309_v15 }
 0x1be   :  { %1311 = vmatprep.subr.bf16.mxu1 %v1437_v19 }
 0x1c1   :  { %1313 = vmatpush3.bf16.msra.mxu1 %v1312_v22 }
 0x1c2   :  { %1314 = vmatprep.subr.bf16.mxu1 %v1437_v19 }
 0x1c5   :  { %1316 = vmatpush3.bf16.msra.mxu1 %v1315_v27 }
 0x1c6   :  { %1317 = vmatprep.subr.bf16.mxu1 %v1437_v19 }
 0x1c9   :  { %1319 = vmatpush3.bf16.msra.mxu1 %v1318_v32 }
 0x1ca   :  { %1320 = vmatprep.subr.bf16.mxu1 %v1437_v19 }
 0x1cd   :  { %1322 = vmatpush3.bf16.msra.mxu1 %v1321_v35 }
 0x1ce   :  { %1323 = vmatprep.subr.bf16.mxu1 %v1437_v19 }
 0x1d1   :  { %1325 = vmatpush3.bf16.msra.mxu1 %v1324_v23 }
 0x247   :  { %v988_v41 = vpop.f32.mrb[0].mxu1 }
 0x248   :  { %v989_v42 = vpop.f32.mrb[1].mxu1 }
 0x249   :  { %v990_v43 = vadd.f32 %v989_v42, %v988_v41 }
 0x287   :  { %v1023_v30 = vpop.f32.mrb[2].mxu1 }
 0x288   :  { %v1024_v45 = vpop.f32.mrb[3].mxu1 }
 0x289   :  { %v1025_v47 = vadd.f32 %v1024_v45, %v1023_v30 }
 0x28b   :  { %v761_v48 = vadd.f32 %v1025_v47, %v990_v43 }
 0x28d   :  { %1204 = vmatmul.mubr.f32.vlgmr.msra.gmra.mrb[4].mxu1 %v761_v48 }
 0x360   :  { %v853_v50 = vpop.f32.mrb[4].mxu1 }
 0x361   :  { %v854_v53 = vadd.f32 %v875_v49, %v853_v50  ;;  %v1205_v37 = vpop.f32.mrb[5].mxu1 }
 0x363   :  { %857 = vst [vmem:[#allocation8] sm:$0x3] %v854_v53 }
 0x364   :  { %1414 = shalt.err (!%p1411_p0)
}
 0x365   :  { %s1415_s17 = scalar_lea.hbm %s1676_s6, 32 }
 0x366   :  { %p1416_p1 = scmp.ne.s32.totalorder %s1676_s6, %s1415_s17  ;;  %p1419_p2 = scmp.lt.u32.totalorder %s1415_s17, %s1676_s6 }
 0x368   :  { %p1421_p3 = pnand %p1419_p2, %p1416_p1 }
 0x36a   :  { %1424 = shalt.err (!%p1421_p3)
}
 0x36b   :  { %867 = dma.vmem_to_hbm [thread:$0]  %s865_s13, 32, %s1676_s6, [#allocation4]  }
 0x36c   :  { %1429 = dma.done.wait [#allocation4], 32  }
 0x36d   :  { %1430 = vsyncadd [#allocation4], 4294967264 }
 0x36e   :  { %871 = vsyncpa [#allocation3], 1 }
 0x36f   :  { %872 = vsyncpa [#allocation6], 1 }
 0x370   :  { %873 = vsyncpa [#allocation4], 1 }

</bundles_post_ra>
